<compile_context>
chip_gen: v5e
topology: v5e:2x2
jax: 0.10.0
libtpu: 0.0.40
codegen_flags: <defaults>
</compile_context>

<pallas_src>
import functools

import jax
import jax.numpy as jnp
from jax.experimental import pallas as pl
from jax.experimental.pallas import tpu as pltpu

LRELU_SLOPE = 0.2
BN_EPS = 1e-5


# ----------------------------- Pallas kernels ------------------------------ #

def _conv_bias_act_kernel(p_ref, w_ref, b_ref, o_ref, *, apply_act):
    """conv (im2col matmul, bf16 operands / f32 acc) + bias [+ LeakyReLU].
    Blocks: p (tm, Kp) bf16, w (Kp, Np) bf16, b (1, Np) f32 -> o (tm, Np)."""
    y = jnp.dot(p_ref[...], w_ref[...], preferred_element_type=jnp.float32)
    y = y + b_ref[...]
    if apply_act:
        y = jnp.where(y >= 0, y, LRELU_SLOPE * y)
    o_ref[...] = y.astype(o_ref.dtype)


def _conv_bn_lrelu_kernel(p_ref, w_ref, g_ref, be_ref, o_ref,
                          y_ref, sum_ref, sq_ref, *, m_true, tile_m):
    """conv + training-mode BatchNorm + LeakyReLU, 2-phase grid (2, nt).

    phase 0: conv tile ONCE (bf16 MXU, f32 acc), cache it in VMEM scratch
             y_ref[t], accumulate per-channel sum / sum-of-squares (padded
             rows masked), finalize mean & rsqrt(var+eps) on the last tile.
             The raw tile is also stored to o_ref so every visited output
             block is initialized (phase-1 writes are the final writeback).
    phase 1: read the cached tile, normalize + affine + LeakyReLU, store.
    Conv bias is intentionally absent: it cancels under batch-mean subtraction.
    """
    phase = pl.program_id(0)
    t = pl.program_id(1)
    nt = pl.num_programs(1)

    @pl.when(phase == 0)
    def _():
        y = jnp.dot(p_ref[...], w_ref[...], preferred_element_type=jnp.float32)
        y_ref[t] = y                          # cache conv output in VMEM
        o_ref[...] = y.astype(o_ref.dtype)    # keep output block initialized

        @pl.when(t == 0)
        def _():
            sum_ref[...] = jnp.zeros_like(sum_ref)
            sq_ref[...] = jnp.zeros_like(sq_ref)

        if m_true % tile_m == 0:              # static: no padded rows
            ym = y
        else:                                 # mask padded rows out of stats
            row = (t * tile_m
                   + jax.lax.broadcasted_iota(jnp.int32, (tile_m, 1), 0))
            ym = jnp.where(row < m_true, y, 0.0)
        sum_ref[...] = sum_ref[...] + jnp.sum(ym, axis=0, keepdims=True)
        sq_ref[...] = sq_ref[...] + jnp.sum(ym * ym, axis=0, keepdims=True)

        @pl.when(t == nt - 1)
        def _():
            inv_m = jnp.float32(1.0 / m_true)
            mean = sum_ref[...] * inv_m
            var = sq_ref[...] * inv_m - mean * mean
            sum_ref[...] = mean                        # reuse scratch: mean
            sq_ref[...] = jax.lax.rsqrt(var + BN_EPS)  # reuse scratch: rstd

    @pl.when(phase == 1)
    def _():
        y = y_ref[t]
        yn = (y - sum_ref[...]) * sq_ref[...]
        yn = g_ref[...] * yn + be_ref[...]
        o_ref[...] = jnp.where(yn >= 0, yn, LRELU_SLOPE * yn).astype(o_ref.dtype)


# ------------------------------ JAX glue ----------------------------------- #

def _round_up(x, m):
    return (x + m - 1) // m * m


def _vmem_budgets():
    """(vmem_limit_bytes, block_set_budget, max_tile_m), generation-aware."""
    vmem = 0
    try:
        info = pltpu.get_tpu_info()
        vmem = int(getattr(info, "vmem_capacity_bytes", 0) or 0)
    except Exception:
        vmem = 0
    if vmem >= 96 * 1024 * 1024:               # v5e / v6e: 128 MiB VMEM
        return 64 * 1024 * 1024, 24 * 1024 * 1024, 1024
    # v7x (64 MiB, 2 TCs share it) or unknown: stay conservative.
    return 32 * 1024 * 1024, 8 * 1024 * 1024, 512


def _im2col_nhwc(x, kh, kw, stride, pad):
    """x: (B, H, W, C) -> patches (B*Ho*Wo, kh*kw*C), Ho, Wo.
    K order = (kh, kw, C); M order = (B, Ho, Wo)."""
    B, H, W, C = x.shape
    xp = jnp.pad(x, ((0, 0), (pad, pad), (pad, pad), (0, 0)))
    Ho = (H + 2 * pad - kh) // stride + 1
    Wo = (W + 2 * pad - kw) // stride + 1
    cols = []
    for di in range(kh):
        for dj in range(kw):
            cols.append(xp[:, di:di + (Ho - 1) * stride + 1:stride,
                            dj:dj + (Wo - 1) * stride + 1:stride, :])
    p = jnp.stack(cols, axis=3)                       # (B, Ho, Wo, kh*kw, C)
    p = p.reshape(B * Ho * Wo, kh * kw * C)
    return p, Ho, Wo


def _prep_weight(w, k_pad, n_pad):
    """(C_out, C_in, kh, kw) -> bf16 (k_pad, n_pad), zero-padded."""
    c_out, c_in, kh, kw = w.shape
    wm = jnp.transpose(w, (2, 3, 1, 0)).reshape(kh * kw * c_in, c_out)
    wm = jnp.pad(wm.astype(jnp.float32),
                 ((0, k_pad - kh * kw * c_in), (0, n_pad - c_out)))
    return wm.astype(jnp.bfloat16)


def _pad_row(v, n_pad, fill):
    n = v.shape[0]
    row = v.reshape(1, n).astype(jnp.float32)
    if n_pad > n:
        row = jnp.pad(row, ((0, 0), (0, n_pad - n)), constant_values=fill)
    return row


def _pick_tile_m(M, k_pad, n_pad, out_bytes, extra_bytes, max_tile, budget):
    """Largest tile_m (multiple of 16, <= max_tile) whose double-buffered block
    set (+ any persistent scratch) fits the per-call VMEM budget."""
    tile = min(max_tile, _round_up(M, 16))

    def block_bytes(t):
        return (2 * 2 * t * k_pad              # p blocks, bf16, double-buffered
                + 2 * k_pad * n_pad            # weight block, bf16
                + 2 * out_bytes * t * n_pad    # out blocks, double-buffered
                + extra_bytes)                 # persistent VMEM scratch

    while tile > 16 and block_bytes(tile) > budget:
        tile = _round_up(tile // 2, 16)
    return max(tile, 16)


def conv2d_pallas(x_nhwc, w, b, stride, pad, *, gamma=None, beta=None,
                  apply_act=True, out_dtype=jnp.float32):
    """One Discriminator layer: conv [+ bias] [+ BN(batch stats)] [+ LeakyReLU].

    x_nhwc: (B, H, W, C_in) -> (B, Ho, Wo, C_out).  Works on the im2col patch
    matrix, tiled over M = B*Ho*Wo; K and C_out are zero-padded to multiples
    of 128 (lane-dense loads/stores); MXU operands are bf16, accumulation f32.
    For BN layers the bias is dropped (cancels under batch-mean subtraction).
    """
    c_out = w.shape[0]
    kh, kw = w.shape[2], w.shape[3]
    B = x_nhwc.shape[0]

    vmem_limit, block_budget, max_tile_m = _vmem_budgets()

    p, Ho, Wo = _im2col_nhwc(x_nhwc, kh, kw, stride, pad)
    M, K = p.shape

    n_pad = max(128, _round_up(c_out, 128))
    k_pad = max(128, _round_up(K, 128))

    wm = _prep_weight(w, k_pad, n_pad)
    p = p.astype(jnp.bfloat16)
    if k_pad != K:
        p = jnp.pad(p, ((0, 0), (0, k_pad - K)))

    out_bytes = jnp.dtype(out_dtype).itemsize
    y_cache_bytes = 0 if gamma is None else 4 * _round_up(M, 16) * n_pad
    tile_m = _pick_tile_m(M, k_pad, n_pad, out_bytes, y_cache_bytes,
                          max_tile_m, block_budget)
    m_pad = _round_up(M, tile_m)
    if m_pad != M:
        p = jnp.pad(p, ((0, m_pad - M), (0, 0)))
    nt = m_pad // tile_m

    if gamma is None:
        bm = _pad_row(b, n_pad, 0.0)
        out = pl.pallas_call(
            functools.partial(_conv_bias_act_kernel, apply_act=apply_act),
            out_shape=jax.ShapeDtypeStruct((m_pad, n_pad), out_dtype),
            grid=(nt,),
            in_specs=[pl.BlockSpec((tile_m, k_pad), lambda i: (i, 0)),
                      pl.BlockSpec((k_pad, n_pad), lambda i: (0, 0)),
                      pl.BlockSpec((1, n_pad), lambda i: (0, 0))],
            out_specs=pl.BlockSpec((tile_m, n_pad), lambda i: (i, 0)),
            compiler_params=pltpu.CompilerParams(
                dimension_semantics=("parallel",),
                vmem_limit_bytes=vmem_limit),
        )(p, wm, bm)
    else:
        gm = _pad_row(gamma, n_pad, 1.0)
        em = _pad_row(beta, n_pad, 0.0)
        kern = functools.partial(_conv_bn_lrelu_kernel, m_true=M, tile_m=tile_m)
        out = pl.pallas_call(
            kern,
            out_shape=jax.ShapeDtypeStruct((m_pad, n_pad), out_dtype),
            grid=(2, nt),       # (phase, M-tile); phases sequential
            in_specs=[
                # p only needed in phase 0; keep a constant block in phase 1
                # so it is fetched at most once more.
                pl.BlockSpec((tile_m, k_pad), lambda ph, t: (t * (1 - ph), 0)),
                pl.BlockSpec((k_pad, n_pad), lambda ph, t: (0, 0)),
                pl.BlockSpec((1, n_pad), lambda ph, t: (0, 0)),
                pl.BlockSpec((1, n_pad), lambda ph, t: (0, 0))],
            out_specs=pl.BlockSpec((tile_m, n_pad), lambda ph, t: (t, 0)),
            scratch_shapes=[pltpu.VMEM((nt, tile_m, n_pad), jnp.float32),  # y cache
                            pltpu.VMEM((1, n_pad), jnp.float32),   # sum / mean
                            pltpu.VMEM((1, n_pad), jnp.float32)],  # sumsq / rstd
            compiler_params=pltpu.CompilerParams(
                dimension_semantics=("arbitrary", "arbitrary"),
                vmem_limit_bytes=vmem_limit),
        )(p, wm, gm, em)

    out = out[:M, :c_out].reshape(B, Ho, Wo, c_out)
    return out


# ----------------------------- Discriminator ------------------------------- #

def init_params(key, latent_dim=16, in_channel=3, std=0.02):
    ks = jax.random.split(key, 5)

    def w(k, cout, cin):
        return std * jax.random.normal(k, (cout, cin, 4, 4), jnp.float32)

    ld = latent_dim
    return {
        "w1": w(ks[0], ld, in_channel), "b1": jnp.zeros((ld,), jnp.float32),
        "w2": w(ks[1], ld * 2, ld), "b2": jnp.zeros((ld * 2,), jnp.float32),
        "g2": jnp.ones((ld * 2,), jnp.float32), "be2": jnp.zeros((ld * 2,), jnp.float32),
        "w3": w(ks[2], ld * 4, ld * 2), "b3": jnp.zeros((ld * 4,), jnp.float32),
        "g3": jnp.ones((ld * 4,), jnp.float32), "be3": jnp.zeros((ld * 4,), jnp.float32),
        "w4": w(ks[3], ld * 8, ld * 4), "b4": jnp.zeros((ld * 8,), jnp.float32),
        "g4": jnp.ones((ld * 8,), jnp.float32), "be4": jnp.zeros((ld * 8,), jnp.float32),
        "w5": w(ks[4], 1, ld * 8), "b5": jnp.zeros((1,), jnp.float32),
    }


def discriminator_forward(params, x):
    """x: (B, C, H, W) NCHW (PyTorch layout) -> (B, 1)."""
    x = jnp.transpose(x, (0, 2, 3, 1))            # NCHW -> NHWC, once
    x = conv2d_pallas(x, params["w1"], params["b1"], 2, 1,
                      apply_act=True, out_dtype=jnp.bfloat16)
    # Conv bias omitted on BN layers: exact cancellation under batch-mean sub.
    x = conv2d_pallas(x, params["w2"], None, 2, 1,
                      gamma=params["g2"], beta=params["be2"],
                      out_dtype=jnp.bfloat16)
    x = conv2d_pallas(x, params["w3"], None, 2, 1,
                      gamma=params["g3"], beta=params["be3"],
                      out_dtype=jnp.bfloat16)
    x = conv2d_pallas(x, params["w4"], None, 2, 1,
                      gamma=params["g4"], beta=params["be4"],
                      out_dtype=jnp.bfloat16)
    x = conv2d_pallas(x, params["w5"], params["b5"], 1, 0,
                      apply_act=False, out_dtype=jnp.float32)
    return x.reshape(x.shape[0], 1)               # .view(B, 1)


# Plain-JAX reference (correctness check only).
def reference_forward(params, x):
    def conv(x, w, b, stride, pad):
        y = jax.lax.conv_general_dilated(
            x, w, (stride, stride), [(pad, pad), (pad, pad)],
            dimension_numbers=("NCHW", "OIHW", "NCHW"),
            precision=jax.lax.Precision.HIGHEST)
        return y + b[None, :, None, None]

    def bn(x, g, be):
        mean = jnp.mean(x, axis=(0, 2, 3), keepdims=True)
        var = jnp.mean(jnp.square(x - mean), axis=(0, 2, 3), keepdims=True)
        xh = (x - mean) * jax.lax.rsqrt(var + BN_EPS)
        return g[None, :, None, None] * xh + be[None, :, None, None]

    def lrelu(x):
        return jnp.where(x >= 0, x, LRELU_SLOPE * x)

    x = lrelu(conv(x, params["w1"], params["b1"], 2, 1))
    x = lrelu(bn(conv(x, params["w2"], params["b2"], 2, 1), params["g2"], params["be2"]))
    x = lrelu(bn(conv(x, params["w3"], params["b3"], 2, 1), params["g3"], params["be3"]))
    x = lrelu(bn(conv(x, params["w4"], params["b4"], 2, 1), params["g4"], params["be4"]))
    x = conv(x, params["w5"], params["b5"], 1, 0)
    return x.reshape(x.shape[0], 1)


if __name__ == "__main__":
    key = jax.random.PRNGKey(0)
    kp, kx = jax.random.split(key)

    # small latent_dim; 64x64 input so conv5 (4x4, stride 1, pad 0) -> 1x1
    latent_dim, in_channel = 16, 3
    params = init_params(kp, latent_dim=latent_dim, in_channel=in_channel)
    x = jax.random.normal(kx, (2, in_channel, 64, 64), jnp.float32)

    fwd = jax.jit(discriminator_forward)
    out = jax.block_until_ready(fwd(params, x))
    assert out.shape == (2, 1), out.shape

    ref = reference_forward(params, x)
    err = float(jnp.max(jnp.abs(out - ref)))
    # bf16 MXU operands (f32 accumulation) vs f32-HIGHEST reference: expected
    # max-abs error is a few 1e-3 on |out| ~ 0.5; gate with margin while still
    # catching real bugs (which produce O(0.1+) errors).
    assert err < 2.5e-2, f"max abs err {err}"

    print("KERNEL_OK")
</pallas_src>

<mosaic_0001>
module attributes {stable_mosaic.version = 11 : i64} {
  func.func @_conv_bias_act_kernel(%arg0: i32, %arg1: memref<512x128xbf16, #tpu.memory_space<vmem>>, %arg2: memref<128x128xbf16, #tpu.memory_space<vmem>>, %arg3: memref<1x128xf32, #tpu.memory_space<vmem>>, %arg4: memref<512x128xbf16, #tpu.memory_space<vmem>>) attributes {dimension_semantics = [#tpu.dimension_semantics<parallel>], iteration_bounds = array<i64: 4>, scalar_prefetch = 0 : i64, scratch_operands = 0 : i64, tpu.core_type = #tpu.core_type<tc>, window_params = [{transform_indices = @transform_0, window_bounds = array<i64: 512, 128>}, {pipeline_mode = #tpu.pipeline_mode<synchronous>, transform_indices = @transform_1, window_bounds = array<i64: 128, 128>}, {pipeline_mode = #tpu.pipeline_mode<synchronous>, transform_indices = @transform_2, window_bounds = array<i64: 1, 128>}, {transform_indices = @transform_3, window_bounds = array<i64: 512, 128>}]} {
    %c0 = arith.constant 0 : index
    %c0_0 = arith.constant 0 : index
    %0 = vector.load %arg1[%c0, %c0_0] : memref<512x128xbf16, #tpu.memory_space<vmem>>, vector<512x128xbf16>
    %c0_1 = arith.constant 0 : index
    %c0_2 = arith.constant 0 : index
    %1 = vector.load %arg2[%c0_1, %c0_2] : memref<128x128xbf16, #tpu.memory_space<vmem>>, vector<128x128xbf16>
    %cst = arith.constant dense<0.000000e+00> : vector<512x128xf32>
    %2 = tpu.matmul %0, %1, %cst {dimension_numbers = #tpu.dot_dimension_numbers<[1], [0], [0], [1], [0, 0, 1, 1], [], []>} : vector<512x128xbf16>, vector<128x128xbf16>, vector<512x128xf32> -> vector<512x128xf32>
    %c0_3 = arith.constant 0 : index
    %c0_4 = arith.constant 0 : index
    %3 = vector.load %arg3[%c0_3, %c0_4] : memref<1x128xf32, #tpu.memory_space<vmem>>, vector<1x128xf32>
    %4 = vector.broadcast %3 : vector<1x128xf32> to vector<512x128xf32>
    %5 = arith.addf %2, %4 : vector<512x128xf32>
    %cst_5 = arith.constant 0.000000e+00 : f32
    %6 = vector.broadcast %cst_5 : f32 to vector<512x128xf32>
    %7 = arith.cmpf oge, %5, %6 : vector<512x128xf32>
    %cst_6 = arith.constant 2.000000e-01 : f32
    %8 = vector.broadcast %cst_6 : f32 to vector<512x128xf32>
    %9 = arith.mulf %8, %5 : vector<512x128xf32>
    %10 = arith.select %7, %5, %9 : vector<512x128xi1>, vector<512x128xf32>
    %11 = arith.truncf %10 : vector<512x128xf32> to vector<512x128xbf16>
    %c0_7 = arith.constant 0 : index
    %c0_8 = arith.constant 0 : index
    %12 = vector.load %arg4[%c0_7, %c0_8] : memref<512x128xbf16, #tpu.memory_space<vmem>>, vector<512x128xbf16>
    tpu.vector_store %arg4[%c0_7, %c0_8], %11 {strides = array<i32>} : memref<512x128xbf16, #tpu.memory_space<vmem>>, vector<512x128xbf16>,
    return
  }
  func.func @transform_0(%arg0: i32) -> (i32, i32) {
    %c0_i32 = arith.constant 0 : i32
    %c0_i32_0 = arith.constant 0 : i32
    return %arg0, %c0_i32 : i32, i32
  }
  func.func @transform_1(%arg0: i32) -> (i32, i32) {
    %c0_i32 = arith.constant 0 : i32
    %c0_i32_0 = arith.constant 0 : i32
    %c0_i32_1 = arith.constant 0 : i32
    return %c0_i32, %c0_i32_0 : i32, i32
  }
  func.func @transform_2(%arg0: i32) -> (i32, i32) {
    %c0_i32 = arith.constant 0 : i32
    %c0_i32_0 = arith.constant 0 : i32
    %c0_i32_1 = arith.constant 0 : i32
    return %c0_i32, %c0_i32_0 : i32, i32
  }
  func.func @transform_3(%arg0: i32) -> (i32, i32) {
    %c0_i32 = arith.constant 0 : i32
    %c0_i32_0 = arith.constant 0 : i32
    return %arg0, %c0_i32 : i32, i32
  }
}

module attributes {stable_mosaic.version = 11 : i64} {
  func.func @_conv_bn_lrelu_kernel(%arg0: i32, %arg1: i32, %arg2: memref<512x256xbf16, #tpu.memory_space<vmem>>, %arg3: memref<256x128xbf16, #tpu.memory_space<vmem>>, %arg4: memref<1x128xf32, #tpu.memory_space<vmem>>, %arg5: memref<1x128xf32, #tpu.memory_space<vmem>>, %arg6: memref<512x128xbf16, #tpu.memory_space<vmem>>, %arg7: memref<1x512x128xf32, #tpu.memory_space<vmem>>, %arg8: memref<1x128xf32, #tpu.memory_space<vmem>>, %arg9: memref<1x128xf32, #tpu.memory_space<vmem>>) attributes {dimension_semantics = [#tpu.dimension_semantics<arbitrary>, #tpu.dimension_semantics<arbitrary>], iteration_bounds = array<i64: 2, 1>, scalar_prefetch = 0 : i64, scratch_operands = 3 : i64, tpu.core_type = #tpu.core_type<tc>, window_params = [{transform_indices = @transform_0, window_bounds = array<i64: 512, 256>}, {pipeline_mode = #tpu.pipeline_mode<synchronous>, transform_indices = @transform_1, window_bounds = array<i64: 256, 128>}, {pipeline_mode = #tpu.pipeline_mode<synchronous>, transform_indices = @transform_2, window_bounds = array<i64: 1, 128>}, {pipeline_mode = #tpu.pipeline_mode<synchronous>, transform_indices = @transform_3, window_bounds = array<i64: 1, 128>}, {transform_indices = @transform_4, window_bounds = array<i64: 512, 128>}]} {
    %c0_i32 = arith.constant 0 : i32
    %0 = arith.cmpi eq, %arg0, %c0_i32 : i32
    %1 = arith.extui %0 : i1 to i32
    %c0_i32_0 = arith.constant 0 : i32
    %2 = arith.cmpi ne, %1, %c0_i32_0 : i32
    scf.if %2 {
      %c0 = arith.constant 0 : index
      %c0_2 = arith.constant 0 : index
      %6 = vector.load %arg2[%c0, %c0_2] : memref<512x256xbf16, #tpu.memory_space<vmem>>, vector<512x256xbf16>
      %c0_3 = arith.constant 0 : index
      %c0_4 = arith.constant 0 : index
      %7 = vector.load %arg3[%c0_3, %c0_4] : memref<256x128xbf16, #tpu.memory_space<vmem>>, vector<256x128xbf16>
      %cst = arith.constant dense<0.000000e+00> : vector<512x128xf32>
      %8 = tpu.matmul %6, %7, %cst {dimension_numbers = #tpu.dot_dimension_numbers<[1], [0], [0], [1], [0, 0, 1, 1], [], []>} : vector<512x256xbf16>, vector<256x128xbf16>, vector<512x128xf32> -> vector<512x128xf32>
      %9 = arith.index_cast %arg1 : i32 to index
      %c0_5 = arith.constant 0 : index
      %c0_6 = arith.constant 0 : index
      %10 = vector.load %arg7[%9, %c0_5, %c0_6] : memref<1x512x128xf32, #tpu.memory_space<vmem>>, vector<1x512x128xf32>
      %11 = vector.shape_cast %10 : vector<1x512x128xf32> to vector<512x128xf32>
      %12 = vector.shape_cast %8 : vector<512x128xf32> to vector<1x512x128xf32>
      tpu.vector_store %arg7[%9, %c0_5, %c0_6], %12 {strides = array<i32>} : memref<1x512x128xf32, #tpu.memory_space<vmem>>, vector<1x512x128xf32>,
      %13 = arith.truncf %8 : vector<512x128xf32> to vector<512x128xbf16>
      %c0_7 = arith.constant 0 : index
      %c0_8 = arith.constant 0 : index
      %14 = vector.load %arg6[%c0_7, %c0_8] : memref<512x128xbf16, #tpu.memory_space<vmem>>, vector<512x128xbf16>
      tpu.vector_store %arg6[%c0_7, %c0_8], %13 {strides = array<i32>} : memref<512x128xbf16, #tpu.memory_space<vmem>>, vector<512x128xbf16>,
      %c0_i32_9 = arith.constant 0 : i32
      %15 = arith.cmpi eq, %arg1, %c0_i32_9 : i32
      %16 = arith.extui %15 : i1 to i32
      %c0_i32_10 = arith.constant 0 : i32
      %17 = arith.cmpi ne, %16, %c0_i32_10 : i32
      scf.if %17 {
        %cst_23 = arith.constant 0.000000e+00 : f32
        %32 = vector.broadcast %cst_23 : f32 to vector<1x128xf32>
        %c0_24 = arith.constant 0 : index
        %c0_25 = arith.constant 0 : index
        %33 = vector.load %arg8[%c0_24, %c0_25] : memref<1x128xf32, #tpu.memory_space<vmem>>, vector<1x128xf32>
        tpu.vector_store %arg8[%c0_24, %c0_25], %32 {strides = array<i32>} : memref<1x128xf32, #tpu.memory_space<vmem>>, vector<1x128xf32>,
        %cst_26 = arith.constant 0.000000e+00 : f32
        %34 = vector.broadcast %cst_26 : f32 to vector<1x128xf32>
        %c0_27 = arith.constant 0 : index
        %c0_28 = arith.constant 0 : index
        %35 = vector.load %arg9[%c0_27, %c0_28] : memref<1x128xf32, #tpu.memory_space<vmem>>, vector<1x128xf32>
        tpu.vector_store %arg9[%c0_27, %c0_28], %34 {strides = array<i32>} : memref<1x128xf32, #tpu.memory_space<vmem>>, vector<1x128xf32>,
      } else {
      }
      %c0_11 = arith.constant 0 : index
      %c0_12 = arith.constant 0 : index
      %18 = vector.load %arg8[%c0_11, %c0_12] : memref<1x128xf32, #tpu.memory_space<vmem>>, vector<1x128xf32>
      %cst_13 = arith.constant dense<0.000000e+00> : vector<128xf32>
      %19 = vector.multi_reduction <add>, %8, %cst_13 [0] : vector<512x128xf32> to vector<128xf32>
      %20 = vector.shape_cast %19 : vector<128xf32> to vector<1x128xf32>
      %21 = arith.addf %18, %20 : vector<1x128xf32>
      %c0_14 = arith.constant 0 : index
      %c0_15 = arith.constant 0 : index
      %22 = vector.load %arg8[%c0_14, %c0_15] : memref<1x128xf32, #tpu.memory_space<vmem>>, vector<1x128xf32>
      tpu.vector_store %arg8[%c0_14, %c0_15], %21 {strides = array<i32>} : memref<1x128xf32, #tpu.memory_space<vmem>>, vector<1x128xf32>,
      %c0_16 = arith.constant 0 : index
      %c0_17 = arith.constant 0 : index
      %23 = vector.load %arg9[%c0_16, %c0_17] : memref<1x128xf32, #tpu.memory_space<vmem>>, vector<1x128xf32>
      %24 = arith.mulf %8, %8 : vector<512x128xf32>
      %cst_18 = arith.constant dense<0.000000e+00> : vector<128xf32>
      %25 = vector.multi_reduction <add>, %24, %cst_18 [0] : vector<512x128xf32> to vector<128xf32>
      %26 = vector.shape_cast %25 : vector<128xf32> to vector<1x128xf32>
      %27 = arith.addf %23, %26 : vector<1x128xf32>
      %c0_19 = arith.constant 0 : index
      %c0_20 = arith.constant 0 : index
      %28 = vector.load %arg9[%c0_19, %c0_20] : memref<1x128xf32, #tpu.memory_space<vmem>>, vector<1x128xf32>
      tpu.vector_store %arg9[%c0_19, %c0_20], %27 {strides = array<i32>} : memref<1x128xf32, #tpu.memory_space<vmem>>, vector<1x128xf32>,
      %c0_i32_21 = arith.constant 0 : i32
      %29 = arith.cmpi eq, %arg1, %c0_i32_21 : i32
      %30 = arith.extui %29 : i1 to i32
      %c0_i32_22 = arith.constant 0 : i32
      %31 = arith.cmpi ne, %30, %c0_i32_22 : i32
      scf.if %31 {
        %c0_23 = arith.constant 0 : index
        %c0_24 = arith.constant 0 : index
        %32 = vector.load %arg8[%c0_23, %c0_24] : memref<1x128xf32, #tpu.memory_space<vmem>>, vector<1x128xf32>
        %cst_25 = arith.constant 0.001953125 : f32
        %33 = vector.broadcast %cst_25 : f32 to vector<1x128xf32>
        %34 = arith.mulf %32, %33 : vector<1x128xf32>
        %c0_26 = arith.constant 0 : index
        %c0_27 = arith.constant 0 : index
        %35 = vector.load %arg9[%c0_26, %c0_27] : memref<1x128xf32, #tpu.memory_space<vmem>>, vector<1x128xf32>
        %cst_28 = arith.constant 0.001953125 : f32
        %36 = vector.broadcast %cst_28 : f32 to vector<1x128xf32>
        %37 = arith.mulf %35, %36 : vector<1x128xf32>
        %38 = arith.mulf %34, %34 : vector<1x128xf32>
        %39 = arith.subf %37, %38 : vector<1x128xf32>
        %c0_29 = arith.constant 0 : index
        %c0_30 = arith.constant 0 : index
        %40 = vector.load %arg8[%c0_29, %c0_30] : memref<1x128xf32, #tpu.memory_space<vmem>>, vector<1x128xf32>
        tpu.vector_store %arg8[%c0_29, %c0_30], %34 {strides = array<i32>} : memref<1x128xf32, #tpu.memory_space<vmem>>, vector<1x128xf32>,
        %cst_31 = arith.constant 9.99999974E-6 : f32
        %41 = vector.broadcast %cst_31 : f32 to vector<1x128xf32>
        %42 = arith.addf %39, %41 : vector<1x128xf32>
        %43 = math.rsqrt %42 : vector<1x128xf32>
        %c0_32 = arith.constant 0 : index
        %c0_33 = arith.constant 0 : index
        %44 = vector.load %arg9[%c0_32, %c0_33] : memref<1x128xf32, #tpu.memory_space<vmem>>, vector<1x128xf32>
        tpu.vector_store %arg9[%c0_32, %c0_33], %43 {strides = array<i32>} : memref<1x128xf32, #tpu.memory_space<vmem>>, vector<1x128xf32>,
      } else {
      }
    } else {
    }
    %c1_i32 = arith.constant 1 : i32
    %3 = arith.cmpi eq, %arg0, %c1_i32 : i32
    %4 = arith.extui %3 : i1 to i32
    %c0_i32_1 = arith.constant 0 : i32
    %5 = arith.cmpi ne, %4, %c0_i32_1 : i32
    scf.if %5 {
      %6 = arith.index_cast %arg1 : i32 to index
      %c0 = arith.constant 0 : index
      %c0_2 = arith.constant 0 : index
      %7 = vector.load %arg7[%6, %c0, %c0_2] : memref<1x512x128xf32, #tpu.memory_space<vmem>>, vector<1x512x128xf32>
      %8 = vector.shape_cast %7 : vector<1x512x128xf32> to vector<512x128xf32>
      %c0_3 = arith.constant 0 : index
      %c0_4 = arith.constant 0 : index
      %9 = vector.load %arg8[%c0_3, %c0_4] : memref<1x128xf32, #tpu.memory_space<vmem>>, vector<1x128xf32>
      %10 = vector.broadcast %9 : vector<1x128xf32> to vector<512x128xf32>
      %11 = arith.subf %8, %10 : vector<512x128xf32>
      %c0_5 = arith.constant 0 : index
      %c0_6 = arith.constant 0 : index
      %12 = vector.load %arg9[%c0_5, %c0_6] : memref<1x128xf32, #tpu.memory_space<vmem>>, vector<1x128xf32>
      %13 = vector.broadcast %12 : vector<1x128xf32> to vector<512x128xf32>
      %14 = arith.mulf %11, %13 : vector<512x128xf32>
      %c0_7 = arith.constant 0 : index
      %c0_8 = arith.constant 0 : index
      %15 = vector.load %arg4[%c0_7, %c0_8] : memref<1x128xf32, #tpu.memory_space<vmem>>, vector<1x128xf32>
      %16 = vector.broadcast %15 : vector<1x128xf32> to vector<512x128xf32>
      %17 = arith.mulf %16, %14 : vector<512x128xf32>
      %c0_9 = arith.constant 0 : index
      %c0_10 = arith.constant 0 : index
      %18 = vector.load %arg5[%c0_9, %c0_10] : memref<1x128xf32, #tpu.memory_space<vmem>>, vector<1x128xf32>
      %19 = vector.broadcast %18 : vector<1x128xf32> to vector<512x128xf32>
      %20 = arith.addf %17, %19 : vector<512x128xf32>
      %cst = arith.constant 0.000000e+00 : f32
      %21 = vector.broadcast %cst : f32 to vector<512x128xf32>
      %22 = arith.cmpf oge, %20, %21 : vector<512x128xf32>
      %cst_11 = arith.constant 2.000000e-01 : f32
      %23 = vector.broadcast %cst_11 : f32 to vector<512x128xf32>
      %24 = arith.mulf %23, %20 : vector<512x128xf32>
      %25 = arith.select %22, %20, %24 : vector<512x128xi1>, vector<512x128xf32>
      %26 = arith.truncf %25 : vector<512x128xf32> to vector<512x128xbf16>
      %c0_12 = arith.constant 0 : index
      %c0_13 = arith.constant 0 : index
      %27 = vector.load %arg6[%c0_12, %c0_13] : memref<512x128xbf16, #tpu.memory_space<vmem>>, vector<512x128xbf16>
      tpu.vector_store %arg6[%c0_12, %c0_13], %26 {strides = array<i32>} : memref<512x128xbf16, #tpu.memory_space<vmem>>, vector<512x128xbf16>,
    } else {
    }
    return
  }
  func.func @transform_0(%arg0: i32, %arg1: i32) -> (i32, i32) {
    %c1_i32 = arith.constant 1 : i32
    %0 = arith.subi %c1_i32, %arg0 : i32
    %1 = arith.muli %arg1, %0 : i32
    %c0_i32 = arith.constant 0 : i32
    %c0_i32_0 = arith.constant 0 : i32
    return %1, %c0_i32 : i32, i32
  }
  func.func @transform_1(%arg0: i32, %arg1: i32) -> (i32, i32) {
    %c0_i32 = arith.constant 0 : i32
    %c0_i32_0 = arith.constant 0 : i32
    %c0_i32_1 = arith.constant 0 : i32
    return %c0_i32, %c0_i32_0 : i32, i32
  }
  func.func @transform_2(%arg0: i32, %arg1: i32) -> (i32, i32) {
    %c0_i32 = arith.constant 0 : i32
    %c0_i32_0 = arith.constant 0 : i32
    %c0_i32_1 = arith.constant 0 : i32
    return %c0_i32, %c0_i32_0 : i32, i32
  }
  func.func @transform_3(%arg0: i32, %arg1: i32) -> (i32, i32) {
    %c0_i32 = arith.constant 0 : i32
    %c0_i32_0 = arith.constant 0 : i32
    %c0_i32_1 = arith.constant 0 : i32
    return %c0_i32, %c0_i32_0 : i32, i32
  }
  func.func @transform_4(%arg0: i32, %arg1: i32) -> (i32, i32) {
    %c0_i32 = arith.constant 0 : i32
    %c0_i32_0 = arith.constant 0 : i32
    return %arg1, %c0_i32 : i32, i32
  }
}

module attributes {stable_mosaic.version = 11 : i64} {
  func.func @_conv_bn_lrelu_kernel(%arg0: i32, %arg1: i32, %arg2: memref<128x512xbf16, #tpu.memory_space<vmem>>, %arg3: memref<512x128xbf16, #tpu.memory_space<vmem>>, %arg4: memref<1x128xf32, #tpu.memory_space<vmem>>, %arg5: memref<1x128xf32, #tpu.memory_space<vmem>>, %arg6: memref<128x128xbf16, #tpu.memory_space<vmem>>, %arg7: memref<1x128x128xf32, #tpu.memory_space<vmem>>, %arg8: memref<1x128xf32, #tpu.memory_space<vmem>>, %arg9: memref<1x128xf32, #tpu.memory_space<vmem>>) attributes {dimension_semantics = [#tpu.dimension_semantics<arbitrary>, #tpu.dimension_semantics<arbitrary>], iteration_bounds = array<i64: 2, 1>, scalar_prefetch = 0 : i64, scratch_operands = 3 : i64, tpu.core_type = #tpu.core_type<tc>, window_params = [{transform_indices = @transform_0, window_bounds = array<i64: 128, 512>}, {pipeline_mode = #tpu.pipeline_mode<synchronous>, transform_indices = @transform_1, window_bounds = array<i64: 512, 128>}, {pipeline_mode = #tpu.pipeline_mode<synchronous>, transform_indices = @transform_2, window_bounds = array<i64: 1, 128>}, {pipeline_mode = #tpu.pipeline_mode<synchronous>, transform_indices = @transform_3, window_bounds = array<i64: 1, 128>}, {transform_indices = @transform_4, window_bounds = array<i64: 128, 128>}]} {
    %c0_i32 = arith.constant 0 : i32
    %0 = arith.cmpi eq, %arg0, %c0_i32 : i32
    %1 = arith.extui %0 : i1 to i32
    %c0_i32_0 = arith.constant 0 : i32
    %2 = arith.cmpi ne, %1, %c0_i32_0 : i32
    scf.if %2 {
      %c0 = arith.constant 0 : index
      %c0_2 = arith.constant 0 : index
      %6 = vector.load %arg2[%c0, %c0_2] : memref<128x512xbf16, #tpu.memory_space<vmem>>, vector<128x512xbf16>
      %c0_3 = arith.constant 0 : index
      %c0_4 = arith.constant 0 : index
      %7 = vector.load %arg3[%c0_3, %c0_4] : memref<512x128xbf16, #tpu.memory_space<vmem>>, vector<512x128xbf16>
      %cst = arith.constant dense<0.000000e+00> : vector<128x128xf32>
      %8 = tpu.matmul %6, %7, %cst {dimension_numbers = #tpu.dot_dimension_numbers<[1], [0], [0], [1], [0, 0, 1, 1], [], []>} : vector<128x512xbf16>, vector<512x128xbf16>, vector<128x128xf32> -> vector<128x128xf32>
      %9 = arith.index_cast %arg1 : i32 to index
      %c0_5 = arith.constant 0 : index
      %c0_6 = arith.constant 0 : index
      %10 = vector.load %arg7[%9, %c0_5, %c0_6] : memref<1x128x128xf32, #tpu.memory_space<vmem>>, vector<1x128x128xf32>
      %11 = vector.shape_cast %10 : vector<1x128x128xf32> to vector<128x128xf32>
      %12 = vector.shape_cast %8 : vector<128x128xf32> to vector<1x128x128xf32>
      tpu.vector_store %arg7[%9, %c0_5, %c0_6], %12 {strides = array<i32>} : memref<1x128x128xf32, #tpu.memory_space<vmem>>, vector<1x128x128xf32>,
      %13 = arith.truncf %8 : vector<128x128xf32> to vector<128x128xbf16>
      %c0_7 = arith.constant 0 : index
      %c0_8 = arith.constant 0 : index
      %14 = vector.load %arg6[%c0_7, %c0_8] : memref<128x128xbf16, #tpu.memory_space<vmem>>, vector<128x128xbf16>
      tpu.vector_store %arg6[%c0_7, %c0_8], %13 {strides = array<i32>} : memref<128x128xbf16, #tpu.memory_space<vmem>>, vector<128x128xbf16>,
      %c0_i32_9 = arith.constant 0 : i32
      %15 = arith.cmpi eq, %arg1, %c0_i32_9 : i32
      %16 = arith.extui %15 : i1 to i32
      %c0_i32_10 = arith.constant 0 : i32
      %17 = arith.cmpi ne, %16, %c0_i32_10 : i32
      scf.if %17 {
        %cst_23 = arith.constant 0.000000e+00 : f32
        %32 = vector.broadcast %cst_23 : f32 to vector<1x128xf32>
        %c0_24 = arith.constant 0 : index
        %c0_25 = arith.constant 0 : index
        %33 = vector.load %arg8[%c0_24, %c0_25] : memref<1x128xf32, #tpu.memory_space<vmem>>, vector<1x128xf32>
        tpu.vector_store %arg8[%c0_24, %c0_25], %32 {strides = array<i32>} : memref<1x128xf32, #tpu.memory_space<vmem>>, vector<1x128xf32>,
        %cst_26 = arith.constant 0.000000e+00 : f32
        %34 = vector.broadcast %cst_26 : f32 to vector<1x128xf32>
        %c0_27 = arith.constant 0 : index
        %c0_28 = arith.constant 0 : index
        %35 = vector.load %arg9[%c0_27, %c0_28] : memref<1x128xf32, #tpu.memory_space<vmem>>, vector<1x128xf32>
        tpu.vector_store %arg9[%c0_27, %c0_28], %34 {strides = array<i32>} : memref<1x128xf32, #tpu.memory_space<vmem>>, vector<1x128xf32>,
      } else {
      }
      %c0_11 = arith.constant 0 : index
      %c0_12 = arith.constant 0 : index
      %18 = vector.load %arg8[%c0_11, %c0_12] : memref<1x128xf32, #tpu.memory_space<vmem>>, vector<1x128xf32>
      %cst_13 = arith.constant dense<0.000000e+00> : vector<128xf32>
      %19 = vector.multi_reduction <add>, %8, %cst_13 [0] : vector<128x128xf32> to vector<128xf32>
      %20 = vector.shape_cast %19 : vector<128xf32> to vector<1x128xf32>
      %21 = arith.addf %18, %20 : vector<1x128xf32>
      %c0_14 = arith.constant 0 : index
      %c0_15 = arith.constant 0 : index
      %22 = vector.load %arg8[%c0_14, %c0_15] : memref<1x128xf32, #tpu.memory_space<vmem>>, vector<1x128xf32>
      tpu.vector_store %arg8[%c0_14, %c0_15], %21 {strides = array<i32>} : memref<1x128xf32, #tpu.memory_space<vmem>>, vector<1x128xf32>,
      %c0_16 = arith.constant 0 : index
      %c0_17 = arith.constant 0 : index
      %23 = vector.load %arg9[%c0_16, %c0_17] : memref<1x128xf32, #tpu.memory_space<vmem>>, vector<1x128xf32>
      %24 = arith.mulf %8, %8 : vector<128x128xf32>
      %cst_18 = arith.constant dense<0.000000e+00> : vector<128xf32>
      %25 = vector.multi_reduction <add>, %24, %cst_18 [0] : vector<128x128xf32> to vector<128xf32>
      %26 = vector.shape_cast %25 : vector<128xf32> to vector<1x128xf32>
      %27 = arith.addf %23, %26 : vector<1x128xf32>
      %c0_19 = arith.constant 0 : index
      %c0_20 = arith.constant 0 : index
      %28 = vector.load %arg9[%c0_19, %c0_20] : memref<1x128xf32, #tpu.memory_space<vmem>>, vector<1x128xf32>
      tpu.vector_store %arg9[%c0_19, %c0_20], %27 {strides = array<i32>} : memref<1x128xf32, #tpu.memory_space<vmem>>, vector<1x128xf32>,
      %c0_i32_21 = arith.constant 0 : i32
      %29 = arith.cmpi eq, %arg1, %c0_i32_21 : i32
      %30 = arith.extui %29 : i1 to i32
      %c0_i32_22 = arith.constant 0 : i32
      %31 = arith.cmpi ne, %30, %c0_i32_22 : i32
      scf.if %31 {
        %c0_23 = arith.constant 0 : index
        %c0_24 = arith.constant 0 : index
        %32 = vector.load %arg8[%c0_23, %c0_24] : memref<1x128xf32, #tpu.memory_space<vmem>>, vector<1x128xf32>
        %cst_25 = arith.constant 7.812500e-03 : f32
        %33 = vector.broadcast %cst_25 : f32 to vector<1x128xf32>
        %34 = arith.mulf %32, %33 : vector<1x128xf32>
        %c0_26 = arith.constant 0 : index
        %c0_27 = arith.constant 0 : index
        %35 = vector.load %arg9[%c0_26, %c0_27] : memref<1x128xf32, #tpu.memory_space<vmem>>, vector<1x128xf32>
        %cst_28 = arith.constant 7.812500e-03 : f32
        %36 = vector.broadcast %cst_28 : f32 to vector<1x128xf32>
        %37 = arith.mulf %35, %36 : vector<1x128xf32>
        %38 = arith.mulf %34, %34 : vector<1x128xf32>
        %39 = arith.subf %37, %38 : vector<1x128xf32>
        %c0_29 = arith.constant 0 : index
        %c0_30 = arith.constant 0 : index
        %40 = vector.load %arg8[%c0_29, %c0_30] : memref<1x128xf32, #tpu.memory_space<vmem>>, vector<1x128xf32>
        tpu.vector_store %arg8[%c0_29, %c0_30], %34 {strides = array<i32>} : memref<1x128xf32, #tpu.memory_space<vmem>>, vector<1x128xf32>,
        %cst_31 = arith.constant 9.99999974E-6 : f32
        %41 = vector.broadcast %cst_31 : f32 to vector<1x128xf32>
        %42 = arith.addf %39, %41 : vector<1x128xf32>
        %43 = math.rsqrt %42 : vector<1x128xf32>
        %c0_32 = arith.constant 0 : index
        %c0_33 = arith.constant 0 : index
        %44 = vector.load %arg9[%c0_32, %c0_33] : memref<1x128xf32, #tpu.memory_space<vmem>>, vector<1x128xf32>
        tpu.vector_store %arg9[%c0_32, %c0_33], %43 {strides = array<i32>} : memref<1x128xf32, #tpu.memory_space<vmem>>, vector<1x128xf32>,
      } else {
      }
    } else {
    }
    %c1_i32 = arith.constant 1 : i32
    %3 = arith.cmpi eq, %arg0, %c1_i32 : i32
    %4 = arith.extui %3 : i1 to i32
    %c0_i32_1 = arith.constant 0 : i32
    %5 = arith.cmpi ne, %4, %c0_i32_1 : i32
    scf.if %5 {
      %6 = arith.index_cast %arg1 : i32 to index
      %c0 = arith.constant 0 : index
      %c0_2 = arith.constant 0 : index
      %7 = vector.load %arg7[%6, %c0, %c0_2] : memref<1x128x128xf32, #tpu.memory_space<vmem>>, vector<1x128x128xf32>
      %8 = vector.shape_cast %7 : vector<1x128x128xf32> to vector<128x128xf32>
      %c0_3 = arith.constant 0 : index
      %c0_4 = arith.constant 0 : index
      %9 = vector.load %arg8[%c0_3, %c0_4] : memref<1x128xf32, #tpu.memory_space<vmem>>, vector<1x128xf32>
      %10 = vector.broadcast %9 : vector<1x128xf32> to vector<128x128xf32>
      %11 = arith.subf %8, %10 : vector<128x128xf32>
      %c0_5 = arith.constant 0 : index
      %c0_6 = arith.constant 0 : index
      %12 = vector.load %arg9[%c0_5, %c0_6] : memref<1x128xf32, #tpu.memory_space<vmem>>, vector<1x128xf32>
      %13 = vector.broadcast %12 : vector<1x128xf32> to vector<128x128xf32>
      %14 = arith.mulf %11, %13 : vector<128x128xf32>
      %c0_7 = arith.constant 0 : index
      %c0_8 = arith.constant 0 : index
      %15 = vector.load %arg4[%c0_7, %c0_8] : memref<1x128xf32, #tpu.memory_space<vmem>>, vector<1x128xf32>
      %16 = vector.broadcast %15 : vector<1x128xf32> to vector<128x128xf32>
      %17 = arith.mulf %16, %14 : vector<128x128xf32>
      %c0_9 = arith.constant 0 : index
      %c0_10 = arith.constant 0 : index
      %18 = vector.load %arg5[%c0_9, %c0_10] : memref<1x128xf32, #tpu.memory_space<vmem>>, vector<1x128xf32>
      %19 = vector.broadcast %18 : vector<1x128xf32> to vector<128x128xf32>
      %20 = arith.addf %17, %19 : vector<128x128xf32>
      %cst = arith.constant 0.000000e+00 : f32
      %21 = vector.broadcast %cst : f32 to vector<128x128xf32>
      %22 = arith.cmpf oge, %20, %21 : vector<128x128xf32>
      %cst_11 = arith.constant 2.000000e-01 : f32
      %23 = vector.broadcast %cst_11 : f32 to vector<128x128xf32>
      %24 = arith.mulf %23, %20 : vector<128x128xf32>
      %25 = arith.select %22, %20, %24 : vector<128x128xi1>, vector<128x128xf32>
      %26 = arith.truncf %25 : vector<128x128xf32> to vector<128x128xbf16>
      %c0_12 = arith.constant 0 : index
      %c0_13 = arith.constant 0 : index
      %27 = vector.load %arg6[%c0_12, %c0_13] : memref<128x128xbf16, #tpu.memory_space<vmem>>, vector<128x128xbf16>
      tpu.vector_store %arg6[%c0_12, %c0_13], %26 {strides = array<i32>} : memref<128x128xbf16, #tpu.memory_space<vmem>>, vector<128x128xbf16>,
    } else {
    }
    return
  }
  func.func @transform_0(%arg0: i32, %arg1: i32) -> (i32, i32) {
    %c1_i32 = arith.constant 1 : i32
    %0 = arith.subi %c1_i32, %arg0 : i32
    %1 = arith.muli %arg1, %0 : i32
    %c0_i32 = arith.constant 0 : i32
    %c0_i32_0 = arith.constant 0 : i32
    return %1, %c0_i32 : i32, i32
  }
  func.func @transform_1(%arg0: i32, %arg1: i32) -> (i32, i32) {
    %c0_i32 = arith.constant 0 : i32
    %c0_i32_0 = arith.constant 0 : i32
    %c0_i32_1 = arith.constant 0 : i32
    return %c0_i32, %c0_i32_0 : i32, i32
  }
  func.func @transform_2(%arg0: i32, %arg1: i32) -> (i32, i32) {
    %c0_i32 = arith.constant 0 : i32
    %c0_i32_0 = arith.constant 0 : i32
    %c0_i32_1 = arith.constant 0 : i32
    return %c0_i32, %c0_i32_0 : i32, i32
  }
  func.func @transform_3(%arg0: i32, %arg1: i32) -> (i32, i32) {
    %c0_i32 = arith.constant 0 : i32
    %c0_i32_0 = arith.constant 0 : i32
    %c0_i32_1 = arith.constant 0 : i32
    return %c0_i32, %c0_i32_0 : i32, i32
  }
  func.func @transform_4(%arg0: i32, %arg1: i32) -> (i32, i32) {
    %c0_i32 = arith.constant 0 : i32
    %c0_i32_0 = arith.constant 0 : i32
    return %arg1, %c0_i32 : i32, i32
  }
}

module attributes {stable_mosaic.version = 11 : i64} {
  func.func @_conv_bn_lrelu_kernel(%arg0: i32, %arg1: i32, %arg2: memref<32x1024xbf16, #tpu.memory_space<vmem>>, %arg3: memref<1024x128xbf16, #tpu.memory_space<vmem>>, %arg4: memref<1x128xf32, #tpu.memory_space<vmem>>, %arg5: memref<1x128xf32, #tpu.memory_space<vmem>>, %arg6: memref<32x128xbf16, #tpu.memory_space<vmem>>, %arg7: memref<1x32x128xf32, #tpu.memory_space<vmem>>, %arg8: memref<1x128xf32, #tpu.memory_space<vmem>>, %arg9: memref<1x128xf32, #tpu.memory_space<vmem>>) attributes {dimension_semantics = [#tpu.dimension_semantics<arbitrary>, #tpu.dimension_semantics<arbitrary>], iteration_bounds = array<i64: 2, 1>, scalar_prefetch = 0 : i64, scratch_operands = 3 : i64, tpu.core_type = #tpu.core_type<tc>, window_params = [{transform_indices = @transform_0, window_bounds = array<i64: 32, 1024>}, {pipeline_mode = #tpu.pipeline_mode<synchronous>, transform_indices = @transform_1, window_bounds = array<i64: 1024, 128>}, {pipeline_mode = #tpu.pipeline_mode<synchronous>, transform_indices = @transform_2, window_bounds = array<i64: 1, 128>}, {pipeline_mode = #tpu.pipeline_mode<synchronous>, transform_indices = @transform_3, window_bounds = array<i64: 1, 128>}, {transform_indices = @transform_4, window_bounds = array<i64: 32, 128>}]} {
    %c0_i32 = arith.constant 0 : i32
    %0 = arith.cmpi eq, %arg0, %c0_i32 : i32
    %1 = arith.extui %0 : i1 to i32
    %c0_i32_0 = arith.constant 0 : i32
    %2 = arith.cmpi ne, %1, %c0_i32_0 : i32
    scf.if %2 {
      %c0 = arith.constant 0 : index
      %c0_2 = arith.constant 0 : index
      %6 = vector.load %arg2[%c0, %c0_2] : memref<32x1024xbf16, #tpu.memory_space<vmem>>, vector<32x1024xbf16>
      %c0_3 = arith.constant 0 : index
      %c0_4 = arith.constant 0 : index
      %7 = vector.load %arg3[%c0_3, %c0_4] : memref<1024x128xbf16, #tpu.memory_space<vmem>>, vector<1024x128xbf16>
      %cst = arith.constant dense<0.000000e+00> : vector<32x128xf32>
      %8 = tpu.matmul %6, %7, %cst {dimension_numbers = #tpu.dot_dimension_numbers<[1], [0], [0], [1], [0, 0, 1, 1], [], []>} : vector<32x1024xbf16>, vector<1024x128xbf16>, vector<32x128xf32> -> vector<32x128xf32>
      %9 = arith.index_cast %arg1 : i32 to index
      %c0_5 = arith.constant 0 : index
      %c0_6 = arith.constant 0 : index
      %10 = vector.load %arg7[%9, %c0_5, %c0_6] : memref<1x32x128xf32, #tpu.memory_space<vmem>>, vector<1x32x128xf32>
      %11 = vector.shape_cast %10 : vector<1x32x128xf32> to vector<32x128xf32>
      %12 = vector.shape_cast %8 : vector<32x128xf32> to vector<1x32x128xf32>
      tpu.vector_store %arg7[%9, %c0_5, %c0_6], %12 {strides = array<i32>} : memref<1x32x128xf32, #tpu.memory_space<vmem>>, vector<1x32x128xf32>,
      %13 = arith.truncf %8 : vector<32x128xf32> to vector<32x128xbf16>
      %c0_7 = arith.constant 0 : index
      %c0_8 = arith.constant 0 : index
      %14 = vector.load %arg6[%c0_7, %c0_8] : memref<32x128xbf16, #tpu.memory_space<vmem>>, vector<32x128xbf16>
      tpu.vector_store %arg6[%c0_7, %c0_8], %13 {strides = array<i32>} : memref<32x128xbf16, #tpu.memory_space<vmem>>, vector<32x128xbf16>,
      %c0_i32_9 = arith.constant 0 : i32
      %15 = arith.cmpi eq, %arg1, %c0_i32_9 : i32
      %16 = arith.extui %15 : i1 to i32
      %c0_i32_10 = arith.constant 0 : i32
      %17 = arith.cmpi ne, %16, %c0_i32_10 : i32
      scf.if %17 {
        %cst_23 = arith.constant 0.000000e+00 : f32
        %32 = vector.broadcast %cst_23 : f32 to vector<1x128xf32>
        %c0_24 = arith.constant 0 : index
        %c0_25 = arith.constant 0 : index
        %33 = vector.load %arg8[%c0_24, %c0_25] : memref<1x128xf32, #tpu.memory_space<vmem>>, vector<1x128xf32>
        tpu.vector_store %arg8[%c0_24, %c0_25], %32 {strides = array<i32>} : memref<1x128xf32, #tpu.memory_space<vmem>>, vector<1x128xf32>,
        %cst_26 = arith.constant 0.000000e+00 : f32
        %34 = vector.broadcast %cst_26 : f32 to vector<1x128xf32>
        %c0_27 = arith.constant 0 : index
        %c0_28 = arith.constant 0 : index
        %35 = vector.load %arg9[%c0_27, %c0_28] : memref<1x128xf32, #tpu.memory_space<vmem>>, vector<1x128xf32>
        tpu.vector_store %arg9[%c0_27, %c0_28], %34 {strides = array<i32>} : memref<1x128xf32, #tpu.memory_space<vmem>>, vector<1x128xf32>,
      } else {
      }
      %c0_11 = arith.constant 0 : index
      %c0_12 = arith.constant 0 : index
      %18 = vector.load %arg8[%c0_11, %c0_12] : memref<1x128xf32, #tpu.memory_space<vmem>>, vector<1x128xf32>
      %cst_13 = arith.constant dense<0.000000e+00> : vector<128xf32>
      %19 = vector.multi_reduction <add>, %8, %cst_13 [0] : vector<32x128xf32> to vector<128xf32>
      %20 = vector.shape_cast %19 : vector<128xf32> to vector<1x128xf32>
      %21 = arith.addf %18, %20 : vector<1x128xf32>
      %c0_14 = arith.constant 0 : index
      %c0_15 = arith.constant 0 : index
      %22 = vector.load %arg8[%c0_14, %c0_15] : memref<1x128xf32, #tpu.memory_space<vmem>>, vector<1x128xf32>
      tpu.vector_store %arg8[%c0_14, %c0_15], %21 {strides = array<i32>} : memref<1x128xf32, #tpu.memory_space<vmem>>, vector<1x128xf32>,
      %c0_16 = arith.constant 0 : index
      %c0_17 = arith.constant 0 : index
      %23 = vector.load %arg9[%c0_16, %c0_17] : memref<1x128xf32, #tpu.memory_space<vmem>>, vector<1x128xf32>
      %24 = arith.mulf %8, %8 : vector<32x128xf32>
      %cst_18 = arith.constant dense<0.000000e+00> : vector<128xf32>
      %25 = vector.multi_reduction <add>, %24, %cst_18 [0] : vector<32x128xf32> to vector<128xf32>
      %26 = vector.shape_cast %25 : vector<128xf32> to vector<1x128xf32>
      %27 = arith.addf %23, %26 : vector<1x128xf32>
      %c0_19 = arith.constant 0 : index
      %c0_20 = arith.constant 0 : index
      %28 = vector.load %arg9[%c0_19, %c0_20] : memref<1x128xf32, #tpu.memory_space<vmem>>, vector<1x128xf32>
      tpu.vector_store %arg9[%c0_19, %c0_20], %27 {strides = array<i32>} : memref<1x128xf32, #tpu.memory_space<vmem>>, vector<1x128xf32>,
      %c0_i32_21 = arith.constant 0 : i32
      %29 = arith.cmpi eq, %arg1, %c0_i32_21 : i32
      %30 = arith.extui %29 : i1 to i32
      %c0_i32_22 = arith.constant 0 : i32
      %31 = arith.cmpi ne, %30, %c0_i32_22 : i32
      scf.if %31 {
        %c0_23 = arith.constant 0 : index
        %c0_24 = arith.constant 0 : index
        %32 = vector.load %arg8[%c0_23, %c0_24] : memref<1x128xf32, #tpu.memory_space<vmem>>, vector<1x128xf32>
        %cst_25 = arith.constant 3.125000e-02 : f32
        %33 = vector.broadcast %cst_25 : f32 to vector<1x128xf32>
        %34 = arith.mulf %32, %33 : vector<1x128xf32>
        %c0_26 = arith.constant 0 : index
        %c0_27 = arith.constant 0 : index
        %35 = vector.load %arg9[%c0_26, %c0_27] : memref<1x128xf32, #tpu.memory_space<vmem>>, vector<1x128xf32>
        %cst_28 = arith.constant 3.125000e-02 : f32
        %36 = vector.broadcast %cst_28 : f32 to vector<1x128xf32>
        %37 = arith.mulf %35, %36 : vector<1x128xf32>
        %38 = arith.mulf %34, %34 : vector<1x128xf32>
        %39 = arith.subf %37, %38 : vector<1x128xf32>
        %c0_29 = arith.constant 0 : index
        %c0_30 = arith.constant 0 : index
        %40 = vector.load %arg8[%c0_29, %c0_30] : memref<1x128xf32, #tpu.memory_space<vmem>>, vector<1x128xf32>
        tpu.vector_store %arg8[%c0_29, %c0_30], %34 {strides = array<i32>} : memref<1x128xf32, #tpu.memory_space<vmem>>, vector<1x128xf32>,
        %cst_31 = arith.constant 9.99999974E-6 : f32
        %41 = vector.broadcast %cst_31 : f32 to vector<1x128xf32>
        %42 = arith.addf %39, %41 : vector<1x128xf32>
        %43 = math.rsqrt %42 : vector<1x128xf32>
        %c0_32 = arith.constant 0 : index
        %c0_33 = arith.constant 0 : index
        %44 = vector.load %arg9[%c0_32, %c0_33] : memref<1x128xf32, #tpu.memory_space<vmem>>, vector<1x128xf32>
        tpu.vector_store %arg9[%c0_32, %c0_33], %43 {strides = array<i32>} : memref<1x128xf32, #tpu.memory_space<vmem>>, vector<1x128xf32>,
      } else {
      }
    } else {
    }
    %c1_i32 = arith.constant 1 : i32
    %3 = arith.cmpi eq, %arg0, %c1_i32 : i32
    %4 = arith.extui %3 : i1 to i32
    %c0_i32_1 = arith.constant 0 : i32
    %5 = arith.cmpi ne, %4, %c0_i32_1 : i32
    scf.if %5 {
      %6 = arith.index_cast %arg1 : i32 to index
      %c0 = arith.constant 0 : index
      %c0_2 = arith.constant 0 : index
      %7 = vector.load %arg7[%6, %c0, %c0_2] : memref<1x32x128xf32, #tpu.memory_space<vmem>>, vector<1x32x128xf32>
      %8 = vector.shape_cast %7 : vector<1x32x128xf32> to vector<32x128xf32>
      %c0_3 = arith.constant 0 : index
      %c0_4 = arith.constant 0 : index
      %9 = vector.load %arg8[%c0_3, %c0_4] : memref<1x128xf32, #tpu.memory_space<vmem>>, vector<1x128xf32>
      %10 = vector.broadcast %9 : vector<1x128xf32> to vector<32x128xf32>
      %11 = arith.subf %8, %10 : vector<32x128xf32>
      %c0_5 = arith.constant 0 : index
      %c0_6 = arith.constant 0 : index
      %12 = vector.load %arg9[%c0_5, %c0_6] : memref<1x128xf32, #tpu.memory_space<vmem>>, vector<1x128xf32>
      %13 = vector.broadcast %12 : vector<1x128xf32> to vector<32x128xf32>
      %14 = arith.mulf %11, %13 : vector<32x128xf32>
      %c0_7 = arith.constant 0 : index
      %c0_8 = arith.constant 0 : index
      %15 = vector.load %arg4[%c0_7, %c0_8] : memref<1x128xf32, #tpu.memory_space<vmem>>, vector<1x128xf32>
      %16 = vector.broadcast %15 : vector<1x128xf32> to vector<32x128xf32>
      %17 = arith.mulf %16, %14 : vector<32x128xf32>
      %c0_9 = arith.constant 0 : index
      %c0_10 = arith.constant 0 : index
      %18 = vector.load %arg5[%c0_9, %c0_10] : memref<1x128xf32, #tpu.memory_space<vmem>>, vector<1x128xf32>
      %19 = vector.broadcast %18 : vector<1x128xf32> to vector<32x128xf32>
      %20 = arith.addf %17, %19 : vector<32x128xf32>
      %cst = arith.constant 0.000000e+00 : f32
      %21 = vector.broadcast %cst : f32 to vector<32x128xf32>
      %22 = arith.cmpf oge, %20, %21 : vector<32x128xf32>
      %cst_11 = arith.constant 2.000000e-01 : f32
      %23 = vector.broadcast %cst_11 : f32 to vector<32x128xf32>
      %24 = arith.mulf %23, %20 : vector<32x128xf32>
      %25 = arith.select %22, %20, %24 : vector<32x128xi1>, vector<32x128xf32>
      %26 = arith.truncf %25 : vector<32x128xf32> to vector<32x128xbf16>
      %c0_12 = arith.constant 0 : index
      %c0_13 = arith.constant 0 : index
      %27 = vector.load %arg6[%c0_12, %c0_13] : memref<32x128xbf16, #tpu.memory_space<vmem>>, vector<32x128xbf16>
      tpu.vector_store %arg6[%c0_12, %c0_13], %26 {strides = array<i32>} : memref<32x128xbf16, #tpu.memory_space<vmem>>, vector<32x128xbf16>,
    } else {
    }
    return
  }
  func.func @transform_0(%arg0: i32, %arg1: i32) -> (i32, i32) {
    %c1_i32 = arith.constant 1 : i32
    %0 = arith.subi %c1_i32, %arg0 : i32
    %1 = arith.muli %arg1, %0 : i32
    %c0_i32 = arith.constant 0 : i32
    %c0_i32_0 = arith.constant 0 : i32
    return %1, %c0_i32 : i32, i32
  }
  func.func @transform_1(%arg0: i32, %arg1: i32) -> (i32, i32) {
    %c0_i32 = arith.constant 0 : i32
    %c0_i32_0 = arith.constant 0 : i32
    %c0_i32_1 = arith.constant 0 : i32
    return %c0_i32, %c0_i32_0 : i32, i32
  }
  func.func @transform_2(%arg0: i32, %arg1: i32) -> (i32, i32) {
    %c0_i32 = arith.constant 0 : i32
    %c0_i32_0 = arith.constant 0 : i32
    %c0_i32_1 = arith.constant 0 : i32
    return %c0_i32, %c0_i32_0 : i32, i32
  }
  func.func @transform_3(%arg0: i32, %arg1: i32) -> (i32, i32) {
    %c0_i32 = arith.constant 0 : i32
    %c0_i32_0 = arith.constant 0 : i32
    %c0_i32_1 = arith.constant 0 : i32
    return %c0_i32, %c0_i32_0 : i32, i32
  }
  func.func @transform_4(%arg0: i32, %arg1: i32) -> (i32, i32) {
    %c0_i32 = arith.constant 0 : i32
    %c0_i32_0 = arith.constant 0 : i32
    return %arg1, %c0_i32 : i32, i32
  }
}

module attributes {stable_mosaic.version = 11 : i64} {
  func.func @_conv_bias_act_kernel(%arg0: i32, %arg1: memref<16x2048xbf16, #tpu.memory_space<vmem>>, %arg2: memref<2048x128xbf16, #tpu.memory_space<vmem>>, %arg3: memref<1x128xf32, #tpu.memory_space<vmem>>, %arg4: memref<16x128xf32, #tpu.memory_space<vmem>>) attributes {dimension_semantics = [#tpu.dimension_semantics<parallel>], iteration_bounds = array<i64: 1>, scalar_prefetch = 0 : i64, scratch_operands = 0 : i64, tpu.core_type = #tpu.core_type<tc>, window_params = [{transform_indices = @transform_0, window_bounds = array<i64: 16, 2048>}, {pipeline_mode = #tpu.pipeline_mode<synchronous>, transform_indices = @transform_1, window_bounds = array<i64: 2048, 128>}, {pipeline_mode = #tpu.pipeline_mode<synchronous>, transform_indices = @transform_2, window_bounds = array<i64: 1, 128>}, {transform_indices = @transform_3, window_bounds = array<i64: 16, 128>}]} {
    %c0 = arith.constant 0 : index
    %c0_0 = arith.constant 0 : index
    %0 = vector.load %arg1[%c0, %c0_0] : memref<16x2048xbf16, #tpu.memory_space<vmem>>, vector<16x2048xbf16>
    %c0_1 = arith.constant 0 : index
    %c0_2 = arith.constant 0 : index
    %1 = vector.load %arg2[%c0_1, %c0_2] : memref<2048x128xbf16, #tpu.memory_space<vmem>>, vector<2048x128xbf16>
    %cst = arith.constant dense<0.000000e+00> : vector<16x128xf32>
    %2 = tpu.matmul %0, %1, %cst {dimension_numbers = #tpu.dot_dimension_numbers<[1], [0], [0], [1], [0, 0, 1, 1], [], []>} : vector<16x2048xbf16>, vector<2048x128xbf16>, vector<16x128xf32> -> vector<16x128xf32>
    %c0_3 = arith.constant 0 : index
    %c0_4 = arith.constant 0 : index
    %3 = vector.load %arg3[%c0_3, %c0_4] : memref<1x128xf32, #tpu.memory_space<vmem>>, vector<1x128xf32>
    %4 = vector.broadcast %3 : vector<1x128xf32> to vector<16x128xf32>
    %5 = arith.addf %2, %4 : vector<16x128xf32>
    %c0_5 = arith.constant 0 : index
    %c0_6 = arith.constant 0 : index
    %6 = vector.load %arg4[%c0_5, %c0_6] : memref<16x128xf32, #tpu.memory_space<vmem>>, vector<16x128xf32>
    tpu.vector_store %arg4[%c0_5, %c0_6], %5 {strides = array<i32>} : memref<16x128xf32, #tpu.memory_space<vmem>>, vector<16x128xf32>,
    return
  }
  func.func @transform_0(%arg0: i32) -> (i32, i32) {
    %c0_i32 = arith.constant 0 : i32
    %c0_i32_0 = arith.constant 0 : i32
    return %arg0, %c0_i32 : i32, i32
  }
  func.func @transform_1(%arg0: i32) -> (i32, i32) {
    %c0_i32 = arith.constant 0 : i32
    %c0_i32_0 = arith.constant 0 : i32
    %c0_i32_1 = arith.constant 0 : i32
    return %c0_i32, %c0_i32_0 : i32, i32
  }
  func.func @transform_2(%arg0: i32) -> (i32, i32) {
    %c0_i32 = arith.constant 0 : i32
    %c0_i32_0 = arith.constant 0 : i32
    %c0_i32_1 = arith.constant 0 : i32
    return %c0_i32, %c0_i32_0 : i32, i32
  }
  func.func @transform_3(%arg0: i32) -> (i32, i32) {
    %c0_i32 = arith.constant 0 : i32
    %c0_i32_0 = arith.constant 0 : i32
    return %arg0, %c0_i32 : i32, i32
  }
}

</mosaic_0001>

<bundles_post_ra>
// kernel: discriminator_forward.5
= control target key start
LH: loop header
LB: loop body
LE: loop exit
PB: predicated region body
PF: predicated region fallthrough
CT: control target
= control target key end

     0   :  { %s1506_s12 = smov 0   ;;  %s1691_s0 = inlined_call_operand.vmem [shape: bf16[2048,128], index: 0, kind: input, shape index: {}]   ;;  %s1692_s1 = inlined_call_operand.vmem [shape: bf16[128,128], index: 1, kind: input, shape index: {}]   ;;  %s1693_s2 = inlined_call_operand.vmem [shape: f32[1,128], index: 2, kind: input, shape index: {}]   ;;  %s1694_s3 = inlined_call_operand.vmem [shape: bf16[2048,128], index: 3, kind: output, shape index: {}]  }
   0x1 LB: > { %s1043_s13 = sadd.s32 4294967295, %s1484_s12   ;;  %p1047_p0 = scmp.ge.s32.totalorder %s1484_s12, 1  ;;  %s1484_s12 = sphi %s1506_s12, %s13_s12  }
   0x2   : > { %p138_p1 = scmp.lt.s32.totalorder %s1484_s12, 5 }
   0x4   : > { %p139_p2 = pnand %p1047_p0, %p138_p1 }
   0x5   : > { %s1048_s22 = sshll.u32 (!%p139_p2), %s1043_s13, 6 }
   0x6   : > { %142 = sbr.rel (%p139_p2) target bundleno = 305 (0x131), region = 32  ;;  %p163_p3 = scmp.lt.s32.totalorder (!%p139_p2), %s1048_s22, 255 }
   0xb   : > { %v1253_v0 = vld [vmem:[%s1692_s1 + $0x38] sm:$0xff]  ;;  %v1252_v1 = vld [vmem:[%s1692_s1 + $0x30] sm:$0xff]  ;;  %v1251_v2 = vld [vmem:[%s1692_s1 + $0x28] sm:$0xff]  ;;  %s1696_s22 = smov (!%p163_p3, %s1048_s22), 255 }
   0xc   : > { %498 = vmatpush.bf16.msra.mxu0 %v1253_v0  ;;  %1445 = vmatpush.bf16.msra.mxu1 %v1253_v0  ;;  %v1250_v3 = vld [vmem:[%s1692_s1 + $0x20] sm:$0xff]  ;;  %v1249_v4 = vld [vmem:[%s1692_s1 + $0x18] sm:$0xff]  ;;  %v1248_v5 = vld [vmem:[%s1692_s1 + $0x10] sm:$0xff]  ;;  %s1049_s29 = sshll.u32 %s1696_s22, 2 }
   0xd   : > { %1446 = vmatpush.bf16.msra.mxu2 %v1253_v0  ;;  %1447 = vmatpush.bf16.msra.mxu3 %v1253_v0  ;;  %v1247_v6 = vld [vmem:[%s1692_s1 + $0x8] sm:$0xff]  ;;  %v1246_v7 = vld [vmem:[%s1692_s1] sm:$0xff]  ;;  %s1546_s7 = scalar_lea.vmem %s1691_s0, %s1049_s29  ;;  %s1596_s13 = scalar_lea.vmem %s1694_s3, %s1049_s29 }
   0xe   : > { %v1214_v8 = vld [vmem:[%s1546_s7] sm:$0xff]  ;;  %v1215_v12 = vld [vmem:[%s1546_s7 + $0x8] sm:$0xff]  ;;  %v1216_v16 = vld [vmem:[%s1546_s7 + $0x10] sm:$0xff] }
   0xf   : > { %v1222_v9 = vld [vmem:[%s1546_s7 + $0x40] sm:$0xff]  ;;  %v1223_v13 = vld [vmem:[%s1546_s7 + $0x48] sm:$0xff]  ;;  %v1224_v17 = vld [vmem:[%s1546_s7 + $0x50] sm:$0xff] }
  0x10   : > { %499 = vmatpush.bf16.msra.mxu0 %v1252_v1  ;;  %1448 = vmatpush.bf16.msra.mxu1 %v1252_v1  ;;  %v1230_v10 = vld [vmem:[%s1546_s7 + $0x80] sm:$0xff]  ;;  %v1231_v14 = vld [vmem:[%s1546_s7 + $0x88] sm:$0xff]  ;;  %v1232_v18 = vld [vmem:[%s1546_s7 + $0x90] sm:$0xff] }
  0x11   : > { %1449 = vmatpush.bf16.msra.mxu2 %v1252_v1  ;;  %1450 = vmatpush.bf16.msra.mxu3 %v1252_v1  ;;  %v1238_v11 = vld [vmem:[%s1546_s7 + $0xc0] sm:$0xff]  ;;  %v1239_v15 = vld [vmem:[%s1546_s7 + $0xc8] sm:$0xff]  ;;  %v1240_v19 = vld [vmem:[%s1546_s7 + $0xd0] sm:$0xff] }
  0x12   : > { %v1217_v20 = vld [vmem:[%s1546_s7 + $0x18] sm:$0xff]  ;;  %v1218_v24 = vld [vmem:[%s1546_s7 + $0x20] sm:$0xff]  ;;  %v1219_v28 = vld [vmem:[%s1546_s7 + $0x28] sm:$0xff] }
  0x13   : > { %v1225_v21 = vld [vmem:[%s1546_s7 + $0x58] sm:$0xff]  ;;  %v1226_v25 = vld [vmem:[%s1546_s7 + $0x60] sm:$0xff]  ;;  %v1227_v29 = vld [vmem:[%s1546_s7 + $0x68] sm:$0xff] }
  0x14   : > { %500 = vmatpush.bf16.msra.mxu0 %v1251_v2  ;;  %1451 = vmatpush.bf16.msra.mxu1 %v1251_v2  ;;  %v1233_v22 = vld [vmem:[%s1546_s7 + $0x98] sm:$0xff]  ;;  %v1234_v26 = vld [vmem:[%s1546_s7 + $0xa0] sm:$0xff]  ;;  %v1235_v30 = vld [vmem:[%s1546_s7 + $0xa8] sm:$0xff] }
  0x15   : > { %1452 = vmatpush.bf16.msra.mxu2 %v1251_v2  ;;  %1453 = vmatpush.bf16.msra.mxu3 %v1251_v2  ;;  %v1241_v23 = vld [vmem:[%s1546_s7 + $0xd8] sm:$0xff]  ;;  %v1242_v27 = vld [vmem:[%s1546_s7 + $0xe0] sm:$0xff]  ;;  %v1243_v31 = vld [vmem:[%s1546_s7 + $0xe8] sm:$0xff] }
  0x16   : > { %v1220_v32 = vld [vmem:[%s1546_s7 + $0x30] sm:$0xff]  ;;  %v1221_v36 = vld [vmem:[%s1546_s7 + $0x38] sm:$0xff]  ;;  %v1583_v42 = vld [vmem:[%s1693_s2] ss:$0 sm:$0xff] }
  0x17   : > { %v1228_v33 = vld [vmem:[%s1546_s7 + $0x70] sm:$0xff]  ;;  %v1229_v37 = vld [vmem:[%s1546_s7 + $0x78] sm:$0xff] }
  0x18   : > { %501 = vmatpush.bf16.msra.mxu0 %v1250_v3  ;;  %1454 = vmatpush.bf16.msra.mxu1 %v1250_v3  ;;  %v1236_v34 = vld [vmem:[%s1546_s7 + $0xb0] sm:$0xff]  ;;  %v1237_v38 = vld [vmem:[%s1546_s7 + $0xb8] sm:$0xff] }
  0x19   : > { %1455 = vmatpush.bf16.msra.mxu2 %v1250_v3  ;;  %1456 = vmatpush.bf16.msra.mxu3 %v1250_v3  ;;  %v1244_v35 = vld [vmem:[%s1546_s7 + $0xf0] sm:$0xff]  ;;  %v1245_v39 = vld [vmem:[%s1546_s7 + $0xf8] sm:$0xff] }
  0x1c   : > { %502 = vmatpush.bf16.msra.mxu0 %v1249_v4  ;;  %1457 = vmatpush.bf16.msra.mxu1 %v1249_v4 }
  0x1d   : > { %1458 = vmatpush.bf16.msra.mxu2 %v1249_v4  ;;  %1459 = vmatpush.bf16.msra.mxu3 %v1249_v4 }
  0x20   : > { %503 = vmatpush.bf16.msra.mxu0 %v1248_v5  ;;  %1460 = vmatpush.bf16.msra.mxu1 %v1248_v5 }
  0x21   : > { %1461 = vmatpush.bf16.msra.mxu2 %v1248_v5  ;;  %1462 = vmatpush.bf16.msra.mxu3 %v1248_v5 }
  0x24   : > { %504 = vmatpush.bf16.msra.mxu0 %v1247_v6  ;;  %1463 = vmatpush.bf16.msra.mxu1 %v1247_v6 }
  0x25   : > { %1464 = vmatpush.bf16.msra.mxu2 %v1247_v6  ;;  %1465 = vmatpush.bf16.msra.mxu3 %v1247_v6 }
  0x28   : > { %505 = vmatpush.bf16.msra.mxu0 %v1246_v7  ;;  %1466 = vmatpush.bf16.msra.mxu1 %v1246_v7 }
  0x29   : > { %1467 = vmatpush.bf16.msra.mxu2 %v1246_v7  ;;  %1468 = vmatpush.bf16.msra.mxu3 %v1246_v7 }
  0x2b   : > { %506 = vmatmul.bf16.vlgmr.msra.gmra.mxu0 %v1214_v8  ;;  %546 = vmatmul.bf16.vlgmr.msra.gmra.mxu1 %v1222_v9 }
  0x2c   : > { %586 = vmatmul.bf16.vlgmr.msra.gmra.mxu2 %v1230_v10  ;;  %626 = vmatmul.bf16.vlgmr.msra.gmra.mxu3 %v1238_v11 }
  0x3b   : > { %511 = vmatmul.bf16.gmra.mxu0 %v1215_v12  ;;  %551 = vmatmul.bf16.gmra.mxu1 %v1223_v13 }
  0x3c   : > { %591 = vmatmul.bf16.gmra.mxu2 %v1231_v14  ;;  %631 = vmatmul.bf16.gmra.mxu3 %v1239_v15 }
  0x4b   : > { %516 = vmatmul.bf16.gmra.mxu0 %v1216_v16  ;;  %556 = vmatmul.bf16.gmra.mxu1 %v1224_v17 }
  0x4c   : > { %596 = vmatmul.bf16.gmra.mxu2 %v1232_v18  ;;  %636 = vmatmul.bf16.gmra.mxu3 %v1240_v19 }
  0x5b   : > { %521 = vmatmul.bf16.gmra.mxu0 %v1217_v20  ;;  %561 = vmatmul.bf16.gmra.mxu1 %v1225_v21 }
  0x5c   : > { %601 = vmatmul.bf16.gmra.mxu2 %v1233_v22  ;;  %641 = vmatmul.bf16.gmra.mxu3 %v1241_v23 }
  0x6b   : > { %526 = vmatmul.bf16.gmra.mxu0 %v1218_v24  ;;  %566 = vmatmul.bf16.gmra.mxu1 %v1226_v25 }
  0x6c   : > { %606 = vmatmul.bf16.gmra.mxu2 %v1234_v26  ;;  %646 = vmatmul.bf16.gmra.mxu3 %v1242_v27 }
  0x7b   : > { %531 = vmatmul.bf16.gmra.mxu0 %v1219_v28  ;;  %571 = vmatmul.bf16.gmra.mxu1 %v1227_v29 }
  0x7c   : > { %611 = vmatmul.bf16.gmra.mxu2 %v1235_v30  ;;  %651 = vmatmul.bf16.gmra.mxu3 %v1243_v31 }
  0x8b   : > { %536 = vmatmul.bf16.gmra.mxu0 %v1220_v32  ;;  %576 = vmatmul.bf16.gmra.mxu1 %v1228_v33 }
  0x8c   : > { %616 = vmatmul.bf16.gmra.mxu2 %v1236_v34  ;;  %656 = vmatmul.bf16.gmra.mxu3 %v1244_v35 }
  0x9b   : > { %541 = vmatmul.bf16.gmra.mxu0 %v1221_v36  ;;  %581 = vmatmul.bf16.gmra.mxu1 %v1229_v37 }
  0x9c   : > { %621 = vmatmul.bf16.gmra.mxu2 %v1237_v38  ;;  %661 = vmatmul.bf16.gmra.mxu3 %v1245_v39 }
  0xa8   : > { %v507_v40 = vpop.f32.mrf.mxu0  ;;  %v547_v41 = vpop.f32.mrf.mxu1 }
  0xa9   : > { %v508_v43 = vadd.f32 %v1583_v42, %v507_v40  ;;  %v548_v44 = vadd.f32 %v1583_v42, %v547_v41 }
  0xab   : > { %v731_v49 = vmul.f32 0.2, %v508_v43  ;;  %v747_v50 = vmul.f32 0.2, %v548_v44  ;;  %vm667_vm0 = vcmp.ge.f32.partialorder %v508_v43, 0.0  ;;  %vm683_vm1 = vcmp.ge.f32.partialorder %v548_v44, 0.0 }
  0xad   : > { %v795_v57 = vsel %vm667_vm0, %v508_v43, %v731_v49  ;;  %v811_v58 = vsel %vm683_vm1, %v548_v44, %v747_v50 }
  0xaf   : > { %v587_v45 = vpop.f32.mrf.mxu2  ;;  %v627_v46 = vpop.f32.mrf.mxu3 }
  0xb0   : > { %v509_v47 = vpop.f32.mrf.mxu0  ;;  %v549_v48 = vpop.f32.mrf.mxu1  ;;  %v588_v55 = vadd.f32 %v1583_v42, %v587_v45  ;;  %v628_v56 = vadd.f32 %v1583_v42, %v627_v46 }
  0xb1   : > { %v510_v51 = vadd.f32 %v1583_v42, %v509_v47  ;;  %v550_v52 = vadd.f32 %v1583_v42, %v549_v48 }
  0xb2   : > { %v763_v1 = vmul.f32 0.2, %v588_v55  ;;  %v779_v2 = vmul.f32 0.2, %v628_v56  ;;  %vm699_vm4 = vcmp.ge.f32.partialorder %v588_v55, 0.0  ;;  %vm715_vm5 = vcmp.ge.f32.partialorder %v628_v56, 0.0 }
  0xb3   : > { %vm668_vm2 = vcmp.ge.f32.partialorder %v510_v51, 0.0  ;;  %v732_v53 = vmul.f32 0.2, %v510_v51  ;;  %vm684_vm3 = vcmp.ge.f32.partialorder %v550_v52, 0.0  ;;  %v748_v54 = vmul.f32 0.2, %v550_v52 }
  0xb4   : > { %v827_v9 = vsel %vm699_vm4, %v588_v55, %v763_v1  ;;  %v843_v10 = vsel %vm715_vm5, %v628_v56, %v779_v2 }
  0xb5   : > { %v796_v59 = vsel %vm668_vm2, %v510_v51, %v732_v53  ;;  %v812_v60 = vsel %vm684_vm3, %v550_v52, %v748_v54 }
  0xb6   : > { %v1257_v61 = vpack.c.bf16 %v796_v59, %v795_v57  ;;  %v1297_v62 = vpack.c.bf16 %v812_v60, %v811_v58 }
  0xb7   : > { %v589_v63 = vpop.f32.mrf.mxu2  ;;  %v629_v0 = vpop.f32.mrf.mxu3 }
  0xb8   : > { %1258 = vst [vmem:[%s1596_s13] sm:$0xff] %v1257_v61   ;;  %v590_v3 = vadd.f32 %v1583_v42, %v589_v63  ;;  %v630_v4 = vadd.f32 %v1583_v42, %v629_v0  ;;  %v512_v5 = vpop.f32.mrf.mxu0  ;;  %v552_v6 = vpop.f32.mrf.mxu1 }
  0xb9   : > { %1421 = vst [vmem:[%s1596_s13 + $0x40] sm:$0xff] %v1297_v62   ;;  %v513_v15 = vadd.f32 %v1583_v42, %v512_v5  ;;  %v553_v16 = vadd.f32 %v1583_v42, %v552_v6 }
  0xba   : > { %vm700_vm6 = vcmp.ge.f32.partialorder %v590_v3, 0.0  ;;  %v764_v7 = vmul.f32 0.2, %v590_v3  ;;  %vm716_vm7 = vcmp.ge.f32.partialorder %v630_v4, 0.0  ;;  %v780_v8 = vmul.f32 0.2, %v630_v4 }
  0xbb   : > { %v733_v21 = vmul.f32 0.2, %v513_v15  ;;  %v749_v22 = vmul.f32 0.2, %v553_v16  ;;  %vm669_vm8 = vcmp.ge.f32.partialorder %v513_v15, 0.0  ;;  %vm685_vm9 = vcmp.ge.f32.partialorder %v553_v16, 0.0 }
  0xbc   : > { %v828_v11 = vsel %vm700_vm6, %v590_v3, %v764_v7  ;;  %v844_v12 = vsel %vm716_vm7, %v630_v4, %v780_v8 }
  0xbd   : > { %v1337_v13 = vpack.c.bf16 %v828_v11, %v827_v9  ;;  %v1377_v14 = vpack.c.bf16 %v844_v12, %v843_v10  ;;  %v797_v29 = vsel %vm669_vm8, %v513_v15, %v733_v21  ;;  %v813_v30 = vsel %vm685_vm9, %v553_v16, %v749_v22 }
  0xbf   : > { %1429 = vst [vmem:[%s1596_s13 + $0x80] sm:$0xff] %v1337_v13   ;;  %v592_v17 = vpop.f32.mrf.mxu2  ;;  %v632_v18 = vpop.f32.mrf.mxu3 }
  0xc0   : > { %1437 = vst [vmem:[%s1596_s13 + $0xc0] sm:$0xff] %v1377_v14   ;;  %v514_v19 = vpop.f32.mrf.mxu0  ;;  %v554_v20 = vpop.f32.mrf.mxu1  ;;  %v593_v27 = vadd.f32 %v1583_v42, %v592_v17  ;;  %v633_v28 = vadd.f32 %v1583_v42, %v632_v18 }
  0xc1   : > { %v515_v23 = vadd.f32 %v1583_v42, %v514_v19  ;;  %v555_v24 = vadd.f32 %v1583_v42, %v554_v20 }
  0xc2   : > { %v765_v37 = vmul.f32 0.2, %v593_v27  ;;  %v781_v38 = vmul.f32 0.2, %v633_v28  ;;  %vm701_vm12 = vcmp.ge.f32.partialorder %v593_v27, 0.0  ;;  %vm717_vm13 = vcmp.ge.f32.partialorder %v633_v28, 0.0 }
  0xc3   : > { %vm670_vm10 = vcmp.ge.f32.partialorder %v515_v23, 0.0  ;;  %v734_v25 = vmul.f32 0.2, %v515_v23  ;;  %vm686_vm11 = vcmp.ge.f32.partialorder %v555_v24, 0.0  ;;  %v750_v26 = vmul.f32 0.2, %v555_v24 }
  0xc4   : > { %v829_v46 = vsel %vm701_vm12, %v593_v27, %v765_v37  ;;  %v845_v47 = vsel %vm717_vm13, %v633_v28, %v781_v38 }
  0xc5   : > { %v798_v31 = vsel %vm670_vm10, %v515_v23, %v734_v25  ;;  %v814_v32 = vsel %vm686_vm11, %v555_v24, %v750_v26 }
  0xc6   : > { %v1262_v33 = vpack.c.bf16 %v798_v31, %v797_v29  ;;  %v1302_v34 = vpack.c.bf16 %v814_v32, %v813_v30 }
  0xc7   : > { %v594_v35 = vpop.f32.mrf.mxu2  ;;  %v634_v36 = vpop.f32.mrf.mxu3 }
  0xc8   : > { %1414 = vst [vmem:[%s1596_s13 + $0x8] sm:$0xff] %v1262_v33   ;;  %v595_v39 = vadd.f32 %v1583_v42, %v594_v35  ;;  %v635_v40 = vadd.f32 %v1583_v42, %v634_v36  ;;  %v517_v41 = vpop.f32.mrf.mxu0  ;;  %v557_v43 = vpop.f32.mrf.mxu1 }
  0xc9   : > { %1422 = vst [vmem:[%s1596_s13 + $0x48] sm:$0xff] %v1302_v34   ;;  %v518_v52 = vadd.f32 %v1583_v42, %v517_v41  ;;  %v558_v53 = vadd.f32 %v1583_v42, %v557_v43 }
  0xca   : > { %vm702_vm14 = vcmp.ge.f32.partialorder %v595_v39, 0.0  ;;  %v766_v44 = vmul.f32 0.2, %v595_v39  ;;  %vm718_vm15 = vcmp.ge.f32.partialorder %v635_v40, 0.0  ;;  %v782_v45 = vmul.f32 0.2, %v635_v40 }
  0xcb   : > { %v735_v58 = vmul.f32 0.2, %v518_v52  ;;  %v751_v59 = vmul.f32 0.2, %v558_v53  ;;  %vm671_vm0 = vcmp.ge.f32.partialorder %v518_v52, 0.0  ;;  %vm687_vm1 = vcmp.ge.f32.partialorder %v558_v53, 0.0 }
  0xcc   : > { %v830_v48 = vsel %vm702_vm14, %v595_v39, %v766_v44  ;;  %v846_v49 = vsel %vm718_vm15, %v635_v40, %v782_v45 }
  0xcd   : > { %v1342_v50 = vpack.c.bf16 %v830_v48, %v829_v46  ;;  %v1382_v51 = vpack.c.bf16 %v846_v49, %v845_v47  ;;  %v799_v2 = vsel %vm671_vm0, %v518_v52, %v735_v58  ;;  %v815_v3 = vsel %vm687_vm1, %v558_v53, %v751_v59 }
  0xcf   : > { %1430 = vst [vmem:[%s1596_s13 + $0x88] sm:$0xff] %v1342_v50   ;;  %v597_v54 = vpop.f32.mrf.mxu2  ;;  %v637_v55 = vpop.f32.mrf.mxu3 }
  0xd0   : > { %1438 = vst [vmem:[%s1596_s13 + $0xc8] sm:$0xff] %v1382_v51   ;;  %v519_v56 = vpop.f32.mrf.mxu0  ;;  %v559_v57 = vpop.f32.mrf.mxu1  ;;  %v598_v0 = vadd.f32 %v1583_v42, %v597_v54  ;;  %v638_v1 = vadd.f32 %v1583_v42, %v637_v55 }
  0xd1   : > { %v520_v60 = vadd.f32 %v1583_v42, %v519_v56  ;;  %v560_v61 = vadd.f32 %v1583_v42, %v559_v57 }
  0xd2   : > { %v767_v10 = vmul.f32 0.2, %v598_v0  ;;  %v783_v11 = vmul.f32 0.2, %v638_v1  ;;  %vm703_vm4 = vcmp.ge.f32.partialorder %v598_v0, 0.0  ;;  %vm719_vm5 = vcmp.ge.f32.partialorder %v638_v1, 0.0 }
  0xd3   : > { %vm672_vm2 = vcmp.ge.f32.partialorder %v520_v60, 0.0  ;;  %v736_v62 = vmul.f32 0.2, %v520_v60  ;;  %vm688_vm3 = vcmp.ge.f32.partialorder %v560_v61, 0.0  ;;  %v752_v63 = vmul.f32 0.2, %v560_v61 }
  0xd4   : > { %v831_v18 = vsel %vm703_vm4, %v598_v0, %v767_v10  ;;  %v847_v19 = vsel %vm719_vm5, %v638_v1, %v783_v11 }
  0xd5   : > { %v800_v4 = vsel %vm672_vm2, %v520_v60, %v736_v62  ;;  %v816_v5 = vsel %vm688_vm3, %v560_v61, %v752_v63 }
  0xd6   : > { %v1267_v6 = vpack.c.bf16 %v800_v4, %v799_v2  ;;  %v1307_v7 = vpack.c.bf16 %v816_v5, %v815_v3 }
  0xd7   : > { %v599_v8 = vpop.f32.mrf.mxu2  ;;  %v639_v9 = vpop.f32.mrf.mxu3 }
  0xd8   : > { %1415 = vst [vmem:[%s1596_s13 + $0x10] sm:$0xff] %v1267_v6   ;;  %v600_v12 = vadd.f32 %v1583_v42, %v599_v8  ;;  %v640_v13 = vadd.f32 %v1583_v42, %v639_v9  ;;  %v522_v14 = vpop.f32.mrf.mxu0  ;;  %v562_v15 = vpop.f32.mrf.mxu1 }
  0xd9   : > { %1423 = vst [vmem:[%s1596_s13 + $0x50] sm:$0xff] %v1307_v7   ;;  %v523_v24 = vadd.f32 %v1583_v42, %v522_v14  ;;  %v563_v25 = vadd.f32 %v1583_v42, %v562_v15 }
  0xda   : > { %vm704_vm6 = vcmp.ge.f32.partialorder %v600_v12, 0.0  ;;  %v768_v16 = vmul.f32 0.2, %v600_v12  ;;  %vm720_vm7 = vcmp.ge.f32.partialorder %v640_v13, 0.0  ;;  %v784_v17 = vmul.f32 0.2, %v640_v13 }
  0xdb   : > { %v737_v30 = vmul.f32 0.2, %v523_v24  ;;  %v753_v31 = vmul.f32 0.2, %v563_v25  ;;  %vm673_vm8 = vcmp.ge.f32.partialorder %v523_v24, 0.0  ;;  %vm689_vm9 = vcmp.ge.f32.partialorder %v563_v25, 0.0 }
  0xdc   : > { %v832_v20 = vsel %vm704_vm6, %v600_v12, %v768_v16  ;;  %v848_v21 = vsel %vm720_vm7, %v640_v13, %v784_v17 }
  0xdd   : > { %v1347_v22 = vpack.c.bf16 %v832_v20, %v831_v18  ;;  %v1387_v23 = vpack.c.bf16 %v848_v21, %v847_v19  ;;  %v801_v38 = vsel %vm673_vm8, %v523_v24, %v737_v30  ;;  %v817_v39 = vsel %vm689_vm9, %v563_v25, %v753_v31 }
  0xdf   : > { %1431 = vst [vmem:[%s1596_s13 + $0x90] sm:$0xff] %v1347_v22   ;;  %v602_v26 = vpop.f32.mrf.mxu2  ;;  %v642_v27 = vpop.f32.mrf.mxu3 }
  0xe0   : > { %1439 = vst [vmem:[%s1596_s13 + $0xd0] sm:$0xff] %v1387_v23   ;;  %v524_v28 = vpop.f32.mrf.mxu0  ;;  %v564_v29 = vpop.f32.mrf.mxu1  ;;  %v603_v36 = vadd.f32 %v1583_v42, %v602_v26  ;;  %v643_v37 = vadd.f32 %v1583_v42, %v642_v27 }
  0xe1   : > { %v525_v32 = vadd.f32 %v1583_v42, %v524_v28  ;;  %v565_v33 = vadd.f32 %v1583_v42, %v564_v29 }
  0xe2   : > { %v769_v47 = vmul.f32 0.2, %v603_v36  ;;  %v785_v48 = vmul.f32 0.2, %v643_v37  ;;  %vm705_vm12 = vcmp.ge.f32.partialorder %v603_v36, 0.0  ;;  %vm721_vm13 = vcmp.ge.f32.partialorder %v643_v37, 0.0 }
  0xe3   : > { %vm674_vm10 = vcmp.ge.f32.partialorder %v525_v32, 0.0  ;;  %v738_v34 = vmul.f32 0.2, %v525_v32  ;;  %vm690_vm11 = vcmp.ge.f32.partialorder %v565_v33, 0.0  ;;  %v754_v35 = vmul.f32 0.2, %v565_v33 }
  0xe4   : > { %v833_v55 = vsel %vm705_vm12, %v603_v36, %v769_v47  ;;  %v849_v56 = vsel %vm721_vm13, %v643_v37, %v785_v48 }
  0xe5   : > { %v802_v40 = vsel %vm674_vm10, %v525_v32, %v738_v34  ;;  %v818_v41 = vsel %vm690_vm11, %v565_v33, %v754_v35 }
  0xe6   : > { %v1272_v43 = vpack.c.bf16 %v802_v40, %v801_v38  ;;  %v1312_v44 = vpack.c.bf16 %v818_v41, %v817_v39 }
  0xe7   : > { %v604_v45 = vpop.f32.mrf.mxu2  ;;  %v644_v46 = vpop.f32.mrf.mxu3 }
  0xe8   : > { %1416 = vst [vmem:[%s1596_s13 + $0x18] sm:$0xff] %v1272_v43   ;;  %v605_v49 = vadd.f32 %v1583_v42, %v604_v45  ;;  %v645_v50 = vadd.f32 %v1583_v42, %v644_v46  ;;  %v527_v51 = vpop.f32.mrf.mxu0  ;;  %v567_v52 = vpop.f32.mrf.mxu1 }
  0xe9   : > { %1424 = vst [vmem:[%s1596_s13 + $0x58] sm:$0xff] %v1312_v44   ;;  %v528_v61 = vadd.f32 %v1583_v42, %v527_v51  ;;  %v568_v62 = vadd.f32 %v1583_v42, %v567_v52 }
  0xea   : > { %vm706_vm14 = vcmp.ge.f32.partialorder %v605_v49, 0.0  ;;  %v770_v53 = vmul.f32 0.2, %v605_v49  ;;  %vm722_vm15 = vcmp.ge.f32.partialorder %v645_v50, 0.0  ;;  %v786_v54 = vmul.f32 0.2, %v645_v50 }
  0xeb   : > { %v739_v3 = vmul.f32 0.2, %v528_v61  ;;  %v755_v4 = vmul.f32 0.2, %v568_v62  ;;  %vm675_vm0 = vcmp.ge.f32.partialorder %v528_v61, 0.0  ;;  %vm691_vm1 = vcmp.ge.f32.partialorder %v568_v62, 0.0 }
  0xec   : > { %v834_v57 = vsel %vm706_vm14, %v605_v49, %v770_v53  ;;  %v850_v58 = vsel %vm722_vm15, %v645_v50, %v786_v54 }
  0xed   : > { %v1352_v59 = vpack.c.bf16 %v834_v57, %v833_v55  ;;  %v1392_v60 = vpack.c.bf16 %v850_v58, %v849_v56  ;;  %v803_v11 = vsel %vm675_vm0, %v528_v61, %v739_v3  ;;  %v819_v12 = vsel %vm691_vm1, %v568_v62, %v755_v4 }
  0xef   : > { %1432 = vst [vmem:[%s1596_s13 + $0x98] sm:$0xff] %v1352_v59   ;;  %v607_v63 = vpop.f32.mrf.mxu2  ;;  %v647_v0 = vpop.f32.mrf.mxu3 }
  0xf0   : > { %1440 = vst [vmem:[%s1596_s13 + $0xd8] sm:$0xff] %v1392_v60   ;;  %v529_v1 = vpop.f32.mrf.mxu0  ;;  %v569_v2 = vpop.f32.mrf.mxu1  ;;  %v608_v9 = vadd.f32 %v1583_v42, %v607_v63  ;;  %v648_v10 = vadd.f32 %v1583_v42, %v647_v0 }
  0xf1   : > { %v530_v5 = vadd.f32 %v1583_v42, %v529_v1  ;;  %v570_v6 = vadd.f32 %v1583_v42, %v569_v2 }
  0xf2   : > { %v771_v19 = vmul.f32 0.2, %v608_v9  ;;  %v787_v20 = vmul.f32 0.2, %v648_v10  ;;  %vm707_vm4 = vcmp.ge.f32.partialorder %v608_v9, 0.0  ;;  %vm723_vm5 = vcmp.ge.f32.partialorder %v648_v10, 0.0 }
  0xf3   : > { %vm676_vm2 = vcmp.ge.f32.partialorder %v530_v5, 0.0  ;;  %v740_v7 = vmul.f32 0.2, %v530_v5  ;;  %vm692_vm3 = vcmp.ge.f32.partialorder %v570_v6, 0.0  ;;  %v756_v8 = vmul.f32 0.2, %v570_v6 }
  0xf4   : > { %v835_v27 = vsel %vm707_vm4, %v608_v9, %v771_v19  ;;  %v851_v28 = vsel %vm723_vm5, %v648_v10, %v787_v20 }
  0xf5   : > { %v804_v13 = vsel %vm676_vm2, %v530_v5, %v740_v7  ;;  %v820_v14 = vsel %vm692_vm3, %v570_v6, %v756_v8 }
  0xf6   : > { %v1277_v15 = vpack.c.bf16 %v804_v13, %v803_v11  ;;  %v1317_v16 = vpack.c.bf16 %v820_v14, %v819_v12 }
  0xf7   : > { %v609_v17 = vpop.f32.mrf.mxu2  ;;  %v649_v18 = vpop.f32.mrf.mxu3 }
  0xf8   : > { %1417 = vst [vmem:[%s1596_s13 + $0x20] sm:$0xff] %v1277_v15   ;;  %v610_v21 = vadd.f32 %v1583_v42, %v609_v17  ;;  %v650_v22 = vadd.f32 %v1583_v42, %v649_v18  ;;  %v532_v23 = vpop.f32.mrf.mxu0  ;;  %v572_v24 = vpop.f32.mrf.mxu1 }
  0xf9   : > { %1425 = vst [vmem:[%s1596_s13 + $0x60] sm:$0xff] %v1317_v16   ;;  %v533_v33 = vadd.f32 %v1583_v42, %v532_v23  ;;  %v573_v34 = vadd.f32 %v1583_v42, %v572_v24 }
  0xfa   : > { %vm708_vm6 = vcmp.ge.f32.partialorder %v610_v21, 0.0  ;;  %v772_v25 = vmul.f32 0.2, %v610_v21  ;;  %vm724_vm7 = vcmp.ge.f32.partialorder %v650_v22, 0.0  ;;  %v788_v26 = vmul.f32 0.2, %v650_v22 }
  0xfb   : > { %v741_v39 = vmul.f32 0.2, %v533_v33  ;;  %v757_v40 = vmul.f32 0.2, %v573_v34  ;;  %vm677_vm8 = vcmp.ge.f32.partialorder %v533_v33, 0.0  ;;  %vm693_vm9 = vcmp.ge.f32.partialorder %v573_v34, 0.0 }
  0xfc   : > { %v836_v29 = vsel %vm708_vm6, %v610_v21, %v772_v25  ;;  %v852_v30 = vsel %vm724_vm7, %v650_v22, %v788_v26 }
  0xfd   : > { %v1357_v31 = vpack.c.bf16 %v836_v29, %v835_v27  ;;  %v1397_v32 = vpack.c.bf16 %v852_v30, %v851_v28  ;;  %v805_v48 = vsel %vm677_vm8, %v533_v33, %v741_v39  ;;  %v821_v49 = vsel %vm693_vm9, %v573_v34, %v757_v40 }
  0xff   : > { %1433 = vst [vmem:[%s1596_s13 + $0xa0] sm:$0xff] %v1357_v31   ;;  %v612_v35 = vpop.f32.mrf.mxu2  ;;  %v652_v36 = vpop.f32.mrf.mxu3 }
 0x100   : > { %1441 = vst [vmem:[%s1596_s13 + $0xe0] sm:$0xff] %v1397_v32   ;;  %v534_v37 = vpop.f32.mrf.mxu0  ;;  %v574_v38 = vpop.f32.mrf.mxu1  ;;  %v613_v46 = vadd.f32 %v1583_v42, %v612_v35  ;;  %v653_v47 = vadd.f32 %v1583_v42, %v652_v36 }
 0x101   : > { %v535_v41 = vadd.f32 %v1583_v42, %v534_v37  ;;  %v575_v43 = vadd.f32 %v1583_v42, %v574_v38 }
 0x102   : > { %v773_v56 = vmul.f32 0.2, %v613_v46  ;;  %v789_v57 = vmul.f32 0.2, %v653_v47  ;;  %vm709_vm12 = vcmp.ge.f32.partialorder %v613_v46, 0.0  ;;  %vm725_vm13 = vcmp.ge.f32.partialorder %v653_v47, 0.0 }
 0x103   : > { %vm678_vm10 = vcmp.ge.f32.partialorder %v535_v41, 0.0  ;;  %v742_v44 = vmul.f32 0.2, %v535_v41  ;;  %vm694_vm11 = vcmp.ge.f32.partialorder %v575_v43, 0.0  ;;  %v758_v45 = vmul.f32 0.2, %v575_v43 }
 0x104   : > { %v837_v0 = vsel %vm709_vm12, %v613_v46, %v773_v56  ;;  %v853_v1 = vsel %vm725_vm13, %v653_v47, %v789_v57 }
 0x105   : > { %v806_v50 = vsel %vm678_vm10, %v535_v41, %v742_v44  ;;  %v822_v51 = vsel %vm694_vm11, %v575_v43, %v758_v45 }
 0x106   : > { %v1282_v52 = vpack.c.bf16 %v806_v50, %v805_v48  ;;  %v1322_v53 = vpack.c.bf16 %v822_v51, %v821_v49 }
 0x107   : > { %v614_v54 = vpop.f32.mrf.mxu2  ;;  %v654_v55 = vpop.f32.mrf.mxu3 }
 0x108   : > { %1418 = vst [vmem:[%s1596_s13 + $0x28] sm:$0xff] %v1282_v52   ;;  %v615_v58 = vadd.f32 %v1583_v42, %v614_v54  ;;  %v655_v59 = vadd.f32 %v1583_v42, %v654_v55  ;;  %v537_v60 = vpop.f32.mrf.mxu0  ;;  %v577_v61 = vpop.f32.mrf.mxu1 }
 0x109   : > { %1426 = vst [vmem:[%s1596_s13 + $0x68] sm:$0xff] %v1322_v53   ;;  %v538_v6 = vadd.f32 %v1583_v42, %v537_v60  ;;  %v578_v7 = vadd.f32 %v1583_v42, %v577_v61 }
 0x10a   : > { %vm710_vm14 = vcmp.ge.f32.partialorder %v615_v58, 0.0  ;;  %v774_v62 = vmul.f32 0.2, %v615_v58  ;;  %vm726_vm15 = vcmp.ge.f32.partialorder %v655_v59, 0.0  ;;  %v790_v63 = vmul.f32 0.2, %v655_v59 }
 0x10b   : > { %v743_v12 = vmul.f32 0.2, %v538_v6  ;;  %v759_v13 = vmul.f32 0.2, %v578_v7  ;;  %vm679_vm0 = vcmp.ge.f32.partialorder %v538_v6, 0.0  ;;  %vm695_vm1 = vcmp.ge.f32.partialorder %v578_v7, 0.0 }
 0x10c   : > { %v838_v2 = vsel %vm710_vm14, %v615_v58, %v774_v62  ;;  %v854_v3 = vsel %vm726_vm15, %v655_v59, %v790_v63 }
 0x10d   : > { %v1362_v4 = vpack.c.bf16 %v838_v2, %v837_v0  ;;  %v1402_v5 = vpack.c.bf16 %v854_v3, %v853_v1  ;;  %v807_v20 = vsel %vm679_vm0, %v538_v6, %v743_v12  ;;  %v823_v21 = vsel %vm695_vm1, %v578_v7, %v759_v13 }
 0x10f   : > { %1434 = vst [vmem:[%s1596_s13 + $0xa8] sm:$0xff] %v1362_v4   ;;  %v617_v8 = vpop.f32.mrf.mxu2  ;;  %v657_v9 = vpop.f32.mrf.mxu3 }
 0x110   : > { %1442 = vst [vmem:[%s1596_s13 + $0xe8] sm:$0xff] %v1402_v5   ;;  %v539_v10 = vpop.f32.mrf.mxu0  ;;  %v579_v11 = vpop.f32.mrf.mxu1  ;;  %v618_v18 = vadd.f32 %v1583_v42, %v617_v8  ;;  %v658_v19 = vadd.f32 %v1583_v42, %v657_v9 }
 0x111   : > { %v540_v14 = vadd.f32 %v1583_v42, %v539_v10  ;;  %v580_v15 = vadd.f32 %v1583_v42, %v579_v11 }
 0x112   : > { %v775_v28 = vmul.f32 0.2, %v618_v18  ;;  %v791_v29 = vmul.f32 0.2, %v658_v19  ;;  %vm711_vm4 = vcmp.ge.f32.partialorder %v618_v18, 0.0  ;;  %vm727_vm5 = vcmp.ge.f32.partialorder %v658_v19, 0.0 }
 0x113   : > { %vm680_vm2 = vcmp.ge.f32.partialorder %v540_v14, 0.0  ;;  %v744_v16 = vmul.f32 0.2, %v540_v14  ;;  %vm696_vm3 = vcmp.ge.f32.partialorder %v580_v15, 0.0  ;;  %v760_v17 = vmul.f32 0.2, %v580_v15 }
 0x114   : > { %v839_v36 = vsel %vm711_vm4, %v618_v18, %v775_v28  ;;  %v855_v37 = vsel %vm727_vm5, %v658_v19, %v791_v29 }
 0x115   : > { %v808_v22 = vsel %vm680_vm2, %v540_v14, %v744_v16  ;;  %v824_v23 = vsel %vm696_vm3, %v580_v15, %v760_v17 }
 0x116   : > { %v1287_v24 = vpack.c.bf16 %v808_v22, %v807_v20  ;;  %v1327_v25 = vpack.c.bf16 %v824_v23, %v823_v21 }
 0x117   : > { %v619_v26 = vpop.f32.mrf.mxu2  ;;  %v659_v27 = vpop.f32.mrf.mxu3 }
 0x118   : > { %1419 = vst [vmem:[%s1596_s13 + $0x30] sm:$0xff] %v1287_v24   ;;  %v620_v30 = vadd.f32 %v1583_v42, %v619_v26  ;;  %v660_v31 = vadd.f32 %v1583_v42, %v659_v27  ;;  %v542_v32 = vpop.f32.mrf.mxu0  ;;  %v582_v33 = vpop.f32.mrf.mxu1 }
 0x119   : > { %1427 = vst [vmem:[%s1596_s13 + $0x70] sm:$0xff] %v1327_v25   ;;  %v543_v43 = vadd.f32 %v1583_v42, %v542_v32  ;;  %v583_v44 = vadd.f32 %v1583_v42, %v582_v33 }
 0x11a   : > { %vm712_vm6 = vcmp.ge.f32.partialorder %v620_v30, 0.0  ;;  %v776_v34 = vmul.f32 0.2, %v620_v30  ;;  %vm728_vm7 = vcmp.ge.f32.partialorder %v660_v31, 0.0  ;;  %v792_v35 = vmul.f32 0.2, %v660_v31 }
 0x11b   : > { %v745_v49 = vmul.f32 0.2, %v543_v43  ;;  %v761_v50 = vmul.f32 0.2, %v583_v44  ;;  %vm681_vm8 = vcmp.ge.f32.partialorder %v543_v43, 0.0  ;;  %vm697_vm9 = vcmp.ge.f32.partialorder %v583_v44, 0.0 }
 0x11c   : > { %v840_v38 = vsel %vm712_vm6, %v620_v30, %v776_v34  ;;  %v856_v39 = vsel %vm728_vm7, %v660_v31, %v792_v35 }
 0x11d   : > { %v1367_v40 = vpack.c.bf16 %v840_v38, %v839_v36  ;;  %v1407_v41 = vpack.c.bf16 %v856_v39, %v855_v37  ;;  %v809_v57 = vsel %vm681_vm8, %v543_v43, %v745_v49  ;;  %v825_v58 = vsel %vm697_vm9, %v583_v44, %v761_v50 }
 0x11f   : > { %1435 = vst [vmem:[%s1596_s13 + $0xb0] sm:$0xff] %v1367_v40   ;;  %v622_v45 = vpop.f32.mrf.mxu2  ;;  %v662_v46 = vpop.f32.mrf.mxu3 }
 0x120   : > { %1443 = vst [vmem:[%s1596_s13 + $0xf0] sm:$0xff] %v1407_v41   ;;  %v544_v47 = vpop.f32.mrf.mxu0  ;;  %v584_v48 = vpop.f32.mrf.mxu1  ;;  %v623_v55 = vadd.f32 %v1583_v42, %v622_v45  ;;  %v663_v56 = vadd.f32 %v1583_v42, %v662_v46 }
 0x121   : > { %v545_v51 = vadd.f32 %v1583_v42, %v544_v47  ;;  %v585_v52 = vadd.f32 %v1583_v42, %v584_v48 }
 0x122   : > { %v777_v1 = vmul.f32 0.2, %v623_v55  ;;  %v793_v2 = vmul.f32 0.2, %v663_v56  ;;  %vm713_vm12 = vcmp.ge.f32.partialorder %v623_v55, 0.0  ;;  %vm729_vm13 = vcmp.ge.f32.partialorder %v663_v56, 0.0 }
 0x123   : > { %vm682_vm10 = vcmp.ge.f32.partialorder %v545_v51, 0.0  ;;  %v746_v53 = vmul.f32 0.2, %v545_v51  ;;  %vm698_vm11 = vcmp.ge.f32.partialorder %v585_v52, 0.0  ;;  %v762_v54 = vmul.f32 0.2, %v585_v52 }
 0x124   : > { %v841_v7 = vsel %vm713_vm12, %v623_v55, %v777_v1  ;;  %v857_v8 = vsel %vm729_vm13, %v663_v56, %v793_v2 }
 0x125   : > { %v810_v59 = vsel %vm682_vm10, %v545_v51, %v746_v53  ;;  %v826_v60 = vsel %vm698_vm11, %v585_v52, %v762_v54 }
 0x126   : > { %v1292_v61 = vpack.c.bf16 %v810_v59, %v809_v57  ;;  %v1332_v62 = vpack.c.bf16 %v826_v60, %v825_v58 }
 0x127   : > { %v624_v63 = vpop.f32.mrf.mxu2  ;;  %v664_v0 = vpop.f32.mrf.mxu3 }
 0x128   : > { %1420 = vst [vmem:[%s1596_s13 + $0x38] sm:$0xff] %v1292_v61   ;;  %v625_v3 = vadd.f32 %v1583_v42, %v624_v63  ;;  %v665_v4 = vadd.f32 %v1583_v42, %v664_v0 }
 0x129   : > { %1428 = vst [vmem:[%s1596_s13 + $0x78] sm:$0xff] %v1332_v62  }
 0x12a   : > { %vm714_vm14 = vcmp.ge.f32.partialorder %v625_v3, 0.0  ;;  %v778_v5 = vmul.f32 0.2, %v625_v3  ;;  %vm730_vm15 = vcmp.ge.f32.partialorder %v665_v4, 0.0  ;;  %v794_v6 = vmul.f32 0.2, %v665_v4 }
 0x12c   : > { %v842_v9 = vsel %vm714_vm14, %v625_v3, %v778_v5  ;;  %v858_v10 = vsel %vm730_vm15, %v665_v4, %v794_v6 }
 0x12d   : > { %v1372_v11 = vpack.c.bf16 %v842_v9, %v841_v7  ;;  %v1412_v12 = vpack.c.bf16 %v858_v10, %v857_v8 }
 0x12f   : > { %1436 = vst [vmem:[%s1596_s13 + $0xb8] sm:$0xff] %v1372_v11  }
 0x130   : > { %1444 = vst [vmem:[%s1596_s13 + $0xf8] sm:$0xff] %v1412_v12  }
 0x131 PF: > { %s13_s12 = sadd.s32 1, %s1484_s12  }
 0x132   : > { %p10_p4 = scmp.ge.s32.totalorder %s13_s12, 6  }
 0x134   :  { %12 = sbr.rel (!%p10_p4) target bundleno = 1 (0x1), region = 62 }

// kernel: discriminator_forward.6
= control target key start
LH: loop header
LB: loop body
LE: loop exit
PB: predicated region body
PF: predicated region fallthrough
CT: control target
= control target key end

     0   :  { %s3136_s15 = smov 0   ;;  %s3138_s16 = smov 0   ;;  %s4301_s0 = inlined_call_operand.vmem [shape: bf16[512,256], index: 0, kind: input, shape index: {}]   ;;  %s4302_s1 = inlined_call_operand.vmem [shape: bf16[256,128], index: 1, kind: input, shape index: {}]   ;;  %s4303_s2 = inlined_call_operand.vmem [shape: f32[1,128], index: 2, kind: input, shape index: {}]   ;;  %s4304_s3 = inlined_call_operand.vmem [shape: f32[1,128], index: 3, kind: input, shape index: {}]   ;;  %s4305_s4 = inlined_call_operand.vmem [shape: bf16[512,128], index: 4, kind: output, shape index: {}]  }
   0x1   :  { %s3140_s17 = smov 0  }
   0x2 LB: > { %s26_s18 = sadd.s32 1, %s3104_s16  ;;  %p2246_p0 = scmp.ge.s32.totalorder %s3108_s17, 1  ;;  %s3108_s17 = sphi %s3140_s17, %s14_s17   ;;  %s3104_s16 = sphi %s3138_s16, %s4307_s16   ;;  %s3100_s15 = sphi %s3136_s15, %s4306_s15  }
   0x3   : > { %p28_p1 = scmp.ge.s32.totalorder %s26_s18, 2  ;;  %p184_p2 = scmp.lt.s32.totalorder %s3108_s17, 3 }
   0x5   : > { %s4309_s18 = smov (%p28_p1, %s26_s18), 0  ;;  %p185_p3 = pnand %p2246_p0, %p184_p2 }
   0x6   : > { %p2247_p4 = scmp.ne.s32.totalorder (!%p185_p3), %s3100_s15, 0 }
   0x7   : > { %188 = sbr.rel (%p185_p3) target bundleno = 675 (0x2a3), region = 36 }
   0xc   : > { %233 = sbr.rel (%p2247_p4) target bundleno = 541 (0x21d), region = 40 }
  0x11   : > { %v2644_v0 = vld [vmem:[%s4302_s1 + $0x38] sm:$0xff]  ;;  %v2643_v2 = vld [vmem:[%s4302_s1 + $0x30] sm:$0xff]  ;;  %v2642_v4 = vld [vmem:[%s4302_s1 + $0x28] sm:$0xff] }
  0x12   : > { %v2652_v1 = vld [vmem:[%s4302_s1 + $0x78] sm:$0xff]  ;;  %746 = vmatpush.bf16.msra.mxu0 %v2644_v0  ;;  %v2651_v3 = vld [vmem:[%s4302_s1 + $0x70] sm:$0xff]  ;;  %3035 = vmatpush.bf16.msra.mxu2 %v2644_v0  ;;  %v2650_v5 = vld [vmem:[%s4302_s1 + $0x68] sm:$0xff] }
  0x13   : > { %915 = vmatpush.bf16.msra.mxu1 %v2652_v1  ;;  %3043 = vmatpush.bf16.msra.mxu3 %v2652_v1  ;;  %v2641_v6 = vld [vmem:[%s4302_s1 + $0x20] sm:$0xff]  ;;  %v2640_v8 = vld [vmem:[%s4302_s1 + $0x18] sm:$0xff]  ;;  %v2639_v10 = vld [vmem:[%s4302_s1 + $0x10] sm:$0xff] }
  0x14   : > { %v2649_v7 = vld [vmem:[%s4302_s1 + $0x60] sm:$0xff]  ;;  %v2648_v9 = vld [vmem:[%s4302_s1 + $0x58] sm:$0xff]  ;;  %v2647_v11 = vld [vmem:[%s4302_s1 + $0x50] sm:$0xff] }
  0x15   : > { %v2638_v12 = vld [vmem:[%s4302_s1 + $0x8] sm:$0xff]  ;;  %v2637_v14 = vld [vmem:[%s4302_s1] sm:$0xff]  ;;  %v2258_v22 = vld [vmem:[%s4301_s0 + $0x10] sm:$0xf] }
  0x16   : > { %747 = vmatpush.bf16.msra.mxu0 %v2643_v2  ;;  %3036 = vmatpush.bf16.msra.mxu2 %v2643_v2  ;;  %v2646_v13 = vld [vmem:[%s4302_s1 + $0x48] sm:$0xff]  ;;  %v2645_v15 = vld [vmem:[%s4302_s1 + $0x40] sm:$0xff]  ;;  %v2576_v23 = vld [vmem:[%s4301_s0 + $0x14] sm:$0xf0] }
  0x17   : > { %916 = vmatpush.bf16.msra.mxu1 %v2651_v3  ;;  %3044 = vmatpush.bf16.msra.mxu3 %v2651_v3  ;;  %v2250_v16 = vld [vmem:[%s4301_s0] sm:$0xf]  ;;  %v2574_v17 = vld [vmem:[%s4301_s0 + $0x4] sm:$0xf0]  ;;  %v2573_v18 = vld [vmem:[%s4301_s0 + $0x4] sm:$0xf]  ;;  %v2259_v26 = vor.u32 %v2576_v23, %v2258_v22 }
  0x18   : > { %v2252_v19 = vld [vmem:[%s4301_s0 + $0x8] sm:$0xf0]  ;;  %v2251_v20 = vor.u32 %v2574_v17, %v2250_v16  ;;  %v2575_v24 = vld [vmem:[%s4301_s0 + $0x14] sm:$0xf]  ;;  %v2260_v25 = vld [vmem:[%s4301_s0 + $0x18] sm:$0xf0] }
  0x19   : > { %v2255_v21 = vor.u32 %v2573_v18, %v2252_v19  ;;  %v2263_v27 = vor.u32 %v2575_v24, %v2260_v25  ;;  %v2378_v28 = vld [vmem:[%s4301_s0 + $0x100] sm:$0xf]  ;;  %v2606_v29 = vld [vmem:[%s4301_s0 + $0x104] sm:$0xf0]  ;;  %v2605_v30 = vld [vmem:[%s4301_s0 + $0x104] sm:$0xf] }
  0x1a   : > { %748 = vmatpush.bf16.msra.mxu0 %v2642_v4  ;;  %3037 = vmatpush.bf16.msra.mxu2 %v2642_v4  ;;  %v2379_v31 = vor.u32 %v2606_v29, %v2378_v28  ;;  %v2380_v32 = vld [vmem:[%s4301_s0 + $0x108] sm:$0xf0]  ;;  %v2266_v34 = vld [vmem:[%s4301_s0 + $0x20] sm:$0xf]  ;;  %v2578_v35 = vld [vmem:[%s4301_s0 + $0x24] sm:$0xf0] }
  0x1b   : > { %917 = vmatpush.bf16.msra.mxu1 %v2650_v5  ;;  %3045 = vmatpush.bf16.msra.mxu3 %v2650_v5  ;;  %v2383_v33 = vor.u32 %v2605_v30, %v2380_v32  ;;  %v2577_v36 = vld [vmem:[%s4301_s0 + $0x24] sm:$0xf]  ;;  %v2268_v37 = vld [vmem:[%s4301_s0 + $0x28] sm:$0xf0]  ;;  %v2267_v38 = vor.u32 %v2578_v35, %v2266_v34  ;;  %v2386_v40 = vld [vmem:[%s4301_s0 + $0x110] sm:$0xf] }
  0x1c   : > { %v2271_v39 = vor.u32 %v2577_v36, %v2268_v37  ;;  %v2608_v41 = vld [vmem:[%s4301_s0 + $0x114] sm:$0xf0]  ;;  %v2607_v42 = vld [vmem:[%s4301_s0 + $0x114] sm:$0xf]  ;;  %v2388_v44 = vld [vmem:[%s4301_s0 + $0x118] sm:$0xf0] }
  0x1d   : > { %v2387_v43 = vor.u32 %v2608_v41, %v2386_v40  ;;  %v2391_v45 = vor.u32 %v2607_v42, %v2388_v44  ;;  %v2274_v46 = vld [vmem:[%s4301_s0 + $0x30] sm:$0xf]  ;;  %v2580_v47 = vld [vmem:[%s4301_s0 + $0x34] sm:$0xf0]  ;;  %v2579_v48 = vld [vmem:[%s4301_s0 + $0x34] sm:$0xf] }
  0x1e   : > { %749 = vmatpush.bf16.msra.mxu0 %v2641_v6  ;;  %3038 = vmatpush.bf16.msra.mxu2 %v2641_v6  ;;  %v2276_v49 = vld [vmem:[%s4301_s0 + $0x38] sm:$0xf0]  ;;  %v2275_v50 = vor.u32 %v2580_v47, %v2274_v46  ;;  %v2394_v52 = vld [vmem:[%s4301_s0 + $0x120] sm:$0xf]  ;;  %v2610_v53 = vld [vmem:[%s4301_s0 + $0x124] sm:$0xf0] }
  0x1f   : > { %918 = vmatpush.bf16.msra.mxu1 %v2649_v7  ;;  %3046 = vmatpush.bf16.msra.mxu3 %v2649_v7  ;;  %v2279_v51 = vor.u32 %v2579_v48, %v2276_v49  ;;  %v2609_v54 = vld [vmem:[%s4301_s0 + $0x124] sm:$0xf]  ;;  %v2395_v55 = vor.u32 %v2610_v53, %v2394_v52  ;;  %v2396_v56 = vld [vmem:[%s4301_s0 + $0x128] sm:$0xf0]  ;;  %v2282_v58 = vld [vmem:[%s4301_s0 + $0x40] sm:$0xf] }
  0x20   : > { %v2399_v57 = vor.u32 %v2609_v54, %v2396_v56  ;;  %v2582_v59 = vld [vmem:[%s4301_s0 + $0x44] sm:$0xf0]  ;;  %v2581_v60 = vld [vmem:[%s4301_s0 + $0x44] sm:$0xf]  ;;  %v2284_v61 = vld [vmem:[%s4301_s0 + $0x48] sm:$0xf0] }
  0x21   : > { %v2283_v62 = vor.u32 %v2582_v59, %v2282_v58  ;;  %v2287_v63 = vor.u32 %v2581_v60, %v2284_v61  ;;  %v2402_v0 = vld [vmem:[%s4301_s0 + $0x130] sm:$0xf]  ;;  %v2612_v1 = vld [vmem:[%s4301_s0 + $0x134] sm:$0xf0]  ;;  %v2611_v2 = vld [vmem:[%s4301_s0 + $0x134] sm:$0xf] }
  0x22   : > { %750 = vmatpush.bf16.msra.mxu0 %v2640_v8  ;;  %3039 = vmatpush.bf16.msra.mxu2 %v2640_v8  ;;  %v2403_v3 = vor.u32 %v2612_v1, %v2402_v0  ;;  %v2404_v4 = vld [vmem:[%s4301_s0 + $0x138] sm:$0xf0]  ;;  %v2290_v6 = vld [vmem:[%s4301_s0 + $0x50] sm:$0xf]  ;;  %v2584_v7 = vld [vmem:[%s4301_s0 + $0x54] sm:$0xf0] }
  0x23   : > { %919 = vmatpush.bf16.msra.mxu1 %v2648_v9  ;;  %3047 = vmatpush.bf16.msra.mxu3 %v2648_v9  ;;  %v2407_v5 = vor.u32 %v2611_v2, %v2404_v4  ;;  %v2583_v8 = vld [vmem:[%s4301_s0 + $0x54] sm:$0xf]  ;;  %v2292_v9 = vld [vmem:[%s4301_s0 + $0x58] sm:$0xf0]  ;;  %v2412_v16 = vld [vmem:[%s4301_s0 + $0x148] sm:$0xf0] }
  0x24   : > { %v2298_v18 = vld [vmem:[%s4301_s0 + $0x60] sm:$0xf]  ;;  %v2586_v19 = vld [vmem:[%s4301_s0 + $0x64] sm:$0xf0]  ;;  %v2418_v24 = vld [vmem:[%s4301_s0 + $0x150] sm:$0xf] }
  0x25   : > { %v2299_v22 = vor.u32 %v2586_v19, %v2298_v18  ;;  %v2616_v25 = vld [vmem:[%s4301_s0 + $0x154] sm:$0xf0]  ;;  %v2420_v28 = vld [vmem:[%s4301_s0 + $0x158] sm:$0xf0]  ;;  %v2306_v30 = vld [vmem:[%s4301_s0 + $0x70] sm:$0xf] }
  0x26   : > { %751 = vmatpush.bf16.msra.mxu0 %v2639_v10  ;;  %3040 = vmatpush.bf16.msra.mxu2 %v2639_v10  ;;  %v2291_v10 = vor.u32 %v2584_v7, %v2290_v6  ;;  %v2587_v32 = vld [vmem:[%s4301_s0 + $0x74] sm:$0xf]  ;;  %v2426_v36 = vld [vmem:[%s4301_s0 + $0x160] sm:$0xf]  ;;  %v2618_v37 = vld [vmem:[%s4301_s0 + $0x164] sm:$0xf0] }
  0x27   : > { %920 = vmatpush.bf16.msra.mxu1 %v2647_v11  ;;  %3048 = vmatpush.bf16.msra.mxu3 %v2647_v11  ;;  %v2295_v11 = vor.u32 %v2583_v8, %v2292_v9  ;;  %v2428_v40 = vld [vmem:[%s4301_s0 + $0x168] sm:$0xf0]  ;;  %v2314_v42 = vld [vmem:[%s4301_s0 + $0x80] sm:$0xf]  ;;  %v2589_v44 = vld [vmem:[%s4301_s0 + $0x84] sm:$0xf] }
  0x28   : > { %v2620_v52 = vld [vmem:[%s4301_s0 + $0x174] sm:$0xf0]  ;;  %v2619_v53 = vld [vmem:[%s4301_s0 + $0x174] sm:$0xf]  ;;  %v2322_v0 = vld [vmem:[%s4301_s0 + $0x90] sm:$0xf] }
  0x29   : > { %v2592_v1 = vld [vmem:[%s4301_s0 + $0x94] sm:$0xf0]  ;;  %v2591_v2 = vld [vmem:[%s4301_s0 + $0x94] sm:$0xf] }
  0x2a   : > { %752 = vmatpush.bf16.msra.mxu0 %v2638_v12  ;;  %3041 = vmatpush.bf16.msra.mxu2 %v2638_v12  ;;  %v2410_v12 = vld [vmem:[%s4301_s0 + $0x140] sm:$0xf] }
  0x2b   : > { %921 = vmatpush.bf16.msra.mxu1 %v2646_v13  ;;  %3049 = vmatpush.bf16.msra.mxu3 %v2646_v13  ;;  %v2614_v13 = vld [vmem:[%s4301_s0 + $0x144] sm:$0xf0] }
  0x2e   : > { %753 = vmatpush.bf16.msra.mxu0 %v2637_v14  ;;  %3042 = vmatpush.bf16.msra.mxu2 %v2637_v14  ;;  %v2613_v14 = vld [vmem:[%s4301_s0 + $0x144] sm:$0xf] }
  0x2f   : > { %922 = vmatpush.bf16.msra.mxu1 %v2645_v15  ;;  %3050 = vmatpush.bf16.msra.mxu3 %v2645_v15  ;;  %v2411_v15 = vor.u32 %v2614_v13, %v2410_v12  ;;  %v2415_v17 = vor.u32 %v2613_v14, %v2412_v16  ;;  %v2621_v12 = vld [vmem:[%s4301_s0 + $0x184] sm:$0xf]  ;;  %v2444_v16 = vld [vmem:[%s4301_s0 + $0x188] sm:$0xf0] }
  0x31   : > { %754 = vmatmul.bf16.vlgmr.msra.gmra.mxu0 %v2251_v20  ;;  %834 = vmatmul.bf16.vlgmr.msra.gmra.mxu2 %v2379_v31  ;;  %v2585_v20 = vld [vmem:[%s4301_s0 + $0x64] sm:$0xf]  ;;  %v2588_v31 = vld [vmem:[%s4301_s0 + $0x74] sm:$0xf0] }
  0x32   : > { %923 = vmatmul.bf16.vlgmr.msra.gmra.mxu1 %v2255_v21  ;;  %1003 = vmatmul.bf16.vlgmr.msra.gmra.mxu3 %v2383_v33  ;;  %v2300_v21 = vld [vmem:[%s4301_s0 + $0x68] sm:$0xf0]  ;;  %v2308_v33 = vld [vmem:[%s4301_s0 + $0x78] sm:$0xf0]  ;;  %v2307_v34 = vor.u32 %v2588_v31, %v2306_v30 }
  0x33   : > { %v2303_v23 = vor.u32 %v2585_v20, %v2300_v21  ;;  %v2311_v35 = vor.u32 %v2587_v32, %v2308_v33  ;;  %v2332_v30 = vld [vmem:[%s4301_s0 + $0xa8] sm:$0xf0] }
  0x41   : > { %759 = vmatmul.bf16.gmra.mxu0 %v2259_v26  ;;  %839 = vmatmul.bf16.gmra.mxu2 %v2387_v43  ;;  %v2615_v26 = vld [vmem:[%s4301_s0 + $0x154] sm:$0xf]  ;;  %v2590_v43 = vld [vmem:[%s4301_s0 + $0x84] sm:$0xf0] }
  0x42   : > { %928 = vmatmul.bf16.gmra.mxu1 %v2263_v27  ;;  %1008 = vmatmul.bf16.gmra.mxu3 %v2391_v45  ;;  %v2419_v27 = vor.u32 %v2616_v25, %v2418_v24  ;;  %v2423_v29 = vor.u32 %v2615_v26, %v2420_v28  ;;  %v2316_v45 = vld [vmem:[%s4301_s0 + $0x88] sm:$0xf0]  ;;  %v2315_v46 = vor.u32 %v2590_v43, %v2314_v42  ;;  %v2594_v28 = vld [vmem:[%s4301_s0 + $0xa4] sm:$0xf0]  ;;  %v2624_v42 = vld [vmem:[%s4301_s0 + $0x194] sm:$0xf0] }
  0x43   : > { %v2319_v47 = vor.u32 %v2589_v44, %v2316_v45  ;;  %v2623_v43 = vld [vmem:[%s4301_s0 + $0x194] sm:$0xf] }
  0x51   : > { %764 = vmatmul.bf16.gmra.mxu0 %v2267_v38  ;;  %844 = vmatmul.bf16.gmra.mxu2 %v2395_v55  ;;  %v2617_v38 = vld [vmem:[%s4301_s0 + $0x164] sm:$0xf]  ;;  %v2436_v55 = vld [vmem:[%s4301_s0 + $0x178] sm:$0xf0] }
  0x52   : > { %933 = vmatmul.bf16.gmra.mxu1 %v2271_v39  ;;  %1013 = vmatmul.bf16.gmra.mxu3 %v2399_v57  ;;  %v2427_v39 = vor.u32 %v2618_v37, %v2426_v36  ;;  %v2431_v41 = vor.u32 %v2617_v38, %v2428_v40  ;;  %v2439_v56 = vor.u32 %v2619_v53, %v2436_v55 }
  0x61   : > { %769 = vmatmul.bf16.gmra.mxu0 %v2275_v50  ;;  %849 = vmatmul.bf16.gmra.mxu2 %v2403_v3  ;;  %v2324_v3 = vld [vmem:[%s4301_s0 + $0x98] sm:$0xf0] }
  0x62   : > { %938 = vmatmul.bf16.gmra.mxu1 %v2279_v51  ;;  %1018 = vmatmul.bf16.gmra.mxu3 %v2407_v5  ;;  %v2434_v51 = vld [vmem:[%s4301_s0 + $0x170] sm:$0xf]  ;;  %v2323_v5 = vor.u32 %v2592_v1, %v2322_v0  ;;  %v2327_v6 = vor.u32 %v2591_v2, %v2324_v3 }
  0x63   : > { %v2435_v54 = vor.u32 %v2620_v52, %v2434_v51 }
  0x71   : > { %774 = vmatmul.bf16.gmra.mxu0 %v2283_v62  ;;  %854 = vmatmul.bf16.gmra.mxu2 %v2411_v15 }
  0x72   : > { %943 = vmatmul.bf16.gmra.mxu1 %v2287_v63  ;;  %1023 = vmatmul.bf16.gmra.mxu3 %v2415_v17  ;;  %v2447_v17 = vor.u32 %v2621_v12, %v2444_v16 }
  0x81   : > { %779 = vmatmul.bf16.gmra.mxu0 %v2291_v10  ;;  %859 = vmatmul.bf16.gmra.mxu2 %v2419_v27  ;;  %v2442_v10 = vld [vmem:[%s4301_s0 + $0x180] sm:$0xf] }
  0x82   : > { %948 = vmatmul.bf16.gmra.mxu1 %v2295_v11  ;;  %1028 = vmatmul.bf16.gmra.mxu3 %v2423_v29  ;;  %v2622_v11 = vld [vmem:[%s4301_s0 + $0x184] sm:$0xf0]  ;;  %v2330_v27 = vld [vmem:[%s4301_s0 + $0xa0] sm:$0xf]  ;;  %v2593_v29 = vld [vmem:[%s4301_s0 + $0xa4] sm:$0xf] }
  0x83   : > { %v2443_v15 = vor.u32 %v2622_v11, %v2442_v10  ;;  %v2331_v33 = vor.u32 %v2594_v28, %v2330_v27  ;;  %v2626_v10 = vld [vmem:[%s4301_s0 + $0x1a4] sm:$0xf0]  ;;  %v2625_v11 = vld [vmem:[%s4301_s0 + $0x1a4] sm:$0xf]  ;;  %v2346_v27 = vld [vmem:[%s4301_s0 + $0xc0] sm:$0xf] }
  0x84   : > { %v2598_v28 = vld [vmem:[%s4301_s0 + $0xc4] sm:$0xf0] }
  0x91   : > { %784 = vmatmul.bf16.gmra.mxu0 %v2299_v22  ;;  %864 = vmatmul.bf16.gmra.mxu2 %v2427_v39 }
  0x92   : > { %953 = vmatmul.bf16.gmra.mxu1 %v2303_v23  ;;  %1033 = vmatmul.bf16.gmra.mxu3 %v2431_v41  ;;  %v2450_v41 = vld [vmem:[%s4301_s0 + $0x190] sm:$0xf] }
  0xa1   : > { %789 = vmatmul.bf16.gmra.mxu0 %v2307_v34  ;;  %869 = vmatmul.bf16.gmra.mxu2 %v2435_v54  ;;  %v2335_v34 = vor.u32 %v2593_v29, %v2332_v30  ;;  %v2597_v29 = vld [vmem:[%s4301_s0 + $0xc4] sm:$0xf]  ;;  %v2348_v30 = vld [vmem:[%s4301_s0 + $0xc8] sm:$0xf0] }
  0xa2   : > { %958 = vmatmul.bf16.gmra.mxu1 %v2311_v35  ;;  %1038 = vmatmul.bf16.gmra.mxu3 %v2439_v56 }
  0xae   : > { %v755_v48 = vpop.f32.mrf.mxu0 }
  0xaf   : > { %v924_v49 = vpop.f32.mrf.mxu1 }
  0xb0   : > { %v925_v50 = vadd.f32 %v924_v49, %v755_v48 }
  0xb1   : > { %794 = vmatmul.bf16.gmra.mxu0 %v2315_v46  ;;  %874 = vmatmul.bf16.gmra.mxu2 %v2443_v15  ;;  %v2451_v46 = vor.u32 %v2624_v42, %v2450_v41  ;;  %v2460_v15 = vld [vmem:[%s4301_s0 + $0x1a8] sm:$0xf0] }
  0xb2   : > { %1086 = vst [vmem:[#allocation2 + $0xb0] sm:$0xff] %v925_v50  ;;  %963 = vmatmul.bf16.gmra.mxu1 %v2319_v47  ;;  %v1357_v60 = vmul.f32 %v925_v50, %v925_v50  ;;  %1043 = vmatmul.bf16.gmra.mxu3 %v2447_v17  ;;  %v2452_v47 = vld [vmem:[%s4301_s0 + $0x198] sm:$0xf0]  ;;  %v2463_v17 = vor.u32 %v2625_v11, %v2460_v15  ;;  %v2629_v15 = vld [vmem:[%s4301_s0 + $0x1c4] sm:$0xf] }
  0xb3   : > { %v2455_v49 = vor.u32 %v2623_v43, %v2452_v47  ;;  %v2466_v43 = vld [vmem:[%s4301_s0 + $0x1b0] sm:$0xf] }
  0xb4   : > { %v835_v22 = vpop.f32.mrf.mxu2 }
  0xb5   : > { %v1004_v23 = vpop.f32.mrf.mxu3 }
  0xb6   : > { %v757_v57 = vpop.f32.mrf.mxu0  ;;  %v3451_v32 = vadd.f32 %v1004_v23, %v835_v22 }
  0xb7   : > { %v926_v58 = vpop.f32.mrf.mxu1 }
  0xb8   : > { %v927_v59 = vadd.f32 %v926_v58, %v757_v57  ;;  %1118 = vst [vmem:[#allocation2 + $0x148] sm:$0xff] %v3451_v32 }
  0xba   : > { %1087 = vst [vmem:[#allocation2 + $0x1b0] sm:$0xff] %v927_v59  ;;  %v2656_v61 = vpack.c.bf16 %v927_v59, %v925_v50  ;;  %v1285_v62 = vadd.f32 %v927_v59, %v925_v50  ;;  %v1358_v63 = vmul.f32 %v927_v59, %v927_v59  ;;  %v2338_v59 = vld [vmem:[%s4301_s0 + $0xb0] sm:$0xf] }
  0xbc   : > { %2657 = vst [vmem:[%s4305_s4] sm:$0xff] %v2656_v61   ;;  %v1421_v4 = vadd.f32 %v1358_v63, %v1357_v60  ;;  %v837_v38 = vpop.f32.mrf.mxu2  ;;  %v2596_v60 = vld [vmem:[%s4301_s0 + $0xb4] sm:$0xf0]  ;;  %v2595_v61 = vld [vmem:[%s4301_s0 + $0xb4] sm:$0xf] }
  0xbd   : > { %v1006_v39 = vpop.f32.mrf.mxu3  ;;  %v2339_v1 = vor.u32 %v2596_v60, %v2338_v59 }
  0xbe   : > { %v760_v7 = vpop.f32.mrf.mxu0  ;;  %v3454_v40 = vadd.f32 %v1006_v39, %v837_v38 }
  0xbf   : > { %v929_v8 = vpop.f32.mrf.mxu1 }
  0xc0   : > { %v930_v9 = vadd.f32 %v929_v8, %v760_v7  ;;  %1119 = vst [vmem:[#allocation2 + $0x1d0] sm:$0xff] %v3454_v40  ;;  %v2736_v48 = vpack.c.bf16 %v3454_v40, %v3451_v32 }
  0xc1   : > { %799 = vmatmul.bf16.gmra.mxu0 %v2323_v5  ;;  %879 = vmatmul.bf16.gmra.mxu2 %v2451_v46 }
  0xc2   : > { %1088 = vst [vmem:[#allocation2 + $0xd8] sm:$0xff] %v930_v9  ;;  %v1286_v13 = vadd.f32 %v1285_v62, %v930_v9  ;;  %v1359_v14 = vmul.f32 %v930_v9, %v930_v9  ;;  %968 = vmatmul.bf16.gmra.mxu1 %v2327_v6  ;;  %1048 = vmatmul.bf16.gmra.mxu3 %v2455_v49  ;;  %v2340_v62 = vld [vmem:[%s4301_s0 + $0xb8] sm:$0xf0] }
  0xc3   : > { %2988 = vst [vmem:[%s4305_s4 + $0x80] sm:$0xff] %v2736_v48   ;;  %v2343_v2 = vor.u32 %v2595_v61, %v2340_v62  ;;  %v2468_v49 = vld [vmem:[%s4301_s0 + $0x1b8] sm:$0xf0]  ;;  %v2354_v61 = vld [vmem:[%s4301_s0 + $0xd0] sm:$0xf] }
  0xc4   : > { %v1422_v18 = vadd.f32 %v1421_v4, %v1359_v14  ;;  %v840_v54 = vpop.f32.mrf.mxu2  ;;  %v2600_v62 = vld [vmem:[%s4301_s0 + $0xd4] sm:$0xf0] }
  0xc5   : > { %v1009_v55 = vpop.f32.mrf.mxu3 }
  0xc6   : > { %v762_v19 = vpop.f32.mrf.mxu0  ;;  %v3489_v0 = vadd.f32 %v1009_v55, %v840_v54 }
  0xc7   : > { %v931_v20 = vpop.f32.mrf.mxu1 }
  0xc8   : > { %v932_v21 = vadd.f32 %v931_v20, %v762_v19  ;;  %1120 = vst [vmem:[#allocation2 + $0x100] sm:$0xff] %v3489_v0 }
  0xca   : > { %1089 = vst [vmem:[#allocation2 + $0x18] sm:$0xff] %v932_v21  ;;  %v2661_v24 = vpack.c.bf16 %v932_v21, %v930_v9  ;;  %v1287_v25 = vadd.f32 %v1286_v13, %v932_v21  ;;  %v1360_v26 = vmul.f32 %v932_v21, %v932_v21  ;;  %v2458_v9 = vld [vmem:[%s4301_s0 + $0x1a0] sm:$0xf] }
  0xcb   : > { %v2459_v14 = vor.u32 %v2626_v10, %v2458_v9 }
  0xcc   : > { %2973 = vst [vmem:[%s4305_s4 + $0x8] sm:$0xff] %v2661_v24   ;;  %v1423_v31 = vadd.f32 %v1422_v18, %v1360_v26  ;;  %v842_v6 = vpop.f32.mrf.mxu2 }
  0xcd   : > { %v1011_v7 = vpop.f32.mrf.mxu3 }
  0xce   : > { %v765_v35 = vpop.f32.mrf.mxu0  ;;  %v3492_v8 = vadd.f32 %v1011_v7, %v842_v6 }
  0xcf   : > { %v934_v36 = vpop.f32.mrf.mxu1 }
  0xd0   : > { %v935_v37 = vadd.f32 %v934_v36, %v765_v35  ;;  %1121 = vst [vmem:[#allocation2 + $0xc8] sm:$0xff] %v3492_v8  ;;  %v2741_v16 = vpack.c.bf16 %v3492_v8, %v3489_v0  ;;  %v2351_v35 = vor.u32 %v2597_v29, %v2348_v30 }
  0xd1   : > { %804 = vmatmul.bf16.gmra.mxu0 %v2331_v33  ;;  %884 = vmatmul.bf16.gmra.mxu2 %v2459_v14  ;;  %v2630_v14 = vld [vmem:[%s4301_s0 + $0x1c4] sm:$0xf0] }
  0xd2   : > { %1090 = vst [vmem:[#allocation2 + $0x50] sm:$0xff] %v935_v37  ;;  %v1288_v44 = vadd.f32 %v1287_v25, %v935_v37  ;;  %v1361_v45 = vmul.f32 %v935_v37, %v935_v37  ;;  %973 = vmatmul.bf16.gmra.mxu1 %v2335_v34  ;;  %1053 = vmatmul.bf16.gmra.mxu3 %v2463_v17 }
  0xd3   : > { %2989 = vst [vmem:[%s4305_s4 + $0x88] sm:$0xff] %v2741_v16   ;;  %v2347_v34 = vor.u32 %v2598_v28, %v2346_v27 }
  0xd4   : > { %v1424_v50 = vadd.f32 %v1423_v31, %v1361_v45  ;;  %v845_v22 = vpop.f32.mrf.mxu2  ;;  %v2627_v45 = vld [vmem:[%s4301_s0 + $0x1b4] sm:$0xf] }
  0xd5   : > { %v1014_v23 = vpop.f32.mrf.mxu3 }
  0xd6   : > { %v767_v51 = vpop.f32.mrf.mxu0  ;;  %v3527_v33 = vadd.f32 %v1014_v23, %v845_v22 }
  0xd7   : > { %v936_v52 = vpop.f32.mrf.mxu1 }
  0xd8   : > { %v937_v53 = vadd.f32 %v936_v52, %v767_v51  ;;  %1122 = vst [vmem:[#allocation2 + $0x40] sm:$0xff] %v3527_v33  ;;  %v2471_v51 = vor.u32 %v2627_v45, %v2468_v49  ;;  %v2482_v49 = vld [vmem:[%s4301_s0 + $0x1d0] sm:$0xf] }
  0xda   : > { %1091 = vst [vmem:[#allocation2 + $0x168] sm:$0xff] %v937_v53  ;;  %v2666_v56 = vpack.c.bf16 %v937_v53, %v935_v37  ;;  %v1289_v57 = vadd.f32 %v1288_v44, %v937_v53  ;;  %v1362_v58 = vmul.f32 %v937_v53, %v937_v53  ;;  %v2628_v44 = vld [vmem:[%s4301_s0 + $0x1b4] sm:$0xf0] }
  0xdb   : > { %v2467_v48 = vor.u32 %v2628_v44, %v2466_v43 }
  0xdc   : > { %2974 = vst [vmem:[%s4305_s4 + $0x10] sm:$0xff] %v2666_v56   ;;  %v1425_v63 = vadd.f32 %v1424_v50, %v1362_v58  ;;  %v847_v39 = vpop.f32.mrf.mxu2 }
  0xdd   : > { %v1016_v41 = vpop.f32.mrf.mxu3 }
  0xde   : > { %v770_v3 = vpop.f32.mrf.mxu0  ;;  %v3530_v42 = vadd.f32 %v1016_v41, %v847_v39 }
  0xdf   : > { %v939_v4 = vpop.f32.mrf.mxu1 }
  0xe0   : > { %v940_v5 = vadd.f32 %v939_v4, %v770_v3  ;;  %1123 = vst [vmem:[#allocation2 + $0x1f8] sm:$0xff] %v3530_v42  ;;  %v2746_v50 = vpack.c.bf16 %v3530_v42, %v3527_v33  ;;  %v2355_v4 = vor.u32 %v2600_v62, %v2354_v61 }
  0xe1   : > { %809 = vmatmul.bf16.gmra.mxu0 %v2339_v1  ;;  %889 = vmatmul.bf16.gmra.mxu2 %v2467_v48  ;;  %v2356_v1 = vld [vmem:[%s4301_s0 + $0xd8] sm:$0xf0] }
  0xe2   : > { %1092 = vst [vmem:[#allocation2 + $0x130] sm:$0xff] %v940_v5  ;;  %v1290_v12 = vadd.f32 %v1289_v57, %v940_v5  ;;  %v1363_v13 = vmul.f32 %v940_v5, %v940_v5  ;;  %978 = vmatmul.bf16.gmra.mxu1 %v2343_v2  ;;  %1058 = vmatmul.bf16.gmra.mxu3 %v2471_v51  ;;  %v2631_v51 = vld [vmem:[%s4301_s0 + $0x1d4] sm:$0xf] }
  0xe3   : > { %2990 = vst [vmem:[%s4305_s4 + $0x90] sm:$0xff] %v2746_v50   ;;  %v2632_v50 = vld [vmem:[%s4301_s0 + $0x1d4] sm:$0xf0] }
  0xe4   : > { %v1426_v18 = vadd.f32 %v1425_v63, %v1363_v13  ;;  %v850_v56 = vpop.f32.mrf.mxu2  ;;  %v2599_v63 = vld [vmem:[%s4301_s0 + $0xd4] sm:$0xf]  ;;  %v2474_v13 = vld [vmem:[%s4301_s0 + $0x1c0] sm:$0xf] }
  0xe5   : > { %v1019_v57 = vpop.f32.mrf.mxu3 }
  0xe6   : > { %v772_v19 = vpop.f32.mrf.mxu0  ;;  %v3565_v3 = vadd.f32 %v1019_v57, %v850_v56 }
  0xe7   : > { %v941_v20 = vpop.f32.mrf.mxu1 }
  0xe8   : > { %v942_v21 = vadd.f32 %v941_v20, %v772_v19  ;;  %1124 = vst [vmem:[#allocation2 + $0x20] sm:$0xff] %v3565_v3  ;;  %v2476_v19 = vld [vmem:[%s4301_s0 + $0x1c8] sm:$0xf0] }
  0xea   : > { %1093 = vst [vmem:[#allocation2 + $0x48] sm:$0xff] %v942_v21  ;;  %v2671_v24 = vpack.c.bf16 %v942_v21, %v940_v5  ;;  %v1291_v25 = vadd.f32 %v1290_v12, %v942_v21  ;;  %v1364_v26 = vmul.f32 %v942_v21, %v942_v21  ;;  %v2359_v5 = vor.u32 %v2599_v63, %v2356_v1 }
  0xeb   : > { %v2479_v21 = vor.u32 %v2629_v15, %v2476_v19 }
  0xec   : > { %2975 = vst [vmem:[%s4305_s4 + $0x18] sm:$0xff] %v2671_v24   ;;  %v1427_v31 = vadd.f32 %v1426_v18, %v1364_v26  ;;  %v852_v10 = vpop.f32.mrf.mxu2  ;;  %v2475_v18 = vor.u32 %v2630_v14, %v2474_v13 }
  0xed   : > { %v1021_v11 = vpop.f32.mrf.mxu3 }
  0xee   : > { %v775_v36 = vpop.f32.mrf.mxu0  ;;  %v3568_v12 = vadd.f32 %v1021_v11, %v852_v10 }
  0xef   : > { %v944_v37 = vpop.f32.mrf.mxu1 }
  0xf0   : > { %v945_v38 = vadd.f32 %v944_v37, %v775_v36  ;;  %1125 = vst [vmem:[#allocation2 + $0x128] sm:$0xff] %v3568_v12  ;;  %v2751_v20 = vpack.c.bf16 %v3568_v12, %v3565_v3  ;;  %v2364_v36 = vld [vmem:[%s4301_s0 + $0xe8] sm:$0xf0] }
  0xf1   : > { %814 = vmatmul.bf16.gmra.mxu0 %v2347_v34  ;;  %894 = vmatmul.bf16.gmra.mxu2 %v2475_v18  ;;  %v2602_v34 = vld [vmem:[%s4301_s0 + $0xe4] sm:$0xf0] }
  0xf2   : > { %1094 = vst [vmem:[#allocation2 + $0x180] sm:$0xff] %v945_v38  ;;  %v1292_v46 = vadd.f32 %v1291_v25, %v945_v38  ;;  %v1365_v47 = vmul.f32 %v945_v38, %v945_v38  ;;  %983 = vmatmul.bf16.gmra.mxu1 %v2351_v35  ;;  %1063 = vmatmul.bf16.gmra.mxu3 %v2479_v21  ;;  %v2601_v35 = vld [vmem:[%s4301_s0 + $0xe4] sm:$0xf]  ;;  %v2490_v21 = vld [vmem:[%s4301_s0 + $0x1e0] sm:$0xf] }
  0xf3   : > { %2991 = vst [vmem:[%s4305_s4 + $0x98] sm:$0xff] %v2751_v20   ;;  %v2367_v41 = vor.u32 %v2601_v35, %v2364_v36 }
  0xf4   : > { %v1428_v52 = vadd.f32 %v1427_v31, %v1365_v47  ;;  %v855_v26 = vpop.f32.mrf.mxu2  ;;  %v2362_v31 = vld [vmem:[%s4301_s0 + $0xe0] sm:$0xf] }
  0xf5   : > { %v1024_v27 = vpop.f32.mrf.mxu3  ;;  %v2363_v39 = vor.u32 %v2602_v34, %v2362_v31 }
  0xf6   : > { %v777_v53 = vpop.f32.mrf.mxu0 }
  0xf7   : > { %v946_v54 = vpop.f32.mrf.mxu1 }
  0xf8   : > { %v947_v55 = vadd.f32 %v946_v54, %v777_v53  ;;  %v2483_v54 = vor.u32 %v2632_v50, %v2482_v49 }
  0xfa   : > { %1095 = vst [vmem:[#allocation2 + $0x110] sm:$0xff] %v947_v55  ;;  %v2676_v58 = vpack.c.bf16 %v947_v55, %v945_v38  ;;  %v1293_v59 = vadd.f32 %v1292_v46, %v947_v55  ;;  %v1366_v60 = vmul.f32 %v947_v55, %v947_v55  ;;  %v3603_v38 = vadd.f32 %v1024_v27, %v855_v26  ;;  %v2484_v55 = vld [vmem:[%s4301_s0 + $0x1d8] sm:$0xf0]  ;;  %v2492_v27 = vld [vmem:[%s4301_s0 + $0x1e8] sm:$0xf0] }
  0xfb   : > { %v2487_v57 = vor.u32 %v2631_v51, %v2484_v55  ;;  %v2635_v55 = vld [vmem:[%s4301_s0 + $0x1f4] sm:$0xf] }
  0xfc   : > { %2976 = vst [vmem:[%s4305_s4 + $0x20] sm:$0xff] %v2676_v58   ;;  %v1429_v2 = vadd.f32 %v1428_v52, %v1366_v60  ;;  %v857_v46 = vpop.f32.mrf.mxu2 }
  0xfd   : > { %1126 = vst [vmem:[#allocation2 + $0x1a0] sm:$0xff] %v3603_v38  ;;  %v1026_v47 = vpop.f32.mrf.mxu3 }
  0xfe   : > { %v780_v6 = vpop.f32.mrf.mxu0  ;;  %v3606_v48 = vadd.f32 %v1026_v47, %v857_v46 }
  0xff   : > { %v949_v7 = vpop.f32.mrf.mxu1 }
 0x100   : > { %v950_v9 = vadd.f32 %v949_v7, %v780_v6  ;;  %1127 = vst [vmem:[#allocation2 + $0x1f0] sm:$0xff] %v3606_v48  ;;  %v2756_v56 = vpack.c.bf16 %v3606_v48, %v3603_v38  ;;  %v2604_v6 = vld [vmem:[%s4301_s0 + $0xf4] sm:$0xf0]  ;;  %v2603_v7 = vld [vmem:[%s4301_s0 + $0xf4] sm:$0xf] }
 0x101   : > { %819 = vmatmul.bf16.gmra.mxu0 %v2355_v4  ;;  %899 = vmatmul.bf16.gmra.mxu2 %v2483_v54  ;;  %v2636_v54 = vld [vmem:[%s4301_s0 + $0x1f4] sm:$0xf0] }
 0x102   : > { %1096 = vst [vmem:[#allocation2 + $0x118] sm:$0xff] %v950_v9  ;;  %v1294_v16 = vadd.f32 %v1293_v59, %v950_v9  ;;  %v1367_v17 = vmul.f32 %v950_v9, %v950_v9  ;;  %988 = vmatmul.bf16.gmra.mxu1 %v2359_v5  ;;  %1068 = vmatmul.bf16.gmra.mxu3 %v2487_v57  ;;  %v2370_v5 = vld [vmem:[%s4301_s0 + $0xf0] sm:$0xf] }
 0x103   : > { %2992 = vst [vmem:[%s4305_s4 + $0xa0] sm:$0xff] %v2756_v56   ;;  %v2371_v13 = vor.u32 %v2604_v6, %v2370_v5 }
 0x104   : > { %v1430_v22 = vadd.f32 %v1429_v2, %v1367_v17  ;;  %v860_v62 = vpop.f32.mrf.mxu2 }
 0x105   : > { %v1029_v63 = vpop.f32.mrf.mxu3 }
 0x106   : > { %v782_v23 = vpop.f32.mrf.mxu0  ;;  %v3641_v11 = vadd.f32 %v1029_v63, %v860_v62 }
 0x107   : > { %v951_v24 = vpop.f32.mrf.mxu1 }
 0x108   : > { %v952_v25 = vadd.f32 %v951_v24, %v782_v23  ;;  %1128 = vst [vmem:[#allocation2 + $0xe8] sm:$0xff] %v3641_v11  ;;  %v2633_v23 = vld [vmem:[%s4301_s0 + $0x1e4] sm:$0xf] }
 0x10a   : > { %1097 = vst [vmem:[#allocation2 + $0x98] sm:$0xff] %v952_v25  ;;  %v2681_v28 = vpack.c.bf16 %v952_v25, %v950_v9  ;;  %v1295_v29 = vadd.f32 %v1294_v16, %v952_v25  ;;  %v1368_v30 = vmul.f32 %v952_v25, %v952_v25  ;;  %v2372_v9 = vld [vmem:[%s4301_s0 + $0xf8] sm:$0xf0] }
 0x10b   : > { %v2375_v14 = vor.u32 %v2603_v7, %v2372_v9 }
 0x10c   : > { %2977 = vst [vmem:[%s4305_s4 + $0x28] sm:$0xff] %v2681_v28   ;;  %v1431_v37 = vadd.f32 %v1430_v22, %v1368_v30  ;;  %v862_v18 = vpop.f32.mrf.mxu2  ;;  %v2634_v22 = vld [vmem:[%s4301_s0 + $0x1e4] sm:$0xf0] }
 0x10d   : > { %v1031_v19 = vpop.f32.mrf.mxu3  ;;  %v2491_v26 = vor.u32 %v2634_v22, %v2490_v21 }
 0x10e   : > { %v785_v43 = vpop.f32.mrf.mxu0  ;;  %v3644_v20 = vadd.f32 %v1031_v19, %v862_v18 }
 0x10f   : > { %v954_v44 = vpop.f32.mrf.mxu1 }
 0x110   : > { %v955_v45 = vadd.f32 %v954_v44, %v785_v43  ;;  %1129 = vst [vmem:[#allocation2 + $0x78] sm:$0xff] %v3644_v20  ;;  %v2761_v28 = vpack.c.bf16 %v3644_v20, %v3641_v11 }
 0x111   : > { %824 = vmatmul.bf16.gmra.mxu0 %v2363_v39  ;;  %904 = vmatmul.bf16.gmra.mxu2 %v2491_v26 }
 0x112   : > { %1098 = vst [vmem:[#allocation2 + $0x120] sm:$0xff] %v955_v45  ;;  %v1296_v52 = vadd.f32 %v1295_v29, %v955_v45  ;;  %v1369_v53 = vmul.f32 %v955_v45, %v955_v45  ;;  %993 = vmatmul.bf16.gmra.mxu1 %v2367_v41  ;;  %v2495_v29 = vor.u32 %v2633_v23, %v2492_v27 }
 0x113   : > { %2993 = vst [vmem:[%s4305_s4 + $0xa8] sm:$0xff] %v2761_v28  }
 0x114   : > { %v1432_v58 = vadd.f32 %v1431_v37, %v1369_v53  ;;  %1073 = vmatmul.bf16.gmra.mxu3 %v2495_v29  ;;  %v865_v36 = vpop.f32.mrf.mxu2  ;;  %v2498_v53 = vld [vmem:[%s4301_s0 + $0x1f0] sm:$0xf] }
 0x115   : > { %v1034_v37 = vpop.f32.mrf.mxu3 }
 0x116   : > { %v787_v59 = vpop.f32.mrf.mxu0 }
 0x117   : > { %v956_v60 = vpop.f32.mrf.mxu1 }
 0x118   : > { %v957_v61 = vadd.f32 %v956_v60, %v787_v59  ;;  %v2500_v59 = vld [vmem:[%s4301_s0 + $0x1f8] sm:$0xf0] }
 0x11a   : > { %1099 = vst [vmem:[#allocation2 + $0x150] sm:$0xff] %v957_v61  ;;  %v2686_v1 = vpack.c.bf16 %v957_v61, %v955_v45  ;;  %v1297_v2 = vadd.f32 %v1296_v52, %v957_v61  ;;  %v1370_v4 = vmul.f32 %v957_v61, %v957_v61  ;;  %v3667_v45 = vadd.f32 %v1034_v37, %v865_v36 }
 0x11b   : > { %v2503_v61 = vor.u32 %v2635_v55, %v2500_v59 }
 0x11c   : > { %2978 = vst [vmem:[%s4305_s4 + $0x30] sm:$0xff] %v2686_v1   ;;  %v1433_v10 = vadd.f32 %v1432_v58, %v1370_v4  ;;  %v867_v50 = vpop.f32.mrf.mxu2  ;;  %v2499_v58 = vor.u32 %v2636_v54, %v2498_v53 }
 0x11d   : > { %1130 = vst [vmem:[#allocation2 + $0x70] sm:$0xff] %v3667_v45  ;;  %v1036_v51 = vpop.f32.mrf.mxu3 }
 0x11e   : > { %v790_v15 = vpop.f32.mrf.mxu0  ;;  %v3670_v52 = vadd.f32 %v1036_v51, %v867_v50 }
 0x11f   : > { %v959_v16 = vpop.f32.mrf.mxu1 }
 0x120   : > { %v960_v17 = vadd.f32 %v959_v16, %v790_v15  ;;  %1131 = vst [vmem:[#allocation2 + $0x90] sm:$0xff] %v3670_v52  ;;  %v2766_v60 = vpack.c.bf16 %v3670_v52, %v3667_v45 }
 0x121   : > { %829 = vmatmul.bf16.gmra.mxu0 %v2371_v13  ;;  %909 = vmatmul.bf16.gmra.mxu2 %v2499_v58 }
 0x122   : > { %1100 = vst [vmem:[#allocation2 + $0x108] sm:$0xff] %v960_v17  ;;  %v1298_v24 = vadd.f32 %v1297_v2, %v960_v17  ;;  %v1371_v25 = vmul.f32 %v960_v17, %v960_v17  ;;  %998 = vmatmul.bf16.gmra.mxu1 %v2375_v14 }
 0x123   : > { %2994 = vst [vmem:[%s4305_s4 + $0xb0] sm:$0xff] %v2766_v60  }
 0x124   : > { %v1434_v30 = vadd.f32 %v1433_v10, %v1371_v25  ;;  %1078 = vmatmul.bf16.gmra.mxu3 %v2503_v61  ;;  %v870_v4 = vpop.f32.mrf.mxu2 }
 0x125   : > { %v1039_v5 = vpop.f32.mrf.mxu3 }
 0x126   : > { %v792_v31 = vpop.f32.mrf.mxu0  ;;  %v3693_v13 = vadd.f32 %v1039_v5, %v870_v4 }
 0x127   : > { %v961_v34 = vpop.f32.mrf.mxu1 }
 0x128   : > { %v962_v35 = vadd.f32 %v961_v34, %v792_v31  ;;  %1132 = vst [vmem:[#allocation2 + $0x1d8] sm:$0xff] %v3693_v13 }
 0x12a   : > { %1101 = vst [vmem:[#allocation2 + $0x60] sm:$0xff] %v962_v35  ;;  %v2691_v39 = vpack.c.bf16 %v962_v35, %v960_v17  ;;  %v1299_v41 = vadd.f32 %v1298_v24, %v962_v35  ;;  %v1372_v43 = vmul.f32 %v962_v35, %v962_v35 }
 0x12c   : > { %2979 = vst [vmem:[%s4305_s4 + $0x38] sm:$0xff] %v2691_v39   ;;  %v1435_v44 = vadd.f32 %v1434_v30, %v1372_v43  ;;  %v872_v17 = vpop.f32.mrf.mxu2 }
 0x12d   : > { %v1041_v18 = vpop.f32.mrf.mxu3 }
 0x12e   : > { %v795_v46 = vpop.f32.mrf.mxu0  ;;  %v3696_v19 = vadd.f32 %v1041_v18, %v872_v17 }
 0x12f   : > { %v964_v47 = vpop.f32.mrf.mxu1 }
 0x130   : > { %v965_v49 = vadd.f32 %v964_v47, %v795_v46  ;;  %1133 = vst [vmem:[#allocation2 + $0xd0] sm:$0xff] %v3696_v19  ;;  %v2771_v23 = vpack.c.bf16 %v3696_v19, %v3693_v13 }
 0x132   : > { %1102 = vst [vmem:[#allocation2 + $0xe0] sm:$0xff] %v965_v49  ;;  %v1300_v56 = vadd.f32 %v1299_v41, %v965_v49  ;;  %v1373_v57 = vmul.f32 %v965_v49, %v965_v49 }
 0x133   : > { %2995 = vst [vmem:[%s4305_s4 + $0xb8] sm:$0xff] %v2771_v23  }
 0x134   : > { %v1436_v62 = vadd.f32 %v1435_v44, %v1373_v57  ;;  %v875_v28 = vpop.f32.mrf.mxu2 }
 0x135   : > { %v1044_v29 = vpop.f32.mrf.mxu3 }
 0x136   : > { %v797_v63 = vpop.f32.mrf.mxu0  ;;  %v3707_v36 = vadd.f32 %v1044_v29, %v875_v28 }
 0x137   : > { %v966_v1 = vpop.f32.mrf.mxu1 }
 0x138   : > { %v967_v2 = vadd.f32 %v966_v1, %v797_v63  ;;  %1134 = vst [vmem:[#allocation2 + $0xb8] sm:$0xff] %v3707_v36 }
 0x13a   : > { %1103 = vst [vmem:[#allocation2 + $0x188] sm:$0xff] %v967_v2  ;;  %v2696_v6 = vpack.c.bf16 %v967_v2, %v965_v49  ;;  %v1301_v7 = vadd.f32 %v1300_v56, %v967_v2  ;;  %v1374_v9 = vmul.f32 %v967_v2, %v967_v2 }
 0x13c   : > { %2980 = vst [vmem:[%s4305_s4 + $0x40] sm:$0xff] %v2696_v6   ;;  %v1437_v10 = vadd.f32 %v1436_v62, %v1374_v9  ;;  %v877_v43 = vpop.f32.mrf.mxu2 }
 0x13d   : > { %v1046_v44 = vpop.f32.mrf.mxu3 }
 0x13e   : > { %v800_v14 = vpop.f32.mrf.mxu0  ;;  %v3710_v46 = vadd.f32 %v1046_v44, %v877_v43 }
 0x13f   : > { %v969_v15 = vpop.f32.mrf.mxu1 }
 0x140   : > { %v970_v16 = vadd.f32 %v969_v15, %v800_v14  ;;  %1135 = vst [vmem:[#allocation2 + $0x88] sm:$0xff] %v3710_v46  ;;  %v2776_v50 = vpack.c.bf16 %v3710_v46, %v3707_v36 }
 0x142   : > { %1104 = vst [vmem:[#allocation2 + $0x138] sm:$0xff] %v970_v16  ;;  %v1302_v21 = vadd.f32 %v1301_v7, %v970_v16  ;;  %v1375_v22 = vmul.f32 %v970_v16, %v970_v16 }
 0x143   : > { %2996 = vst [vmem:[%s4305_s4 + $0xc0] sm:$0xff] %v2776_v50  }
 0x144   : > { %v1438_v24 = vadd.f32 %v1437_v10, %v1375_v22  ;;  %v880_v56 = vpop.f32.mrf.mxu2 }
 0x145   : > { %v1049_v57 = vpop.f32.mrf.mxu3 }
 0x146   : > { %v802_v25 = vpop.f32.mrf.mxu0  ;;  %v3729_v59 = vadd.f32 %v1049_v57, %v880_v56 }
 0x147   : > { %v971_v26 = vpop.f32.mrf.mxu1 }
 0x148   : > { %v972_v27 = vadd.f32 %v971_v26, %v802_v25  ;;  %1136 = vst [vmem:[#allocation2 + $0xa8] sm:$0xff] %v3729_v59 }
 0x14a   : > { %1105 = vst [vmem:[#allocation2 + $0x140] sm:$0xff] %v972_v27  ;;  %v2701_v30 = vpack.c.bf16 %v972_v27, %v970_v16  ;;  %v1303_v31 = vadd.f32 %v1302_v21, %v972_v27  ;;  %v1376_v34 = vmul.f32 %v972_v27, %v972_v27 }
 0x14c   : > { %2981 = vst [vmem:[%s4305_s4 + $0x48] sm:$0xff] %v2701_v30   ;;  %v1439_v35 = vadd.f32 %v1438_v24, %v1376_v34  ;;  %v882_v63 = vpop.f32.mrf.mxu2 }
 0x14d   : > { %v1051_v1 = vpop.f32.mrf.mxu3 }
 0x14e   : > { %v805_v37 = vpop.f32.mrf.mxu0  ;;  %v3734_v2 = vadd.f32 %v1051_v1, %v882_v63 }
 0x14f   : > { %v974_v39 = vpop.f32.mrf.mxu1 }
 0x150   : > { %v975_v41 = vadd.f32 %v974_v39, %v805_v37  ;;  %1137 = vst [vmem:[#allocation2 + $0x1c8] sm:$0xff] %v3734_v2  ;;  %v2781_v4 = vpack.c.bf16 %v3734_v2, %v3729_v59 }
 0x152   : > { %1106 = vst [vmem:[#allocation2 + $0x80] sm:$0xff] %v975_v41  ;;  %v3712_v47 = vadd.f32 %v1303_v31, %v975_v41  ;;  %v1377_v49 = vmul.f32 %v975_v41, %v975_v41 }
 0x153   : > { %2997 = vst [vmem:[%s4305_s4 + $0xc8] sm:$0xff] %v2781_v4  }
 0x154   : > { %v3717_v51 = vadd.f32 %v1439_v35, %v1377_v49  ;;  %v885_v9 = vpop.f32.mrf.mxu2 }
 0x155   : > { %v1054_v10 = vpop.f32.mrf.mxu3 }
 0x156   : > { %v807_v53 = vpop.f32.mrf.mxu0  ;;  %v3751_v15 = vadd.f32 %v1054_v10, %v885_v9 }
 0x157   : > { %v976_v54 = vpop.f32.mrf.mxu1 }
 0x158   : > { %v3722_v55 = vadd.f32 %v976_v54, %v807_v53  ;;  %1138 = vst [vmem:[#allocation2 + $0x170] sm:$0xff] %v3751_v15 }
 0x15a   : > { %1107 = vst [vmem:[#allocation2 + $0x1a8] sm:$0xff] %v3722_v55  ;;  %v2706_v58 = vpack.c.bf16 %v3722_v55, %v975_v41 }
 0x15c   : > { %2982 = vst [vmem:[%s4305_s4 + $0x50] sm:$0xff] %v2706_v58   ;;  %v887_v21 = vpop.f32.mrf.mxu2 }
 0x15d   : > { %v1056_v22 = vpop.f32.mrf.mxu3 }
 0x15e   : > { %v810_v60 = vpop.f32.mrf.mxu0  ;;  %v3756_v23 = vadd.f32 %v1056_v22, %v887_v21 }
 0x15f   : > { %v979_v61 = vpop.f32.mrf.mxu1 }
 0x160   : > { %v3732_v62 = vadd.f32 %v979_v61, %v810_v60  ;;  %1139 = vst [vmem:[#allocation2 + $0x178] sm:$0xff] %v3756_v23  ;;  %v2786_v24 = vpack.c.bf16 %v3756_v23, %v3751_v15 }
 0x162   : > { %1108 = vst [vmem:[#allocation2 + $0x1b8] sm:$0xff] %v3732_v62  ;;  %v1379_v10 = vmul.f32 %v3732_v62, %v3732_v62 }
 0x163   : > { %2998 = vst [vmem:[%s4305_s4 + $0xd0] sm:$0xff] %v2786_v24  }
 0x164   : > { %v890_v28 = vpop.f32.mrf.mxu2 }
 0x165   : > { %v1059_v29 = vpop.f32.mrf.mxu3 }
 0x166   : > { %v812_v5 = vpop.f32.mrf.mxu0  ;;  %v3769_v31 = vadd.f32 %v1059_v29, %v890_v28 }
 0x167   : > { %v981_v6 = vpop.f32.mrf.mxu1 }
 0x168   : > { %v3743_v7 = vadd.f32 %v981_v6, %v812_v5  ;;  %1140 = vst [vmem:[#allocation2 + $0x68] sm:$0xff] %v3769_v31  ;;  %v1378_v6 = vmul.f32 %v3722_v55, %v3722_v55 }
 0x16a   : > { %1109 = vst [vmem:[#allocation2 + $0x28] sm:$0xff] %v3743_v7  ;;  %v2711_v14 = vpack.c.bf16 %v3743_v7, %v3732_v62 }
 0x16c   : > { %2983 = vst [vmem:[%s4305_s4 + $0x58] sm:$0xff] %v2711_v14   ;;  %v892_v39 = vpop.f32.mrf.mxu2  ;;  %v1305_v14 = vadd.f32 %v3712_v47, %v3722_v55 }
 0x16d   : > { %v1061_v41 = vpop.f32.mrf.mxu3 }
 0x16e   : > { %v815_v16 = vpop.f32.mrf.mxu0  ;;  %v3772_v43 = vadd.f32 %v1061_v41, %v892_v39  ;;  %v1306_v24 = vadd.f32 %v1305_v14, %v3732_v62 }
 0x16f   : > { %v984_v17 = vpop.f32.mrf.mxu1 }
 0x170   : > { %v3754_v18 = vadd.f32 %v984_v17, %v815_v16  ;;  %1141 = vst [vmem:[#allocation2 + $0x190] sm:$0xff] %v3772_v43  ;;  %v2791_v44 = vpack.c.bf16 %v3772_v43, %v3769_v31  ;;  %v1441_v16 = vadd.f32 %v3717_v51, %v1378_v6  ;;  %v1380_v17 = vmul.f32 %v3743_v7, %v3743_v7 }
 0x172   : > { %1110 = vst [vmem:[#allocation2 + $0x1e8] sm:$0xff] %v3754_v18  ;;  %v1442_v29 = vadd.f32 %v1441_v16, %v1379_v10 }
 0x173   : > { %2999 = vst [vmem:[%s4305_s4 + $0xd8] sm:$0xff] %v2791_v44  }
 0x174   : > { %v895_v54 = vpop.f32.mrf.mxu2  ;;  %v1443_v55 = vadd.f32 %v1442_v29, %v1380_v17 }
 0x175   : > { %v1064_v56 = vpop.f32.mrf.mxu3 }
 0x176   : > { %v817_v25 = vpop.f32.mrf.mxu0  ;;  %v3783_v63 = vadd.f32 %v1064_v56, %v895_v54 }
 0x177   : > { %v986_v26 = vpop.f32.mrf.mxu1 }
 0x178   : > { %v987_v27 = vadd.f32 %v986_v26, %v817_v25  ;;  %1142 = vst [vmem:[#allocation2 + $0x198] sm:$0xff] %v3783_v63 }
 0x17a   : > { %1111 = vst [vmem:[#allocation2 + $0xf8] sm:$0xff] %v987_v27  ;;  %v2716_v30 = vpack.c.bf16 %v987_v27, %v3754_v18  ;;  %v1382_v51 = vmul.f32 %v987_v27, %v987_v27 }
 0x17c   : > { %2984 = vst [vmem:[%s4305_s4 + $0x60] sm:$0xff] %v2716_v30   ;;  %v897_v1 = vpop.f32.mrf.mxu2  ;;  %v1381_v30 = vmul.f32 %v3754_v18, %v3754_v18 }
 0x17d   : > { %v1066_v4 = vpop.f32.mrf.mxu3 }
 0x17e   : > { %v820_v34 = vpop.f32.mrf.mxu0  ;;  %v3785_v5 = vadd.f32 %v1066_v4, %v897_v1  ;;  %v1444_v62 = vadd.f32 %v1443_v55, %v1381_v30  ;;  %v1389_v55 = vmul.f32 %v3451_v32, %v3451_v32 }
 0x17f   : > { %v989_v35 = vpop.f32.mrf.mxu1 }
 0x180   : > { %v990_v37 = vadd.f32 %v989_v35, %v820_v34  ;;  %v2796_v9 = vpack.c.bf16 %v3785_v5, %v3783_v63  ;;  %1143 = vst [vmem:[#allocation2 + $0x38] sm:$0xff] %v3785_v5  ;;  %v1307_v34 = vadd.f32 %v1306_v24, %v3743_v7  ;;  %v1445_v44 = vadd.f32 %v1444_v62, %v1382_v51 }
 0x182   : > { %1112 = vst [vmem:[#allocation2 + $0x160] sm:$0xff] %v990_v37  ;;  %v1308_v35 = vadd.f32 %v1307_v34, %v3754_v18  ;;  %v1383_v41 = vmul.f32 %v990_v37, %v990_v37 }
 0x183   : > { %3000 = vst [vmem:[%s4305_s4 + $0xe0] sm:$0xff] %v2796_v9  }
 0x184   : > { %v900_v26 = vpop.f32.mrf.mxu2  ;;  %v1309_v39 = vadd.f32 %v1308_v35, %v987_v27  ;;  %v1446_v18 = vadd.f32 %v1445_v44, %v1383_v41  ;;  %v1390_v35 = vmul.f32 %v3454_v40, %v3454_v40  ;;  %v1391_v41 = vmul.f32 %v3489_v0, %v3489_v0 }
 0x185   : > { %v1069_v28 = vpop.f32.mrf.mxu3 }
 0x186   : > { %v822_v49 = vpop.f32.mrf.mxu0  ;;  %v1310_v54 = vadd.f32 %v1309_v39, %v990_v37  ;;  %v3811_v7 = vadd.f32 %v1069_v28, %v900_v26 }
 0x187   : > { %v991_v50 = vpop.f32.mrf.mxu1 }
 0x188   : > { %v992_v53 = vadd.f32 %v991_v50, %v822_v49  ;;  %1144 = vst [vmem:[#allocation2 + $0xc0] sm:$0xff] %v3811_v7 }
 0x18a   : > { %1113 = vst [vmem:[#allocation2 + $0x30] sm:$0xff] %v992_v53  ;;  %v2721_v57 = vpack.c.bf16 %v992_v53, %v990_v37  ;;  %v1384_v56 = vmul.f32 %v992_v53, %v992_v53  ;;  %v1311_v4 = vadd.f32 %v1310_v54, %v992_v53 }
 0x18c   : > { %2985 = vst [vmem:[%s4305_s4 + $0x68] sm:$0xff] %v2721_v57   ;;  %v1447_v9 = vadd.f32 %v1446_v18, %v1384_v56 }
 0x18e   : > { %v825_v58 = vpop.f32.mrf.mxu0 }
 0x18f   : > { %v994_v60 = vpop.f32.mrf.mxu1 }
 0x190   : > { %v995_v61 = vadd.f32 %v994_v60, %v825_v58  ;;  %v902_v58 = vpop.f32.mrf.mxu2  ;;  %v1071_v60 = vpop.f32.mrf.mxu3 }
 0x191   : > { %v3813_v1 = vadd.f32 %v1071_v60, %v902_v58 }
 0x192   : > { %1114 = vst [vmem:[#allocation2 + $0x1e0] sm:$0xff] %v995_v61  ;;  %v1385_v6 = vmul.f32 %v995_v61, %v995_v61  ;;  %v1312_v10 = vadd.f32 %v1311_v4, %v995_v61 }
 0x193   : > { %v2801_v27 = vpack.c.bf16 %v3813_v1, %v3811_v7  ;;  %1145 = vst [vmem:[#allocation2 + $0x1c0] sm:$0xff] %v3813_v1 }
 0x194   : > { %v1448_v14 = vadd.f32 %v1447_v9, %v1385_v6  ;;  %v1395_v9 = vmul.f32 %v3565_v3, %v3565_v3 }
 0x195   : > { %3001 = vst [vmem:[%s4305_s4 + $0xe8] sm:$0xff] %v2801_v27  }
 0x196   : > { %v827_v21 = vpop.f32.mrf.mxu0 }
 0x197   : > { %v996_v22 = vpop.f32.mrf.mxu1 }
 0x198   : > { %v997_v25 = vadd.f32 %v996_v22, %v827_v21  ;;  %v905_v28 = vpop.f32.mrf.mxu2  ;;  %v1074_v29 = vpop.f32.mrf.mxu3 }
 0x19a   : > { %1115 = vst [vmem:[#allocation2] sm:$0xff] %v997_v25  ;;  %v2726_v47 = vpack.c.bf16 %v997_v25, %v995_v61  ;;  %v1386_v37 = vmul.f32 %v997_v25, %v997_v25  ;;  %v1313_v16 = vadd.f32 %v1312_v10, %v997_v25 }
 0x19c   : > { %2986 = vst [vmem:[%s4305_s4 + $0x70] sm:$0xff] %v2726_v47   ;;  %v1449_v22 = vadd.f32 %v1448_v14, %v1386_v37 }
 0x19e   : > { %v830_v49 = vpop.f32.mrf.mxu0 }
 0x19f   : > { %v999_v50 = vpop.f32.mrf.mxu1 }
 0x1a0   : > { %v1000_v57 = vadd.f32 %v999_v50, %v830_v49  ;;  %v3834_v50 = vadd.f32 %v1074_v29, %v905_v28  ;;  %v907_v54 = vpop.f32.mrf.mxu2  ;;  %v1076_v56 = vpop.f32.mrf.mxu3  ;;  %v1399_v28 = vmul.f32 %v3641_v11, %v3641_v11 }
 0x1a2   : > { %1116 = vst [vmem:[#allocation2 + $0xf0] sm:$0xff] %v1000_v57  ;;  %v1387_v17 = vmul.f32 %v1000_v57, %v1000_v57  ;;  %v1314_v24 = vadd.f32 %v1313_v16, %v1000_v57 }
 0x1a3   : > { %1146 = vst [vmem:[#allocation2 + $0x158] sm:$0xff] %v3834_v50 }
 0x1a4   : > { %v1450_v30 = vadd.f32 %v1449_v22, %v1387_v17 }
 0x1a6   : > { %v832_v53 = vpop.f32.mrf.mxu0 }
 0x1a7   : > { %v1001_v21 = vpop.f32.mrf.mxu1 }
 0x1a8   : > { %v1002_v26 = vadd.f32 %v1001_v21, %v832_v53  ;;  %v910_v14 = vpop.f32.mrf.mxu2  ;;  %v1079_v16 = vpop.f32.mrf.mxu3  ;;  %v1397_v21 = vmul.f32 %v3603_v38, %v3603_v38 }
 0x1aa   : > { %1117 = vst [vmem:[#allocation2 + $0x8] sm:$0xff] %v1002_v26  ;;  %v2731_v61 = vpack.c.bf16 %v1002_v26, %v1000_v57  ;;  %v1315_v34 = vadd.f32 %v1314_v24, %v1002_v26  ;;  %v1388_v47 = vmul.f32 %v1002_v26, %v1002_v26  ;;  %v3836_v57 = vadd.f32 %v1076_v56, %v907_v54 }
 0x1ab   : > { %v1398_v24 = vmul.f32 %v3606_v48, %v3606_v48  ;;  %v1404_v54 = vmul.f32 %v3696_v19, %v3696_v19 }
 0x1ac   : > { %2987 = vst [vmem:[%s4305_s4 + $0x78] sm:$0xff] %v2731_v61   ;;  %v1316_v25 = vadd.f32 %v1315_v34, %v3451_v32  ;;  %v1451_v51 = vadd.f32 %v1450_v30, %v1388_v47  ;;  %v1392_v32 = vmul.f32 %v3492_v8, %v3492_v8 }
 0x1ad   : > { %1147 = vst [vmem:[#allocation2 + $0x10] sm:$0xff] %v3836_v57 }
 0x1ae   : > { %v1317_v62 = vadd.f32 %v1316_v25, %v3454_v40  ;;  %v1452_v39 = vadd.f32 %v1451_v51, %v1389_v55  ;;  %v2806_v40 = vpack.c.bf16 %v3836_v57, %v3834_v50 }
 0x1b0   : > { %v1318_v44 = vadd.f32 %v1317_v62, %v3489_v0  ;;  %v1453_v49 = vadd.f32 %v1452_v39, %v1390_v35  ;;  %v1393_v0 = vmul.f32 %v3527_v33, %v3527_v33  ;;  %3002 = vst [vmem:[%s4305_s4 + $0xf0] sm:$0xff] %v2806_v40   ;;  %v912_v61 = vpop.f32.mrf.mxu2  ;;  %v1081_v34 = vpop.f32.mrf.mxu3  ;;  %v1406_v40 = vmul.f32 %v3710_v46, %v3710_v46 }
 0x1b1   : > { %v3871_v47 = vadd.f32 %v1081_v34, %v912_v61  ;;  %v1417_v61 = vmul.f32 %v3834_v50, %v3834_v50 }
 0x1b2   : > { %v1319_v58 = vadd.f32 %v1318_v44, %v3492_v8  ;;  %v1454_v60 = vadd.f32 %v1453_v49, %v1391_v41  ;;  %v1394_v8 = vmul.f32 %v3530_v42, %v3530_v42  ;;  %v1403_v41 = vmul.f32 %v3693_v13, %v3693_v13 }
 0x1b3   : > { %1149 = vst [vmem:[#allocation2 + $0xa0] sm:$0xff] %v3871_v47 }
 0x1b4   : > { %v1320_v18 = vadd.f32 %v1319_v58, %v3527_v33  ;;  %v1455_v4 = vadd.f32 %v1454_v60, %v1392_v32  ;;  %v1396_v33 = vmul.f32 %v3568_v12, %v3568_v12  ;;  %v3110_v32 = vmov 0.0  }
 0x1b5   : > { %1282 = vst [vmem:[#allocation3] sm:$0x1] %v3110_v32  ;;  %v1405_v58 = vmul.f32 %v3707_v36, %v3707_v36 }
 0x1b6   : > { %v1321_v6 = vadd.f32 %v1320_v18, %v3530_v42  ;;  %v1456_v27 = vadd.f32 %v1455_v4, %v1393_v0  ;;  %1283 = vst [vmem:[#allocation4] sm:$0x1] %v3110_v32  ;;  %v1407_v18 = vmul.f32 %v3729_v59, %v3729_v59 }
 0x1b8   : > { %v1322_v10 = vadd.f32 %v1321_v6, %v3565_v3  ;;  %v1457_v37 = vadd.f32 %v1456_v27, %v1394_v8  ;;  %v1408_v8 = vmul.f32 %v3734_v2, %v3734_v2  ;;  %v1409_v27 = vmul.f32 %v3751_v15, %v3751_v15 }
 0x1ba   : > { %v1323_v17 = vadd.f32 %v1322_v10, %v3568_v12  ;;  %v1458_v53 = vadd.f32 %v1457_v37, %v1395_v9  ;;  %v3869_v12 = vadd.f32 %v1079_v16, %v910_v14 }
 0x1bc   : > { %v1324_v42 = vadd.f32 %v1323_v17, %v3603_v38  ;;  %v1459_v22 = vadd.f32 %v1458_v53, %v1396_v33  ;;  %v1400_v38 = vmul.f32 %v3644_v20, %v3644_v20  ;;  %1148 = vst [vmem:[#allocation2 + $0x58] sm:$0xff] %v3869_v12 }
 0x1be   : > { %v1325_v3 = vadd.f32 %v1324_v42, %v3606_v48  ;;  %v1460_v26 = vadd.f32 %v1459_v22, %v1397_v21  ;;  %v2811_v48 = vpack.c.bf16 %v3871_v47, %v3869_v12  ;;  %v1413_v21 = vmul.f32 %v3783_v63, %v3783_v63 }
 0x1c0   : > { %v1326_v29 = vadd.f32 %v1325_v3, %v3641_v11  ;;  %v1461_v30 = vadd.f32 %v1460_v26, %v1398_v24  ;;  %v1401_v11 = vmul.f32 %v3667_v45, %v3667_v45  ;;  %3003 = vst [vmem:[%s4305_s4 + $0xf8] sm:$0xff] %v2811_v48   ;;  %v1414_v24 = vmul.f32 %v3785_v5, %v3785_v5 }
 0x1c1   : > { %v1415_v26 = vmul.f32 %v3811_v7, %v3811_v7 }
 0x1c2   : > { %v1327_v55 = vadd.f32 %v1326_v29, %v3644_v20  ;;  %v1462_v25 = vadd.f32 %v1461_v30, %v1399_v28  ;;  %v1402_v20 = vmul.f32 %v3670_v52, %v3670_v52  ;;  %v1416_v29 = vmul.f32 %v3813_v1, %v3813_v1 }
 0x1c4   : > { %v1463_v51 = vadd.f32 %v1462_v25, %v1400_v38  ;;  %v1328_v35 = vadd.f32 %v1327_v55, %v3667_v45  ;;  %v1418_v38 = vmul.f32 %v3836_v57, %v3836_v57  ;;  %v1419_v25 = vmul.f32 %v3869_v12, %v3869_v12 }
 0x1c6   : > { %v1329_v62 = vadd.f32 %v1328_v35, %v3670_v52  ;;  %v1464_v39 = vadd.f32 %v1463_v51, %v1401_v11  ;;  %v1420_v11 = vmul.f32 %v3871_v47, %v3871_v47 }
 0x1c8   : > { %v1330_v44 = vadd.f32 %v1329_v62, %v3693_v13  ;;  %v1465_v49 = vadd.f32 %v1464_v39, %v1402_v20 }
 0x1ca   : > { %v1331_v45 = vadd.f32 %v1330_v44, %v3696_v19  ;;  %v1466_v56 = vadd.f32 %v1465_v49, %v1403_v41 }
 0x1cc   : > { %v1332_v52 = vadd.f32 %v1331_v45, %v3707_v36  ;;  %v1467_v60 = vadd.f32 %v1466_v56, %v1404_v54  ;;  %v1284_v54 = vld [vmem:[#allocation3] sm:$0x1] }
 0x1ce   : > { %v1333_v13 = vadd.f32 %v1332_v52, %v3710_v46  ;;  %v1468_v0 = vadd.f32 %v1467_v60, %v1405_v58  ;;  %v1410_v46 = vmul.f32 %v3756_v23, %v3756_v23 }
 0x1d0   : > { %v1334_v19 = vadd.f32 %v1333_v13, %v3729_v59  ;;  %v1469_v4 = vadd.f32 %v1468_v0, %v1406_v40  ;;  %v1411_v59 = vmul.f32 %v3769_v31, %v3769_v31 }
 0x1d2   : > { %v1335_v6 = vadd.f32 %v1334_v19, %v3734_v2  ;;  %v1470_v36 = vadd.f32 %v1469_v4, %v1407_v18  ;;  %v1412_v2 = vmul.f32 %v3772_v43, %v3772_v43 }
 0x1d4   : > { %v1336_v9 = vadd.f32 %v1335_v6, %v3751_v15  ;;  %v1471_v10 = vadd.f32 %v1470_v36, %v1408_v8 }
 0x1d6   : > { %v1337_v37 = vadd.f32 %v1336_v9, %v3756_v23  ;;  %v1472_v14 = vadd.f32 %v1471_v10, %v1409_v27 }
 0x1d8   : > { %v1338_v16 = vadd.f32 %v1337_v37, %v3769_v31  ;;  %v1473_v33 = vadd.f32 %v1472_v14, %v1410_v46 }
 0x1da   : > { %v1339_v17 = vadd.f32 %v1338_v16, %v3772_v43  ;;  %v1474_v53 = vadd.f32 %v1473_v33, %v1411_v59 }
 0x1dc   : > { %v1340_v15 = vadd.f32 %v1339_v17, %v3783_v63  ;;  %v1475_v42 = vadd.f32 %v1474_v53, %v1412_v2 }
 0x1de   : > { %v1476_v23 = vadd.f32 %v1475_v42, %v1413_v21  ;;  %v1341_v22 = vadd.f32 %v1340_v15, %v3785_v5 }
 0x1e0   : > { %v1477_v31 = vadd.f32 %v1476_v23, %v1414_v24  ;;  %v1342_v3 = vadd.f32 %v1341_v22, %v3811_v7 }
 0x1e2   : > { %v1478_v43 = vadd.f32 %v1477_v31, %v1415_v26  ;;  %v1343_v28 = vadd.f32 %v1342_v3, %v3813_v1 }
 0x1e4   : > { %v1479_v63 = vadd.f32 %v1478_v43, %v1416_v29  ;;  %v1344_v30 = vadd.f32 %v1343_v28, %v3834_v50 }
 0x1e6   : > { %v1480_v34 = vadd.f32 %v1479_v63, %v1417_v61  ;;  %v1345_v5 = vadd.f32 %v1344_v30, %v3836_v57 }
 0x1e8   : > { %v1481_v55 = vadd.f32 %v1480_v34, %v1418_v38  ;;  %v1346_v7 = vadd.f32 %v1345_v5, %v3869_v12  ;;  %v1356_v12 = vld [vmem:[#allocation4] sm:$0x1] }
 0x1ea   : > { %v1482_v48 = vadd.f32 %v1481_v55, %v1419_v25  ;;  %v1347_v1 = vadd.f32 %v1346_v7, %v3871_v47 }
 0x1ec   : > { %v1348_v51 = vrot.slane %v1347_v1, 4  ;;  %v1483_v50 = vadd.f32 %v1482_v48, %v1420_v11 }
 0x1ee   : > { %v1349_v35 = vadd.f32 %v1348_v51, %v1347_v1  ;;  %v1484_v20 = vrot.slane %v1483_v50, 4 }
 0x1f0   : > { %v1350_v62 = vrot.slane %v1349_v35, 2  ;;  %v1485_v39 = vadd.f32 %v1484_v20, %v1483_v50 }
 0x1f2   : > { %v1351_v41 = vadd.f32 %v1350_v62, %v1349_v35  ;;  %v1486_v57 = vrot.slane %v1485_v39, 2 }
 0x1f4   : > { %v1352_v44 = vrot.slane %v1351_v41, 1  ;;  %v1487_v49 = vadd.f32 %v1486_v57, %v1485_v39 }
 0x1f6   : > { %v1353_v45 = vadd.f32 %v1352_v44, %v1351_v41  ;;  %v1488_v56 = vrot.slane %v1487_v49, 1 }
 0x1f8   : > { %v1354_v32 = vadd.f32 %v1353_v45, %v1284_v54  ;;  %v1489_v58 = vadd.f32 %v1488_v56, %v1487_v49 }
 0x1fa   : > { %1355 = vst [vmem:[#allocation3] sm:$0x1] %v1354_v32  ;;  %v1490_v52 = vadd.f32 %v1489_v58, %v1356_v12 }
 0x1fc   : > { %1491 = vst [vmem:[#allocation4] sm:$0x1] %v1490_v52 }
 0x201   : > { %v1495_v47 = vld [vmem:[#allocation3] sm:$0x1] }
 0x202   : > { %v1496_v60 = vmul.f32 0.001953125, %v1495_v47 }
 0x203   : > { %v1497_v40 = vld [vmem:[#allocation4] sm:$0x1] }
 0x204   : > { %v1498_v13 = vmul.f32 0.001953125, %v1497_v40  ;;  %v1499_v0 = vmul.f32 %v1496_v60, %v1496_v60  ;;  %1501 = vst [vmem:[#allocation3] sm:$0x1] %v1496_v60 }
 0x206   : > { %v1500_v18 = vsub.f32 %v1498_v13, %v1499_v0 }
 0x208   : > { %v1502_v19 = vadd.f32 1e-05, %v1500_v18 }
 0x20a   : > { %3076 = vrsqrt.f32 %v1502_v19  ;;  %vm1509_vm1 = vweird.f32 %v1502_v19 }
 0x210   : > { %v3077_v4 = vpop.eup %3076 }
 0x211   : > { %v1504_v8 = vmul.f32 %v3077_v4, %v1502_v19  ;;  %vm1510_vm0 = vweird.f32 %v3077_v4 }
 0x212   : > { %vm1511_vm2 = vmor %vm1509_vm1, %vm1510_vm0 }
 0x213   : > { %v1505_v6 = vmul.f32 %v3077_v4, %v1504_v8 }
 0x215   : > { %v1506_v36 = vmul.f32 0.5, %v1505_v6 }
 0x217   : > { %v1507_v27 = vsub.f32 1.5, %v1506_v36 }
 0x219   : > { %v1508_v9 = vmul.f32 %v3077_v4, %v1507_v27 }
 0x21b   : > { %v1512_v10 = vsel %vm1511_vm2, %v3077_v4, %v1508_v9 }
 0x21c   : > { %1513 = vst [vmem:[#allocation4] sm:$0x1] %v1512_v10 }
 0x21d PF: > { %p2568_p5 = scmp.ne.s32.totalorder %s3100_s15, 1 }
 0x21f   : > { %1517 = sbr.rel (%p2568_p5) target bundleno = 675 (0x2a3), region = 52 }
 0x224   : > { %v1520_v46 = vld [vmem:[#allocation2 + $0xb0] sm:$0xff]  ;;  %v3944_v14 = vld [vmem:[#allocation3] ss:$0 sm:$0xff]  ;;  %v3946_v59 = vld [vmem:[#allocation4] ss:$0 sm:$0xff] }
 0x225   : > { %v1521_v37 = vld [vmem:[#allocation2 + $0x1b0] sm:$0xff]  ;;  %v1588_v16 = vsub.f32 %v1520_v46, %v3944_v14  ;;  %v3953_v2 = vld [vmem:[%s4303_s2] ss:$0 sm:$0xff]  ;;  %v1522_v17 = vld [vmem:[#allocation2 + $0xd8] sm:$0xff] }
 0x226   : > { %v1589_v33 = vsub.f32 %v1521_v37, %v3944_v14  ;;  %v1523_v53 = vld [vmem:[#allocation2 + $0x18] sm:$0xff]  ;;  %v1590_v15 = vsub.f32 %v1522_v17, %v3944_v14  ;;  %v1524_v42 = vld [vmem:[#allocation2 + $0x50] sm:$0xff]  ;;  %v1525_v23 = vld [vmem:[#allocation2 + $0x168] sm:$0xff] }
 0x227   : > { %v1591_v21 = vsub.f32 %v1523_v53, %v3944_v14  ;;  %v1526_v22 = vld [vmem:[#allocation2 + $0x130] sm:$0xff]  ;;  %v1656_v24 = vmul.f32 %v3946_v59, %v1588_v16  ;;  %v3962_v3 = vld [vmem:[%s4304_s3] ss:$0 sm:$0xff]  ;;  %v1592_v26 = vsub.f32 %v1524_v42, %v3944_v14  ;;  %v1593_v43 = vsub.f32 %v1525_v23, %v3944_v14  ;;  %v1527_v28 = vld [vmem:[#allocation2 + $0x48] sm:$0xff] }
 0x228   : > { %v1657_v31 = vmul.f32 %v3946_v59, %v1589_v33  ;;  %v1658_v29 = vmul.f32 %v3946_v59, %v1590_v15  ;;  %v1594_v30 = vsub.f32 %v1526_v22, %v3944_v14  ;;  %v1595_v61 = vsub.f32 %v1527_v28, %v3944_v14  ;;  %v1528_v40 = vld [vmem:[#allocation2 + $0x180] sm:$0xff]  ;;  %v1529_v13 = vld [vmem:[#allocation2 + $0x110] sm:$0xff]  ;;  %v1530_v0 = vld [vmem:[#allocation2 + $0x118] sm:$0xff] }
 0x229   : > { %v1659_v63 = vmul.f32 %v3946_v59, %v1591_v21  ;;  %v1724_v34 = vmul.f32 %v3953_v2, %v1656_v24  ;;  %v1660_v38 = vmul.f32 %v3946_v59, %v1592_v26  ;;  %v1661_v55 = vmul.f32 %v3946_v59, %v1593_v43  ;;  %v1531_v36 = vld [vmem:[#allocation2 + $0x98] sm:$0xff]  ;;  %v1532_v37 = vld [vmem:[#allocation2 + $0x120] sm:$0xff]  ;;  %v1533_v16 = vld [vmem:[#allocation2 + $0x150] sm:$0xff] }
 0x22a   : > { %v1725_v5 = vmul.f32 %v3953_v2, %v1657_v31  ;;  %v1726_v7 = vmul.f32 %v3953_v2, %v1658_v29  ;;  %v1662_v48 = vmul.f32 %v3946_v59, %v1594_v30  ;;  %v1663_v1 = vmul.f32 %v3946_v59, %v1595_v61  ;;  %v1534_v22 = vld [vmem:[#allocation2 + $0x108] sm:$0xff]  ;;  %v1535_v28 = vld [vmem:[#allocation2 + $0x60] sm:$0xff] }
 0x22b   : > { %v1727_v25 = vmul.f32 %v3953_v2, %v1659_v63  ;;  %v1792_v11 = vadd.f32 %v3962_v3, %v1724_v34  ;;  %v1728_v50 = vmul.f32 %v3953_v2, %v1660_v38  ;;  %v1729_v35 = vmul.f32 %v3953_v2, %v1661_v55 }
 0x22c   : > { %v1793_v51 = vadd.f32 %v3962_v3, %v1725_v5  ;;  %v1794_v20 = vadd.f32 %v3962_v3, %v1726_v7  ;;  %v1730_v39 = vmul.f32 %v3953_v2, %v1662_v48  ;;  %v1731_v41 = vmul.f32 %v3953_v2, %v1663_v1 }
 0x22d   : > { %v1795_v62 = vadd.f32 %v3962_v3, %v1727_v25  ;;  %vm1856_vm3 = vcmp.ge.f32.partialorder %v1792_v11, 0.0  ;;  %v1920_v57 = vmul.f32 0.2, %v1792_v11  ;;  %v1796_v12 = vadd.f32 %v3962_v3, %v1728_v50 }
 0x22e   : > { %vm1857_vm4 = vcmp.ge.f32.partialorder %v1793_v51, 0.0  ;;  %v1921_v44 = vmul.f32 0.2, %v1793_v51  ;;  %vm1858_vm5 = vcmp.ge.f32.partialorder %v1794_v20, 0.0  ;;  %v1922_v49 = vmul.f32 0.2, %v1794_v20 }
 0x22f   : > { %vm1859_vm6 = vcmp.ge.f32.partialorder %v1795_v62, 0.0  ;;  %v1923_v54 = vmul.f32 0.2, %v1795_v62  ;;  %v1984_v45 = vsel %vm1856_vm3, %v1792_v11, %v1920_v57  ;;  %v1797_v32 = vadd.f32 %v3962_v3, %v1729_v35 }
 0x230   : > { %v1985_v56 = vsel %vm1857_vm4, %v1793_v51, %v1921_v44  ;;  %v1986_v52 = vsel %vm1858_vm5, %v1794_v20, %v1922_v49  ;;  %v1798_v60 = vadd.f32 %v3962_v3, %v1730_v39  ;;  %vm1860_vm7 = vcmp.ge.f32.partialorder %v1796_v12, 0.0 }
 0x231   : > { %v2816_v58 = vpack.c.bf16 %v1985_v56, %v1984_v45  ;;  %v1987_v47 = vsel %vm1859_vm6, %v1795_v62, %v1923_v54  ;;  %vm1861_vm8 = vcmp.ge.f32.partialorder %v1797_v32, 0.0  ;;  %v1924_v19 = vmul.f32 0.2, %v1796_v12  ;;  %v1536_v56 = vld [vmem:[#allocation2 + $0xe0] sm:$0xff] }
 0x232   : > { %v2821_v18 = vpack.c.bf16 %v1987_v47, %v1986_v52  ;;  %v1925_v4 = vmul.f32 0.2, %v1797_v32  ;;  %v1799_v8 = vadd.f32 %v3962_v3, %v1731_v41  ;;  %vm1862_vm9 = vcmp.ge.f32.partialorder %v1798_v60, 0.0  ;;  %v1537_v52 = vld [vmem:[#allocation2 + $0x188] sm:$0xff] }
 0x233   : > { %2817 = vst [vmem:[%s4305_s4] sm:$0xff] %v2816_v58   ;;  %v1926_v6 = vmul.f32 0.2, %v1798_v60  ;;  %v1988_v27 = vsel %vm1860_vm7, %v1796_v12, %v1924_v19  ;;  %v1596_v9 = vsub.f32 %v1528_v40, %v3944_v14  ;;  %v1597_v10 = vsub.f32 %v1529_v13, %v3944_v14  ;;  %v1538_v19 = vld [vmem:[#allocation2 + $0x138] sm:$0xff] }
 0x234   : > { %3004 = vst [vmem:[%s4305_s4 + $0x8] sm:$0xff] %v2821_v18   ;;  %v1598_v46 = vsub.f32 %v1530_v0, %v3944_v14  ;;  %v1989_v33 = vsel %vm1861_vm8, %v1797_v32, %v1925_v4  ;;  %vm1863_vm10 = vcmp.ge.f32.partialorder %v1799_v8, 0.0  ;;  %v1927_v17 = vmul.f32 0.2, %v1799_v8  ;;  %v1539_v4 = vld [vmem:[#allocation2 + $0x140] sm:$0xff] }
 0x235   : > { %v1990_v53 = vsel %vm1862_vm9, %v1798_v60, %v1926_v6  ;;  %v2826_v15 = vpack.c.bf16 %v1989_v33, %v1988_v27  ;;  %v1664_v21 = vmul.f32 %v3946_v59, %v1596_v9  ;;  %v1665_v42 = vmul.f32 %v3946_v59, %v1597_v10 }
 0x236   : > { %v1599_v23 = vsub.f32 %v1531_v36, %v3944_v14  ;;  %v1991_v24 = vsel %vm1863_vm10, %v1799_v8, %v1927_v17  ;;  %v1666_v31 = vmul.f32 %v3946_v59, %v1598_v46  ;;  %v1600_v26 = vsub.f32 %v1532_v37, %v3944_v14  ;;  %v1540_v8 = vld [vmem:[#allocation2 + $0x80] sm:$0xff] }
 0x237   : > { %v1601_v43 = vsub.f32 %v1533_v16, %v3944_v14  ;;  %3005 = vst [vmem:[%s4305_s4 + $0x10] sm:$0xff] %v2826_v15   ;;  %v2831_v29 = vpack.c.bf16 %v1991_v24, %v1990_v53  ;;  %v1732_v63 = vmul.f32 %v3953_v2, %v1664_v21  ;;  %v1733_v30 = vmul.f32 %v3953_v2, %v1665_v42  ;;  %v1541_v15 = vld [vmem:[#allocation2 + $0x1a8] sm:$0xff] }
 0x238   : > { %v1667_v61 = vmul.f32 %v3946_v59, %v1599_v23  ;;  %v1734_v34 = vmul.f32 %v3953_v2, %v1666_v31  ;;  %v1668_v5 = vmul.f32 %v3946_v59, %v1600_v26  ;;  %v1602_v55 = vsub.f32 %v1534_v22, %v3944_v14 }
 0x239   : > { %v1669_v38 = vmul.f32 %v3946_v59, %v1601_v43  ;;  %3006 = vst [vmem:[%s4305_s4 + $0x18] sm:$0xff] %v2831_v29   ;;  %v1800_v7 = vadd.f32 %v3962_v3, %v1732_v63  ;;  %v1801_v25 = vadd.f32 %v3962_v3, %v1733_v30  ;;  %v1603_v1 = vsub.f32 %v1535_v28, %v3944_v14 }
 0x23a   : > { %v1735_v48 = vmul.f32 %v3953_v2, %v1667_v61  ;;  %v1802_v11 = vadd.f32 %v3962_v3, %v1734_v34  ;;  %v1736_v51 = vmul.f32 %v3953_v2, %v1668_v5  ;;  %v1670_v35 = vmul.f32 %v3946_v59, %v1602_v55 }
 0x23b   : > { %v1737_v50 = vmul.f32 %v3953_v2, %v1669_v38  ;;  %vm1864_vm11 = vcmp.ge.f32.partialorder %v1800_v7, 0.0  ;;  %vm1865_vm12 = vcmp.ge.f32.partialorder %v1801_v25, 0.0  ;;  %v1928_v20 = vmul.f32 0.2, %v1800_v7  ;;  %v1542_v38 = vld [vmem:[#allocation2 + $0x1b8] sm:$0xff] }
 0x23c   : > { %v1929_v62 = vmul.f32 0.2, %v1801_v25  ;;  %v1803_v39 = vadd.f32 %v3962_v3, %v1735_v48  ;;  %vm1866_vm13 = vcmp.ge.f32.partialorder %v1802_v11, 0.0  ;;  %v1930_v41 = vmul.f32 0.2, %v1802_v11 }
 0x23d   : > { %v1804_v57 = vadd.f32 %v3962_v3, %v1736_v51  ;;  %v1992_v44 = vsel %vm1864_vm11, %v1800_v7, %v1928_v20  ;;  %v1805_v54 = vadd.f32 %v3962_v3, %v1737_v50  ;;  %v1671_v45 = vmul.f32 %v3946_v59, %v1603_v1  ;;  %v1543_v20 = vld [vmem:[#allocation2 + $0x28] sm:$0xff] }
 0x23e   : > { %v1993_v49 = vsel %vm1865_vm12, %v1801_v25, %v1929_v62  ;;  %vm1867_vm14 = vcmp.ge.f32.partialorder %v1803_v39, 0.0  ;;  %v1931_v32 = vmul.f32 0.2, %v1803_v39  ;;  %v1994_v58 = vsel %vm1866_vm13, %v1802_v11, %v1930_v41 }
 0x23f   : > { %v2836_v12 = vpack.c.bf16 %v1993_v49, %v1992_v44  ;;  %vm1868_vm15 = vcmp.ge.f32.partialorder %v1804_v57, 0.0  ;;  %vm1869_vm0 = vcmp.ge.f32.partialorder %v1805_v54, 0.0  ;;  %v1932_v47 = vmul.f32 0.2, %v1804_v57 }
 0x240   : > { %v1933_v60 = vmul.f32 0.2, %v1805_v54  ;;  %v1995_v40 = vsel %vm1867_vm14, %v1803_v39, %v1931_v32  ;;  %v1738_v13 = vmul.f32 %v3953_v2, %v1670_v35  ;;  %v1739_v0 = vmul.f32 %v3953_v2, %v1671_v45  ;;  %v1544_v39 = vld [vmem:[#allocation2 + $0x1e8] sm:$0xff] }
 0x241   : > { %3007 = vst [vmem:[%s4305_s4 + $0x20] sm:$0xff] %v2836_v12   ;;  %v1604_v18 = vsub.f32 %v1536_v56, %v3944_v14  ;;  %v2841_v6 = vpack.c.bf16 %v1995_v40, %v1994_v58  ;;  %v1996_v36 = vsel %vm1868_vm15, %v1804_v57, %v1932_v47  ;;  %v1605_v9 = vsub.f32 %v1537_v52, %v3944_v14  ;;  %v1545_v58 = vld [vmem:[#allocation2 + $0xf8] sm:$0xff]  ;;  %v1546_v47 = vld [vmem:[#allocation2 + $0x160] sm:$0xff] }
 0x242   : > { %v1997_v27 = vsel %vm1869_vm0, %v1805_v54, %v1933_v60  ;;  %v1806_v46 = vadd.f32 %v3962_v3, %v1738_v13  ;;  %v1807_v37 = vadd.f32 %v3962_v3, %v1739_v0  ;;  %v1606_v17 = vsub.f32 %v1538_v19, %v3944_v14  ;;  %v1547_v13 = vld [vmem:[#allocation2 + $0x30] sm:$0xff] }
 0x243   : > { %v2846_v10 = vpack.c.bf16 %v1997_v27, %v1996_v36  ;;  %v1672_v16 = vmul.f32 %v3946_v59, %v1604_v18  ;;  %3008 = vst [vmem:[%s4305_s4 + $0x28] sm:$0xff] %v2841_v6   ;;  %v1673_v33 = vmul.f32 %v3946_v59, %v1605_v9  ;;  %v1607_v53 = vsub.f32 %v1539_v4, %v3944_v14 }
 0x244   : > { %v1608_v21 = vsub.f32 %v1540_v8, %v3944_v14  ;;  %vm1870_vm1 = vcmp.ge.f32.partialorder %v1806_v46, 0.0  ;;  %vm1871_vm2 = vcmp.ge.f32.partialorder %v1807_v37, 0.0  ;;  %v1934_v42 = vmul.f32 0.2, %v1806_v46 }
 0x245   : > { %3009 = vst [vmem:[%s4305_s4 + $0x30] sm:$0xff] %v2846_v10   ;;  %v1740_v23 = vmul.f32 %v3953_v2, %v1672_v16  ;;  %v1935_v22 = vmul.f32 0.2, %v1807_v37  ;;  %v1741_v24 = vmul.f32 %v3953_v2, %v1673_v33  ;;  %v1674_v31 = vmul.f32 %v3946_v59, %v1606_v17  ;;  %v1548_v16 = vld [vmem:[#allocation2 + $0x1e0] sm:$0xff] }
 0x246   : > { %v1675_v26 = vmul.f32 %v3946_v59, %v1607_v53  ;;  %v1998_v43 = vsel %vm1870_vm1, %v1806_v46, %v1934_v42  ;;  %v1609_v29 = vsub.f32 %v1541_v15, %v3944_v14  ;;  %v1676_v63 = vmul.f32 %v3946_v59, %v1608_v21 }
 0x247   : > { %v1808_v28 = vadd.f32 %v3962_v3, %v1740_v23  ;;  %v1999_v30 = vsel %vm1871_vm2, %v1807_v37, %v1935_v22  ;;  %v1809_v61 = vadd.f32 %v3962_v3, %v1741_v24  ;;  %v1742_v34 = vmul.f32 %v3953_v2, %v1674_v31 }
 0x248   : > { %v1743_v5 = vmul.f32 %v3953_v2, %v1675_v26  ;;  %v2851_v55 = vpack.c.bf16 %v1999_v30, %v1998_v43  ;;  %v1677_v25 = vmul.f32 %v3946_v59, %v1609_v29  ;;  %v1744_v50 = vmul.f32 %v3953_v2, %v1676_v63  ;;  %v1549_v26 = vld [vmem:[#allocation2] sm:$0xff] }
 0x249   : > { %vm1872_vm3 = vcmp.ge.f32.partialorder %v1808_v28, 0.0  ;;  %v1936_v7 = vmul.f32 0.2, %v1808_v28  ;;  %vm1873_vm4 = vcmp.ge.f32.partialorder %v1809_v61, 0.0  ;;  %v1937_v48 = vmul.f32 0.2, %v1809_v61 }
 0x24a   : > { %v1810_v1 = vadd.f32 %v3962_v3, %v1742_v34  ;;  %v1811_v11 = vadd.f32 %v3962_v3, %v1743_v5  ;;  %3010 = vst [vmem:[%s4305_s4 + $0x38] sm:$0xff] %v2851_v55   ;;  %v1745_v35 = vmul.f32 %v3953_v2, %v1677_v25  ;;  %v1610_v62 = vsub.f32 %v1542_v38, %v3944_v14  ;;  %v1550_v25 = vld [vmem:[#allocation2 + $0xf0] sm:$0xff] }
 0x24b   : > { %v2000_v51 = vsel %vm1872_vm3, %v1808_v28, %v1936_v7  ;;  %v2001_v41 = vsel %vm1873_vm4, %v1809_v61, %v1937_v48  ;;  %v1812_v54 = vadd.f32 %v3962_v3, %v1744_v50  ;;  %v1611_v12 = vsub.f32 %v1543_v20, %v3944_v14 }
 0x24c   : > { %vm1874_vm5 = vcmp.ge.f32.partialorder %v1810_v1, 0.0  ;;  %vm1875_vm6 = vcmp.ge.f32.partialorder %v1811_v11, 0.0  ;;  %v1938_v57 = vmul.f32 0.2, %v1810_v1  ;;  %v2856_v44 = vpack.c.bf16 %v2001_v41, %v2000_v51  ;;  %v1551_v51 = vld [vmem:[#allocation2 + $0x8] sm:$0xff] }
 0x24d   : > { %v1939_v49 = vmul.f32 0.2, %v1811_v11  ;;  %v1813_v45 = vadd.f32 %v3962_v3, %v1745_v35  ;;  %v1678_v32 = vmul.f32 %v3946_v59, %v1610_v62  ;;  %v1612_v52 = vsub.f32 %v1544_v39, %v3944_v14 }
 0x24e   : > { %v2002_v56 = vsel %vm1874_vm5, %v1810_v1, %v1938_v57  ;;  %3011 = vst [vmem:[%s4305_s4 + $0x40] sm:$0xff] %v2856_v44   ;;  %vm1876_vm7 = vcmp.ge.f32.partialorder %v1812_v54, 0.0  ;;  %v1940_v40 = vmul.f32 0.2, %v1812_v54  ;;  %v1679_v19 = vmul.f32 %v3946_v59, %v1611_v12  ;;  %v1552_v57 = vld [vmem:[#allocation2 + $0x148] sm:$0xff]  ;;  %v1553_v44 = vld [vmem:[#allocation2 + $0x1d0] sm:$0xff] }
 0x24f   : > { %v2003_v60 = vsel %vm1875_vm6, %v1811_v11, %v1939_v49  ;;  %vm1877_vm8 = vcmp.ge.f32.partialorder %v1813_v45, 0.0  ;;  %v1941_v18 = vmul.f32 0.2, %v1813_v45  ;;  %v1746_v4 = vmul.f32 %v3953_v2, %v1678_v32  ;;  %v1554_v49 = vld [vmem:[#allocation2 + $0x100] sm:$0xff] }
 0x250   : > { %v2861_v0 = vpack.c.bf16 %v2003_v60, %v2002_v56  ;;  %v2004_v8 = vsel %vm1876_vm7, %v1812_v54, %v1940_v40  ;;  %v1613_v6 = vsub.f32 %v1545_v58, %v3944_v14  ;;  %v1680_v36 = vmul.f32 %v3946_v59, %v1612_v52  ;;  %v1555_v60 = vld [vmem:[#allocation2 + $0xc8] sm:$0xff] }
 0x251   : > { %v1614_v27 = vsub.f32 %v1546_v47, %v3944_v14  ;;  %v2005_v9 = vsel %vm1877_vm8, %v1813_v45, %v1941_v18  ;;  %v1747_v10 = vmul.f32 %v3953_v2, %v1679_v19  ;;  %v1814_v46 = vadd.f32 %v3962_v3, %v1746_v4 }
 0x252   : > { %3012 = vst [vmem:[%s4305_s4 + $0x48] sm:$0xff] %v2861_v0   ;;  %v1615_v37 = vsub.f32 %v1547_v13, %v3944_v14  ;;  %v2866_v33 = vpack.c.bf16 %v2005_v9, %v2004_v8  ;;  %v1681_v17 = vmul.f32 %v3946_v59, %v1613_v6  ;;  %v1748_v53 = vmul.f32 %v3953_v2, %v1680_v36 }
 0x253   : > { %v1682_v15 = vmul.f32 %v3946_v59, %v1614_v27  ;;  %v1815_v21 = vadd.f32 %v3962_v3, %v1747_v10  ;;  %vm1878_vm9 = vcmp.ge.f32.partialorder %v1814_v46, 0.0  ;;  %v1942_v42 = vmul.f32 0.2, %v1814_v46 }
 0x254   : > { %v1683_v23 = vmul.f32 %v3946_v59, %v1615_v37  ;;  %3013 = vst [vmem:[%s4305_s4 + $0x50] sm:$0xff] %v2866_v33   ;;  %v1749_v22 = vmul.f32 %v3953_v2, %v1681_v17  ;;  %v1816_v24 = vadd.f32 %v3962_v3, %v1748_v53  ;;  %v1616_v43 = vsub.f32 %v1548_v16, %v3944_v14 }
 0x255   : > { %v1750_v31 = vmul.f32 %v3953_v2, %v1682_v15  ;;  %vm1879_vm10 = vcmp.ge.f32.partialorder %v1815_v21, 0.0  ;;  %v1943_v28 = vmul.f32 0.2, %v1815_v21  ;;  %v2006_v29 = vsel %vm1878_vm9, %v1814_v46, %v1942_v42 }
 0x256   : > { %v1751_v63 = vmul.f32 %v3953_v2, %v1683_v23  ;;  %v1817_v30 = vadd.f32 %v3962_v3, %v1749_v22  ;;  %vm1880_vm11 = vcmp.ge.f32.partialorder %v1816_v24, 0.0  ;;  %v1944_v61 = vmul.f32 0.2, %v1816_v24  ;;  %v1556_v23 = vld [vmem:[#allocation2 + $0x40] sm:$0xff] }
 0x257   : > { %v1818_v34 = vadd.f32 %v3962_v3, %v1750_v31  ;;  %v2007_v5 = vsel %vm1879_vm10, %v1815_v21, %v1943_v28  ;;  %v1617_v55 = vsub.f32 %v1549_v26, %v3944_v14  ;;  %v1684_v7 = vmul.f32 %v3946_v59, %v1616_v43 }
 0x258   : > { %v1819_v38 = vadd.f32 %v3962_v3, %v1751_v63  ;;  %v2871_v48 = vpack.c.bf16 %v2007_v5, %v2006_v29  ;;  %vm1881_vm12 = vcmp.ge.f32.partialorder %v1817_v30, 0.0  ;;  %v1945_v1 = vmul.f32 0.2, %v1817_v30  ;;  %v1557_v63 = vld [vmem:[#allocation2 + $0x1f8] sm:$0xff]  ;;  %v1558_v5 = vld [vmem:[#allocation2 + $0x20] sm:$0xff] }
 0x259   : > { %v2008_v11 = vsel %vm1880_vm11, %v1816_v24, %v1944_v61  ;;  %vm1882_vm13 = vcmp.ge.f32.partialorder %v1818_v34, 0.0  ;;  %v1946_v50 = vmul.f32 0.2, %v1818_v34  ;;  %v1685_v62 = vmul.f32 %v3946_v59, %v1617_v55 }
 0x25a   : > { %vm1883_vm14 = vcmp.ge.f32.partialorder %v1819_v38, 0.0  ;;  %v1947_v35 = vmul.f32 0.2, %v1819_v38  ;;  %3014 = vst [vmem:[%s4305_s4 + $0x58] sm:$0xff] %v2871_v48   ;;  %v2009_v20 = vsel %vm1881_vm12, %v1817_v30, %v1945_v1  ;;  %v1752_v39 = vmul.f32 %v3953_v2, %v1684_v7 }
 0x25b   : > { %v1618_v41 = vsub.f32 %v1550_v25, %v3944_v14  ;;  %v2876_v54 = vpack.c.bf16 %v2009_v20, %v2008_v11  ;;  %v2010_v45 = vsel %vm1882_vm13, %v1818_v34, %v1946_v50  ;;  %v1619_v12 = vsub.f32 %v1551_v51, %v3944_v14  ;;  %v1559_v51 = vld [vmem:[#allocation2 + $0x128] sm:$0xff] }
 0x25c   : > { %v2011_v56 = vsel %vm1883_vm14, %v1819_v38, %v1947_v35  ;;  %v1753_v58 = vmul.f32 %v3953_v2, %v1685_v62  ;;  %v1820_v52 = vadd.f32 %v3962_v3, %v1752_v39  ;;  %v1620_v13 = vsub.f32 %v1552_v57, %v3944_v14  ;;  %v1560_v62 = vld [vmem:[#allocation2 + $0x1a0] sm:$0xff]  ;;  %v1561_v39 = vld [vmem:[#allocation2 + $0x1f0] sm:$0xff] }
 0x25d   : > { %v2881_v32 = vpack.c.bf16 %v2011_v56, %v2010_v45  ;;  %v1686_v47 = vmul.f32 %v3946_v59, %v1618_v41  ;;  %3015 = vst [vmem:[%s4305_s4 + $0x60] sm:$0xff] %v2876_v54   ;;  %v1687_v40 = vmul.f32 %v3946_v59, %v1619_v12  ;;  %v1621_v0 = vsub.f32 %v1553_v44, %v3944_v14  ;;  %v1562_v12 = vld [vmem:[#allocation2 + $0xe8] sm:$0xff] }
 0x25e   : > { %v1622_v18 = vsub.f32 %v1554_v49, %v3944_v14  ;;  %v1821_v19 = vadd.f32 %v3962_v3, %v1753_v58  ;;  %vm1884_vm15 = vcmp.ge.f32.partialorder %v1820_v52, 0.0  ;;  %v1948_v4 = vmul.f32 0.2, %v1820_v52 }
 0x25f   : > { %3016 = vst [vmem:[%s4305_s4 + $0x68] sm:$0xff] %v2881_v32   ;;  %v1754_v8 = vmul.f32 %v3953_v2, %v1686_v47  ;;  %v1755_v6 = vmul.f32 %v3953_v2, %v1687_v40  ;;  %v1688_v36 = vmul.f32 %v3946_v59, %v1620_v13  ;;  %v1689_v27 = vmul.f32 %v3946_v59, %v1621_v0 }
 0x260   : > { %v1623_v9 = vsub.f32 %v1555_v60, %v3944_v14  ;;  %vm1885_vm0 = vcmp.ge.f32.partialorder %v1821_v19, 0.0  ;;  %v1949_v10 = vmul.f32 0.2, %v1821_v19  ;;  %v2012_v46 = vsel %vm1884_vm15, %v1820_v52, %v1948_v4 }
 0x261   : > { %v1822_v37 = vadd.f32 %v3962_v3, %v1754_v8  ;;  %v1823_v16 = vadd.f32 %v3962_v3, %v1755_v6  ;;  %v1756_v33 = vmul.f32 %v3953_v2, %v1688_v36  ;;  %v1757_v17 = vmul.f32 %v3953_v2, %v1689_v27 }
 0x262   : > { %v1690_v53 = vmul.f32 %v3946_v59, %v1622_v18  ;;  %v2013_v15 = vsel %vm1885_vm0, %v1821_v19, %v1949_v10  ;;  %v1691_v42 = vmul.f32 %v3946_v59, %v1623_v9  ;;  %v1624_v34 = vsub.f32 %v1556_v23, %v3944_v14  ;;  %v1563_v9 = vld [vmem:[#allocation2 + $0x78] sm:$0xff]  ;;  %v1564_v23 = vld [vmem:[#allocation2 + $0x70] sm:$0xff] }
 0x263   : > { %vm1886_vm1 = vcmp.ge.f32.partialorder %v1822_v37, 0.0  ;;  %v1950_v21 = vmul.f32 0.2, %v1822_v37  ;;  %v2886_v22 = vpack.c.bf16 %v2013_v15, %v2012_v46  ;;  %vm1887_vm2 = vcmp.ge.f32.partialorder %v1823_v16, 0.0 }
 0x264   : > { %v1951_v24 = vmul.f32 0.2, %v1823_v16  ;;  %v1824_v31 = vadd.f32 %v3962_v3, %v1756_v33  ;;  %v1825_v43 = vadd.f32 %v3962_v3, %v1757_v17  ;;  %v1758_v28 = vmul.f32 %v3953_v2, %v1690_v53 }
 0x265   : > { %v2014_v26 = vsel %vm1886_vm1, %v1822_v37, %v1950_v21  ;;  %v1759_v29 = vmul.f32 %v3953_v2, %v1691_v42  ;;  %3017 = vst [vmem:[%s4305_s4 + $0x70] sm:$0xff] %v2886_v22   ;;  %v1625_v1 = vsub.f32 %v1557_v63, %v3944_v14  ;;  %v1692_v11 = vmul.f32 %v3946_v59, %v1624_v34  ;;  %v1566_v34 = vld [vmem:[#allocation2 + $0x1d8] sm:$0xff] }
 0x266   : > { %v2015_v30 = vsel %vm1887_vm2, %v1823_v16, %v1951_v24  ;;  %vm1888_vm3 = vcmp.ge.f32.partialorder %v1824_v31, 0.0  ;;  %v1952_v61 = vmul.f32 0.2, %v1824_v31  ;;  %vm1889_vm4 = vcmp.ge.f32.partialorder %v1825_v43, 0.0 }
 0x267   : > { %v2891_v38 = vpack.c.bf16 %v2015_v30, %v2014_v26  ;;  %v1953_v55 = vmul.f32 0.2, %v1825_v43  ;;  %v1826_v7 = vadd.f32 %v3962_v3, %v1758_v28  ;;  %v1827_v48 = vadd.f32 %v3962_v3, %v1759_v29  ;;  %v1565_v26 = vld [vmem:[#allocation2 + $0x90] sm:$0xff] }
 0x268   : > { %v2016_v25 = vsel %vm1888_vm3, %v1824_v31, %v1952_v61  ;;  %v1626_v20 = vsub.f32 %v1558_v5, %v3944_v14  ;;  %v1693_v44 = vmul.f32 %v3946_v59, %v1625_v1  ;;  %v1760_v54 = vmul.f32 %v3953_v2, %v1692_v11  ;;  %v1567_v5 = vld [vmem:[#allocation2 + $0xd0] sm:$0xff]  ;;  %v1569_v1 = vld [vmem:[#allocation2 + $0x88] sm:$0xff] }
 0x269   : > { %3018 = vst [vmem:[%s4305_s4 + $0x78] sm:$0xff] %v2891_v38   ;;  %v2017_v50 = vsel %vm1889_vm4, %v1825_v43, %v1953_v55  ;;  %vm1890_vm5 = vcmp.ge.f32.partialorder %v1826_v7, 0.0  ;;  %v1954_v35 = vmul.f32 0.2, %v1826_v7  ;;  %vm1891_vm6 = vcmp.ge.f32.partialorder %v1827_v48, 0.0  ;;  %v1568_v38 = vld [vmem:[#allocation2 + $0xb8] sm:$0xff] }
 0x26a   : > { %v2896_v41 = vpack.c.bf16 %v2017_v50, %v2016_v25  ;;  %v1955_v57 = vmul.f32 0.2, %v1827_v48  ;;  %v1627_v45 = vsub.f32 %v1559_v51, %v3944_v14  ;;  %v1694_v56 = vmul.f32 %v3946_v59, %v1626_v20 }
 0x26b   : > { %v2018_v49 = vsel %vm1890_vm5, %v1826_v7, %v1954_v35  ;;  %v1761_v58 = vmul.f32 %v3953_v2, %v1693_v44  ;;  %v1628_v52 = vsub.f32 %v1560_v62, %v3944_v14  ;;  %v1629_v47 = vsub.f32 %v1561_v39, %v3944_v14 }
 0x26c   : > { %3019 = vst [vmem:[%s4305_s4 + $0x80] sm:$0xff] %v2896_v41   ;;  %v2019_v32 = vsel %vm1891_vm6, %v1827_v48, %v1955_v57  ;;  %v1828_v40 = vadd.f32 %v3962_v3, %v1760_v54  ;;  %v1695_v13 = vmul.f32 %v3946_v59, %v1627_v45  ;;  %v1762_v0 = vmul.f32 %v3953_v2, %v1694_v56 }
 0x26d   : > { %v2901_v60 = vpack.c.bf16 %v2019_v32, %v2018_v49  ;;  %v1829_v18 = vadd.f32 %v3962_v3, %v1761_v58  ;;  %v1696_v19 = vmul.f32 %v3946_v59, %v1628_v52  ;;  %v1697_v4 = vmul.f32 %v3946_v59, %v1629_v47 }
 0x26e   : > { %v1630_v8 = vsub.f32 %v1562_v12, %v3944_v14  ;;  %vm1892_vm7 = vcmp.ge.f32.partialorder %v1828_v40, 0.0  ;;  %v1956_v6 = vmul.f32 0.2, %v1828_v40  ;;  %v1763_v36 = vmul.f32 %v3953_v2, %v1695_v13 }
 0x26f   : > { %3020 = vst [vmem:[%s4305_s4 + $0x88] sm:$0xff] %v2901_v60   ;;  %v1830_v27 = vadd.f32 %v3962_v3, %v1762_v0  ;;  %vm1893_vm8 = vcmp.ge.f32.partialorder %v1829_v18, 0.0  ;;  %v1957_v10 = vmul.f32 0.2, %v1829_v18  ;;  %v1764_v46 = vmul.f32 %v3953_v2, %v1696_v19 }
 0x270   : > { %v1765_v37 = vmul.f32 %v3953_v2, %v1697_v4  ;;  %v2020_v16 = vsel %vm1892_vm7, %v1828_v40, %v1956_v6  ;;  %v1831_v33 = vadd.f32 %v3962_v3, %v1763_v36  ;;  %v1631_v42 = vsub.f32 %v1563_v9, %v3944_v14  ;;  %v1571_v6 = vld [vmem:[#allocation2 + $0x1c8] sm:$0xff] }
 0x271   : > { %vm1894_vm9 = vcmp.ge.f32.partialorder %v1830_v27, 0.0  ;;  %v1958_v17 = vmul.f32 0.2, %v1830_v27  ;;  %v2021_v53 = vsel %vm1893_vm8, %v1829_v18, %v1957_v10  ;;  %v1832_v15 = vadd.f32 %v3962_v3, %v1764_v46 }
 0x272   : > { %v1833_v21 = vadd.f32 %v3962_v3, %v1765_v37  ;;  %v2906_v22 = vpack.c.bf16 %v2021_v53, %v2020_v16  ;;  %vm1895_vm10 = vcmp.ge.f32.partialorder %v1831_v33, 0.0  ;;  %v1959_v24 = vmul.f32 0.2, %v1831_v33 }
 0x273   : > { %v2022_v31 = vsel %vm1894_vm9, %v1830_v27, %v1958_v17  ;;  %vm1896_vm11 = vcmp.ge.f32.partialorder %v1832_v15, 0.0  ;;  %v1960_v43 = vmul.f32 0.2, %v1832_v15  ;;  %v1698_v63 = vmul.f32 %v3946_v59, %v1630_v8  ;;  %v1570_v8 = vld [vmem:[#allocation2 + $0xa8] sm:$0xff] }
 0x274   : > { %vm1897_vm12 = vcmp.ge.f32.partialorder %v1833_v21, 0.0  ;;  %v1961_v28 = vmul.f32 0.2, %v1833_v21  ;;  %3021 = vst [vmem:[%s4305_s4 + $0x90] sm:$0xff] %v2906_v22   ;;  %v2023_v29 = vsel %vm1895_vm10, %v1831_v33, %v1959_v24  ;;  %v1699_v30 = vmul.f32 %v3946_v59, %v1631_v42  ;;  %v1572_v42 = vld [vmem:[#allocation2 + $0x170] sm:$0xff] }
 0x275   : > { %v1632_v61 = vsub.f32 %v1564_v23, %v3944_v14  ;;  %v2911_v55 = vpack.c.bf16 %v2023_v29, %v2022_v31  ;;  %v2024_v7 = vsel %vm1896_vm11, %v1832_v15, %v1960_v43  ;;  %v1633_v48 = vsub.f32 %v1565_v26, %v3944_v14  ;;  %v1573_v29 = vld [vmem:[#allocation2 + $0x178] sm:$0xff] }
 0x276   : > { %v2025_v25 = vsel %vm1897_vm12, %v1833_v21, %v1961_v28  ;;  %v1766_v51 = vmul.f32 %v3953_v2, %v1698_v63  ;;  %v1767_v50 = vmul.f32 %v3953_v2, %v1699_v30  ;;  %v1634_v62 = vsub.f32 %v1566_v34, %v3944_v14  ;;  %v1574_v63 = vld [vmem:[#allocation2 + $0x68] sm:$0xff] }
 0x277   : > { %v2916_v11 = vpack.c.bf16 %v2025_v25, %v2024_v7  ;;  %v1700_v35 = vmul.f32 %v3946_v59, %v1632_v61  ;;  %3022 = vst [vmem:[%s4305_s4 + $0x98] sm:$0xff] %v2911_v55   ;;  %v1701_v20 = vmul.f32 %v3946_v59, %v1633_v48  ;;  %v1635_v39 = vsub.f32 %v1567_v5, %v3944_v14  ;;  %v1575_v5 = vld [vmem:[#allocation2 + $0x190] sm:$0xff]  ;;  %v1576_v48 = vld [vmem:[#allocation2 + $0x198] sm:$0xff] }
 0x278   : > { %v1636_v41 = vsub.f32 %v1568_v38, %v3944_v14  ;;  %v1834_v57 = vadd.f32 %v3962_v3, %v1766_v51  ;;  %v1835_v44 = vadd.f32 %v3962_v3, %v1767_v50  ;;  %v1637_v54 = vsub.f32 %v1569_v1, %v3944_v14 }
 0x279   : > { %3023 = vst [vmem:[%s4305_s4 + $0xa0] sm:$0xff] %v2916_v11   ;;  %v1768_v49 = vmul.f32 %v3953_v2, %v1700_v35  ;;  %v1769_v45 = vmul.f32 %v3953_v2, %v1701_v20  ;;  %v1702_v56 = vmul.f32 %v3946_v59, %v1634_v62  ;;  %v1703_v12 = vmul.f32 %v3946_v59, %v1635_v39 }
 0x27a   : > { %v1704_v32 = vmul.f32 %v3946_v59, %v1636_v41  ;;  %vm1898_vm13 = vcmp.ge.f32.partialorder %v1834_v57, 0.0  ;;  %vm1899_vm14 = vcmp.ge.f32.partialorder %v1835_v44, 0.0  ;;  %v1962_v58 = vmul.f32 0.2, %v1834_v57 }
 0x27b   : > { %v1963_v52 = vmul.f32 0.2, %v1835_v44  ;;  %v1836_v47 = vadd.f32 %v3962_v3, %v1768_v49  ;;  %v1837_v60 = vadd.f32 %v3962_v3, %v1769_v45  ;;  %v1770_v40 = vmul.f32 %v3953_v2, %v1702_v56  ;;  %v1577_v49 = vld [vmem:[#allocation2 + $0x38] sm:$0xff] }
 0x27c   : > { %v1771_v13 = vmul.f32 %v3953_v2, %v1703_v12  ;;  %v2026_v0 = vsel %vm1898_vm13, %v1834_v57, %v1962_v58  ;;  %v1705_v19 = vmul.f32 %v3946_v59, %v1637_v54  ;;  %v1772_v4 = vmul.f32 %v3953_v2, %v1704_v32 }
 0x27d   : > { %v2027_v18 = vsel %vm1899_vm14, %v1835_v44, %v1963_v52  ;;  %vm1900_vm15 = vcmp.ge.f32.partialorder %v1836_v47, 0.0  ;;  %vm1901_vm0 = vcmp.ge.f32.partialorder %v1837_v60, 0.0  ;;  %v1964_v27 = vmul.f32 0.2, %v1836_v47 }
 0x27e   : > { %v2921_v36 = vpack.c.bf16 %v2027_v18, %v2026_v0  ;;  %v1965_v9 = vmul.f32 0.2, %v1837_v60  ;;  %v1838_v10 = vadd.f32 %v3962_v3, %v1770_v40  ;;  %v1839_v46 = vadd.f32 %v3962_v3, %v1771_v13 }
 0x27f   : > { %v1773_v37 = vmul.f32 %v3953_v2, %v1705_v19  ;;  %v2028_v16 = vsel %vm1900_vm15, %v1836_v47, %v1964_v27  ;;  %v1840_v33 = vadd.f32 %v3962_v3, %v1772_v4  ;;  %v1638_v17 = vsub.f32 %v1570_v8, %v3944_v14  ;;  %v1578_v27 = vld [vmem:[#allocation2 + $0xc0] sm:$0xff] }
 0x280   : > { %3024 = vst [vmem:[%s4305_s4 + $0xa8] sm:$0xff] %v2921_v36   ;;  %v1639_v53 = vsub.f32 %v1571_v6, %v3944_v14  ;;  %v2029_v15 = vsel %vm1901_vm0, %v1837_v60, %v1965_v9  ;;  %vm1902_vm1 = vcmp.ge.f32.partialorder %v1838_v10, 0.0  ;;  %vm1903_vm2 = vcmp.ge.f32.partialorder %v1839_v46, 0.0 }
 0x281   : > { %v1966_v21 = vmul.f32 0.2, %v1838_v10  ;;  %v2926_v23 = vpack.c.bf16 %v2029_v15, %v2028_v16  ;;  %v1967_v22 = vmul.f32 0.2, %v1839_v46  ;;  %v1841_v24 = vadd.f32 %v3962_v3, %v1773_v37 }
 0x282   : > { %vm1904_vm3 = vcmp.ge.f32.partialorder %v1840_v33, 0.0  ;;  %v1968_v26 = vmul.f32 0.2, %v1840_v33  ;;  %v1706_v43 = vmul.f32 %v3946_v59, %v1638_v17  ;;  %v1707_v28 = vmul.f32 %v3946_v59, %v1639_v53  ;;  %v3082_v53 = vld [vmem:[#allocation3] ss:$0 sm:$0xff] }
 0x283   : > { %v2030_v31 = vsel %vm1902_vm1, %v1838_v10, %v1966_v21  ;;  %3025 = vst [vmem:[%s4305_s4 + $0xb0] sm:$0xff] %v2926_v23   ;;  %v2031_v30 = vsel %vm1903_vm2, %v1839_v46, %v1967_v22  ;;  %vm1905_vm4 = vcmp.ge.f32.partialorder %v1841_v24, 0.0  ;;  %v1969_v61 = vmul.f32 0.2, %v1841_v24  ;;  %v1579_v46 = vld [vmem:[#allocation2 + $0x1c0] sm:$0xff] }
 0x284   : > { %v1640_v34 = vsub.f32 %v1572_v42, %v3944_v14  ;;  %v2931_v38 = vpack.c.bf16 %v2031_v30, %v2030_v31  ;;  %v2032_v55 = vsel %vm1904_vm3, %v1840_v33, %v1968_v26  ;;  %v1774_v7 = vmul.f32 %v3953_v2, %v1706_v43  ;;  %v1581_v31 = vld [vmem:[#allocation2 + $0x10] sm:$0xff] }
 0x285   : > { %v1775_v25 = vmul.f32 %v3953_v2, %v1707_v28  ;;  %v2033_v1 = vsel %vm1905_vm4, %v1841_v24, %v1969_v61  ;;  %v1641_v11 = vsub.f32 %v1573_v29, %v3944_v14  ;;  %v1642_v50 = vsub.f32 %v1574_v63, %v3944_v14  ;;  %v1580_v24 = vld [vmem:[#allocation2 + $0x158] sm:$0xff]  ;;  %v3083_v28 = vld [vmem:[#allocation4] ss:$0 sm:$0xff] }
 0x286   : > { %v1708_v51 = vmul.f32 %v3946_v59, %v1640_v34  ;;  %3026 = vst [vmem:[%s4305_s4 + $0xb8] sm:$0xff] %v2931_v38   ;;  %v2936_v35 = vpack.c.bf16 %v2033_v1, %v2032_v55  ;;  %v1842_v20 = vadd.f32 %v3962_v3, %v1774_v7  ;;  %v1643_v39 = vsub.f32 %v1575_v5, %v3944_v14  ;;  %v1582_v63 = vld [vmem:[#allocation2 + $0x58] sm:$0xff] }
 0x287   : > { %v1843_v62 = vadd.f32 %v3962_v3, %v1775_v25  ;;  %v1709_v41 = vmul.f32 %v3946_v59, %v1641_v11  ;;  %v1710_v44 = vmul.f32 %v3946_v59, %v1642_v50  ;;  %v1644_v54 = vsub.f32 %v1576_v48, %v3944_v14  ;;  %v3085_v50 = vld [vmem:[%s4304_s3] ss:$0 sm:$0xff] }
 0x288   : > { %v1776_v57 = vmul.f32 %v3953_v2, %v1708_v51  ;;  %3027 = vst [vmem:[%s4305_s4 + $0xc0] sm:$0xff] %v2936_v35   ;;  %vm1906_vm5 = vcmp.ge.f32.partialorder %v1842_v20, 0.0  ;;  %v1970_v45 = vmul.f32 0.2, %v1842_v20  ;;  %v1711_v56 = vmul.f32 %v3946_v59, %v1643_v39 }
 0x289   : > { %vm1907_vm6 = vcmp.ge.f32.partialorder %v1843_v62, 0.0  ;;  %v1971_v12 = vmul.f32 0.2, %v1843_v62  ;;  %v1777_v32 = vmul.f32 %v3953_v2, %v1709_v41  ;;  %v1778_v52 = vmul.f32 %v3953_v2, %v1710_v44 }
 0x28a   : > { %v1844_v58 = vadd.f32 %v3962_v3, %v1776_v57  ;;  %v2034_v47 = vsel %vm1906_vm5, %v1842_v20, %v1970_v45  ;;  %v1779_v60 = vmul.f32 %v3953_v2, %v1711_v56  ;;  %v1645_v40 = vsub.f32 %v1577_v49, %v3944_v14 }
 0x28b   : > { %v1712_v13 = vmul.f32 %v3946_v59, %v1644_v54  ;;  %v2035_v0 = vsel %vm1907_vm6, %v1843_v62, %v1971_v12  ;;  %v1845_v18 = vadd.f32 %v3962_v3, %v1777_v32  ;;  %v1846_v8 = vadd.f32 %v3962_v3, %v1778_v52 }
 0x28c   : > { %vm1908_vm7 = vcmp.ge.f32.partialorder %v1844_v58, 0.0  ;;  %v1972_v19 = vmul.f32 0.2, %v1844_v58  ;;  %v2941_v4 = vpack.c.bf16 %v2035_v0, %v2034_v47  ;;  %v1847_v6 = vadd.f32 %v3962_v3, %v1779_v60 }
 0x28d   : > { %v1713_v36 = vmul.f32 %v3946_v59, %v1645_v40  ;;  %vm1909_vm8 = vcmp.ge.f32.partialorder %v1845_v18, 0.0  ;;  %v1973_v9 = vmul.f32 0.2, %v1845_v18  ;;  %v1780_v14 = vmul.f32 %v3953_v2, %v1712_v13 }
 0x28e   : > { %v2036_v10 = vsel %vm1908_vm7, %v1844_v58, %v1972_v19  ;;  %3028 = vst [vmem:[%s4305_s4 + $0xc8] sm:$0xff] %v2941_v4   ;;  %vm1910_vm9 = vcmp.ge.f32.partialorder %v1846_v8, 0.0  ;;  %vm1911_vm10 = vcmp.ge.f32.partialorder %v1847_v6, 0.0  ;;  %v1974_v37 = vmul.f32 0.2, %v1846_v8 }
 0x28f   : > { %v1781_v16 = vmul.f32 %v3953_v2, %v1713_v36  ;;  %v2037_v33 = vsel %vm1909_vm8, %v1845_v18, %v1973_v9  ;;  %v1975_v17 = vmul.f32 0.2, %v1847_v6  ;;  %v1848_v59 = vadd.f32 %v3962_v3, %v1780_v14  ;;  %v1583_v2 = vld [vmem:[#allocation2 + $0xa0] sm:$0xff] }
 0x290   : > { %v1646_v15 = vsub.f32 %v1578_v27, %v3082_v53  ;;  %v2946_v21 = vpack.c.bf16 %v2037_v33, %v2036_v10  ;;  %v2038_v42 = vsel %vm1910_vm9, %v1846_v8, %v1974_v37  ;;  %v1647_v22 = vsub.f32 %v1579_v46, %v3082_v53 }
 0x291   : > { %v1849_v23 = vadd.f32 %v3962_v3, %v1781_v16  ;;  %v2039_v26 = vsel %vm1911_vm10, %v1847_v6, %v1975_v17  ;;  %vm1912_vm11 = vcmp.ge.f32.partialorder %v1848_v59, 0.0  ;;  %v1976_v43 = vmul.f32 0.2, %v1848_v59  ;;  %v3084_v3 = vld [vmem:[%s4303_s2] ss:$0 sm:$0xff] }
 0x292   : > { %v1714_v29 = vmul.f32 %v3083_v28, %v1646_v15  ;;  %3029 = vst [vmem:[%s4305_s4 + $0xd0] sm:$0xff] %v2946_v21   ;;  %v2951_v30 = vpack.c.bf16 %v2039_v26, %v2038_v42  ;;  %v1715_v34 = vmul.f32 %v3083_v28, %v1647_v22  ;;  %v1648_v55 = vsub.f32 %v1580_v24, %v3082_v53 }
 0x293   : > { %vm1913_vm12 = vcmp.ge.f32.partialorder %v1849_v23, 0.0  ;;  %v1977_v61 = vmul.f32 0.2, %v1849_v23  ;;  %v2040_v5 = vsel %vm1912_vm11, %v1848_v59, %v1976_v43  ;;  %v1649_v7 = vsub.f32 %v1581_v31, %v3082_v53 }
 0x294   : > { %v1782_v38 = vmul.f32 %v3084_v3, %v1714_v29  ;;  %3030 = vst [vmem:[%s4305_s4 + $0xd8] sm:$0xff] %v2951_v30   ;;  %v1783_v48 = vmul.f32 %v3084_v3, %v1715_v34  ;;  %v1650_v1 = vsub.f32 %v1582_v63, %v3082_v53  ;;  %v1651_v11 = vsub.f32 %v1583_v2, %v3082_v53 }
 0x295   : > { %v2041_v25 = vsel %vm1913_vm12, %v1849_v23, %v1977_v61  ;;  %v1716_v20 = vmul.f32 %v3083_v28, %v1648_v55  ;;  %v1717_v62 = vmul.f32 %v3083_v28, %v1649_v7 }
 0x296   : > { %v2956_v51 = vpack.c.bf16 %v2041_v25, %v2040_v5  ;;  %v1850_v35 = vadd.f32 %v3085_v50, %v1782_v38  ;;  %v1851_v39 = vadd.f32 %v3085_v50, %v1783_v48  ;;  %v1718_v41 = vmul.f32 %v3083_v28, %v1650_v1 }
 0x297   : > { %v1719_v57 = vmul.f32 %v3083_v28, %v1651_v11  ;;  %v1784_v49 = vmul.f32 %v3084_v3, %v1716_v20  ;;  %v1785_v54 = vmul.f32 %v3084_v3, %v1717_v62 }
 0x298   : > { %3031 = vst [vmem:[%s4305_s4 + $0xe0] sm:$0xff] %v2956_v51   ;;  %vm1914_vm13 = vcmp.ge.f32.partialorder %v1850_v35, 0.0  ;;  %v1978_v44 = vmul.f32 0.2, %v1850_v35  ;;  %vm1915_vm14 = vcmp.ge.f32.partialorder %v1851_v39, 0.0  ;;  %v1786_v56 = vmul.f32 %v3084_v3, %v1718_v41 }
 0x299   : > { %v1979_v45 = vmul.f32 0.2, %v1851_v39  ;;  %v1787_v12 = vmul.f32 %v3084_v3, %v1719_v57  ;;  %v1852_v58 = vadd.f32 %v3085_v50, %v1784_v49  ;;  %v1853_v52 = vadd.f32 %v3085_v50, %v1785_v54 }
 0x29a   : > { %v2042_v32 = vsel %vm1914_vm13, %v1850_v35, %v1978_v44  ;;  %v1854_v60 = vadd.f32 %v3085_v50, %v1786_v56 }
 0x29b   : > { %v2043_v47 = vsel %vm1915_vm14, %v1851_v39, %v1979_v45  ;;  %v1855_v40 = vadd.f32 %v3085_v50, %v1787_v12  ;;  %vm1916_vm15 = vcmp.ge.f32.partialorder %v1852_v58, 0.0  ;;  %vm1917_vm0 = vcmp.ge.f32.partialorder %v1853_v52, 0.0 }
 0x29c   : > { %v2961_v13 = vpack.c.bf16 %v2043_v47, %v2042_v32  ;;  %v1980_v0 = vmul.f32 0.2, %v1852_v58  ;;  %v1981_v18 = vmul.f32 0.2, %v1853_v52  ;;  %vm1918_vm1 = vcmp.ge.f32.partialorder %v1854_v60, 0.0 }
 0x29d   : > { %vm1919_vm2 = vcmp.ge.f32.partialorder %v1855_v40, 0.0  ;;  %v1982_v19 = vmul.f32 0.2, %v1854_v60  ;;  %v1983_v8 = vmul.f32 0.2, %v1855_v40 }
 0x29e   : > { %3032 = vst [vmem:[%s4305_s4 + $0xe8] sm:$0xff] %v2961_v13   ;;  %v2044_v4 = vsel %vm1916_vm15, %v1852_v58, %v1980_v0  ;;  %v2045_v6 = vsel %vm1917_vm0, %v1853_v52, %v1981_v18 }
 0x29f   : > { %v2046_v36 = vsel %vm1918_vm1, %v1854_v60, %v1982_v19  ;;  %v2966_v27 = vpack.c.bf16 %v2045_v6, %v2044_v4  ;;  %v2047_v9 = vsel %vm1919_vm2, %v1855_v40, %v1983_v8 }
 0x2a0   : > { %v2971_v10 = vpack.c.bf16 %v2047_v9, %v2046_v36 }
 0x2a1   : > { %3033 = vst [vmem:[%s4305_s4 + $0xf0] sm:$0xff] %v2966_v27  }
 0x2a2   : > { %3034 = vst [vmem:[%s4305_s4 + $0xf8] sm:$0xff] %v2971_v10  }
 0x2a3 PF: > { %s14_s17 = sadd.s32 1, %s3108_s17   ;;  %s4306_s15 = smov %s3104_s16 }
 0x2a4   : > { %p11_p6 = scmp.ge.s32.totalorder %s14_s17, 4   ;;  %s4307_s16 = smov %s4309_s18 }
 0x2a6   :  { %13 = sbr.rel (!%p11_p6) target bundleno = 2 (0x2), region = 84 }

// kernel: discriminator_forward.7
= control target key start
LH: loop header
LB: loop body
LE: loop exit
PB: predicated region body
PF: predicated region fallthrough
CT: control target
= control target key end

     0   :  { %s1774_s15 = smov 0   ;;  %s1776_s16 = smov 0   ;;  %s2246_s0 = inlined_call_operand.vmem [shape: bf16[128,512], index: 0, kind: input, shape index: {}]   ;;  %s2247_s1 = inlined_call_operand.vmem [shape: bf16[512,128], index: 1, kind: input, shape index: {}]   ;;  %s2248_s2 = inlined_call_operand.vmem [shape: f32[1,128], index: 2, kind: input, shape index: {}]   ;;  %s2249_s3 = inlined_call_operand.vmem [shape: f32[1,128], index: 3, kind: input, shape index: {}]   ;;  %s2250_s4 = inlined_call_operand.vmem [shape: bf16[128,128], index: 4, kind: output, shape index: {}]  }
   0x1   :  { %s1778_s17 = smov 0  }
   0x2 LB: > { %s26_s18 = sadd.s32 1, %s1742_s16  ;;  %p1272_p0 = scmp.ge.s32.totalorder %s1746_s17, 1  ;;  %s1746_s17 = sphi %s1778_s17, %s14_s17   ;;  %s1742_s16 = sphi %s1776_s16, %s2252_s16   ;;  %s1738_s15 = sphi %s1774_s15, %s2251_s15  }
   0x3   : > { %p28_p1 = scmp.ge.s32.totalorder %s26_s18, 2  ;;  %p184_p2 = scmp.lt.s32.totalorder %s1746_s17, 3 }
   0x5   : > { %s2254_s18 = smov (%p28_p1, %s26_s18), 0  ;;  %p185_p3 = pnand %p1272_p0, %p184_p2 }
   0x6   : > { %p1273_p4 = scmp.ne.s32.totalorder (!%p185_p3), %s1738_s15, 0 }
   0x7   : > { %188 = sbr.rel (%p185_p3) target bundleno = 404 (0x194), region = 36 }
   0xc   : > { %233 = sbr.rel (%p1273_p4) target bundleno = 358 (0x166), region = 40 }
  0x11   : > { %v1574_v0 = vld [vmem:[%s2247_s1 + $0x38] sm:$0xff]  ;;  %v1573_v4 = vld [vmem:[%s2247_s1 + $0x30] sm:$0xff]  ;;  %v1572_v8 = vld [vmem:[%s2247_s1 + $0x28] sm:$0xff] }
  0x12   : > { %v1582_v1 = vld [vmem:[%s2247_s1 + $0x78] sm:$0xff]  ;;  %682 = vmatpush.bf16.msra.mxu0 %v1574_v0  ;;  %v1581_v5 = vld [vmem:[%s2247_s1 + $0x70] sm:$0xff]  ;;  %v1580_v9 = vld [vmem:[%s2247_s1 + $0x68] sm:$0xff] }
  0x13   : > { %v1590_v2 = vld [vmem:[%s2247_s1 + $0xb8] sm:$0xff]  ;;  %731 = vmatpush.bf16.msra.mxu1 %v1582_v1  ;;  %v1589_v6 = vld [vmem:[%s2247_s1 + $0xb0] sm:$0xff]  ;;  %v1588_v10 = vld [vmem:[%s2247_s1 + $0xa8] sm:$0xff] }
  0x14   : > { %v1598_v3 = vld [vmem:[%s2247_s1 + $0xf8] sm:$0xff]  ;;  %780 = vmatpush.bf16.msra.mxu2 %v1590_v2  ;;  %v1597_v7 = vld [vmem:[%s2247_s1 + $0xf0] sm:$0xff]  ;;  %v1596_v11 = vld [vmem:[%s2247_s1 + $0xe8] sm:$0xff] }
  0x15   : > { %829 = vmatpush.bf16.msra.mxu3 %v1598_v3  ;;  %v1571_v12 = vld [vmem:[%s2247_s1 + $0x20] sm:$0xff]  ;;  %v1570_v16 = vld [vmem:[%s2247_s1 + $0x18] sm:$0xff]  ;;  %v1569_v20 = vld [vmem:[%s2247_s1 + $0x10] sm:$0xff] }
  0x16   : > { %683 = vmatpush.bf16.msra.mxu0 %v1573_v4  ;;  %v1579_v13 = vld [vmem:[%s2247_s1 + $0x60] sm:$0xff]  ;;  %v1578_v17 = vld [vmem:[%s2247_s1 + $0x58] sm:$0xff]  ;;  %v1577_v21 = vld [vmem:[%s2247_s1 + $0x50] sm:$0xff] }
  0x17   : > { %732 = vmatpush.bf16.msra.mxu1 %v1581_v5  ;;  %v1587_v14 = vld [vmem:[%s2247_s1 + $0xa0] sm:$0xff]  ;;  %v1586_v18 = vld [vmem:[%s2247_s1 + $0x98] sm:$0xff]  ;;  %v1585_v22 = vld [vmem:[%s2247_s1 + $0x90] sm:$0xff] }
  0x18   : > { %781 = vmatpush.bf16.msra.mxu2 %v1589_v6  ;;  %v1595_v15 = vld [vmem:[%s2247_s1 + $0xe0] sm:$0xff]  ;;  %v1594_v19 = vld [vmem:[%s2247_s1 + $0xd8] sm:$0xff]  ;;  %v1593_v23 = vld [vmem:[%s2247_s1 + $0xd0] sm:$0xff] }
  0x19   : > { %830 = vmatpush.bf16.msra.mxu3 %v1597_v7  ;;  %v1568_v24 = vld [vmem:[%s2247_s1 + $0x8] sm:$0xff]  ;;  %v1567_v28 = vld [vmem:[%s2247_s1] sm:$0xff]  ;;  %v1537_v33 = vld [vmem:[%s2246_s0 + $0xc] sm:$0xf0] }
  0x1a   : > { %684 = vmatpush.bf16.msra.mxu0 %v1572_v8  ;;  %v1576_v25 = vld [vmem:[%s2247_s1 + $0x48] sm:$0xff]  ;;  %v1575_v29 = vld [vmem:[%s2247_s1 + $0x40] sm:$0xff]  ;;  %v1278_v35 = vld [vmem:[%s2246_s0 + $0x10] sm:$0xf0] }
  0x1b   : > { %733 = vmatpush.bf16.msra.mxu1 %v1580_v9  ;;  %v1584_v26 = vld [vmem:[%s2247_s1 + $0x88] sm:$0xff]  ;;  %v1583_v30 = vld [vmem:[%s2247_s1 + $0x80] sm:$0xff]  ;;  %v1538_v37 = vld [vmem:[%s2246_s0 + $0x14] sm:$0xf0] }
  0x1c   : > { %782 = vmatpush.bf16.msra.mxu2 %v1588_v10  ;;  %v1592_v27 = vld [vmem:[%s2247_s1 + $0xc8] sm:$0xff]  ;;  %v1591_v31 = vld [vmem:[%s2247_s1 + $0xc0] sm:$0xff]  ;;  %v1286_v39 = vld [vmem:[%s2246_s0 + $0x18] sm:$0xf0] }
  0x1d   : > { %831 = vmatpush.bf16.msra.mxu3 %v1596_v11  ;;  %v1276_v32 = vld [vmem:[%s2246_s0] sm:$0xf]  ;;  %v1535_v34 = vld [vmem:[%s2246_s0 + $0x4] sm:$0xf]  ;;  %v1284_v36 = vld [vmem:[%s2246_s0 + $0x8] sm:$0xf] }
  0x1e   : > { %685 = vmatpush.bf16.msra.mxu0 %v1571_v12  ;;  %v1536_v38 = vld [vmem:[%s2246_s0 + $0xc] sm:$0xf]  ;;  %v1277_v40 = vor.u32 %v1537_v33, %v1276_v32  ;;  %v1281_v41 = vor.u32 %v1535_v34, %v1278_v35  ;;  %v1285_v42 = vor.u32 %v1538_v37, %v1284_v36  ;;  %v1292_v44 = vld [vmem:[%s2246_s0 + $0x20] sm:$0xf]  ;;  %v1541_v45 = vld [vmem:[%s2246_s0 + $0x2c] sm:$0xf0] }
  0x1f   : > { %734 = vmatpush.bf16.msra.mxu1 %v1579_v13  ;;  %v1289_v43 = vor.u32 %v1536_v38, %v1286_v39  ;;  %v1539_v46 = vld [vmem:[%s2246_s0 + $0x24] sm:$0xf]  ;;  %v1294_v47 = vld [vmem:[%s2246_s0 + $0x30] sm:$0xf0]  ;;  %v1300_v48 = vld [vmem:[%s2246_s0 + $0x28] sm:$0xf]  ;;  %v1293_v52 = vor.u32 %v1541_v45, %v1292_v44 }
  0x20   : > { %783 = vmatpush.bf16.msra.mxu2 %v1587_v14  ;;  %v1542_v49 = vld [vmem:[%s2246_s0 + $0x34] sm:$0xf0]  ;;  %v1540_v50 = vld [vmem:[%s2246_s0 + $0x2c] sm:$0xf]  ;;  %v1302_v51 = vld [vmem:[%s2246_s0 + $0x38] sm:$0xf0]  ;;  %v1297_v53 = vor.u32 %v1539_v46, %v1294_v47 }
  0x21   : > { %832 = vmatpush.bf16.msra.mxu3 %v1595_v15  ;;  %v1301_v54 = vor.u32 %v1542_v49, %v1300_v48  ;;  %v1305_v55 = vor.u32 %v1540_v50, %v1302_v51  ;;  %v1308_v56 = vld [vmem:[%s2246_s0 + $0x40] sm:$0xf]  ;;  %v1545_v57 = vld [vmem:[%s2246_s0 + $0x4c] sm:$0xf0]  ;;  %v1543_v58 = vld [vmem:[%s2246_s0 + $0x44] sm:$0xf] }
  0x22   : > { %686 = vmatpush.bf16.msra.mxu0 %v1570_v16  ;;  %v1310_v59 = vld [vmem:[%s2246_s0 + $0x50] sm:$0xf0]  ;;  %v1316_v60 = vld [vmem:[%s2246_s0 + $0x48] sm:$0xf]  ;;  %v1546_v61 = vld [vmem:[%s2246_s0 + $0x54] sm:$0xf0]  ;;  %v1309_v0 = vor.u32 %v1545_v57, %v1308_v56 }
  0x23   : > { %735 = vmatpush.bf16.msra.mxu1 %v1578_v17  ;;  %v1544_v62 = vld [vmem:[%s2246_s0 + $0x4c] sm:$0xf]  ;;  %v1318_v63 = vld [vmem:[%s2246_s0 + $0x58] sm:$0xf0]  ;;  %v1313_v1 = vor.u32 %v1543_v58, %v1310_v59  ;;  %v1317_v2 = vor.u32 %v1546_v61, %v1316_v60  ;;  %v1324_v4 = vld [vmem:[%s2246_s0 + $0x60] sm:$0xf] }
  0x24   : > { %784 = vmatpush.bf16.msra.mxu2 %v1586_v18  ;;  %v1321_v3 = vor.u32 %v1544_v62, %v1318_v63  ;;  %v1549_v5 = vld [vmem:[%s2246_s0 + $0x6c] sm:$0xf0]  ;;  %v1547_v6 = vld [vmem:[%s2246_s0 + $0x64] sm:$0xf]  ;;  %v1326_v7 = vld [vmem:[%s2246_s0 + $0x70] sm:$0xf0] }
  0x25   : > { %833 = vmatpush.bf16.msra.mxu3 %v1594_v19  ;;  %v1332_v8 = vld [vmem:[%s2246_s0 + $0x68] sm:$0xf]  ;;  %v1550_v9 = vld [vmem:[%s2246_s0 + $0x74] sm:$0xf0]  ;;  %v1548_v10 = vld [vmem:[%s2246_s0 + $0x6c] sm:$0xf]  ;;  %v1325_v12 = vor.u32 %v1549_v5, %v1324_v4  ;;  %v1329_v13 = vor.u32 %v1547_v6, %v1326_v7 }
  0x26   : > { %687 = vmatpush.bf16.msra.mxu0 %v1569_v20  ;;  %v1334_v11 = vld [vmem:[%s2246_s0 + $0x78] sm:$0xf0]  ;;  %v1333_v14 = vor.u32 %v1550_v9, %v1332_v8  ;;  %v1340_v16 = vld [vmem:[%s2246_s0 + $0x80] sm:$0xf]  ;;  %v1553_v17 = vld [vmem:[%s2246_s0 + $0x8c] sm:$0xf0] }
  0x27   : > { %736 = vmatpush.bf16.msra.mxu1 %v1577_v21  ;;  %v1337_v15 = vor.u32 %v1548_v10, %v1334_v11  ;;  %v1551_v18 = vld [vmem:[%s2246_s0 + $0x84] sm:$0xf]  ;;  %v1342_v19 = vld [vmem:[%s2246_s0 + $0x90] sm:$0xf0]  ;;  %v1348_v20 = vld [vmem:[%s2246_s0 + $0x88] sm:$0xf] }
  0x28   : > { %785 = vmatpush.bf16.msra.mxu2 %v1585_v22  ;;  %v1554_v21 = vld [vmem:[%s2246_s0 + $0x94] sm:$0xf0]  ;;  %v1552_v22 = vld [vmem:[%s2246_s0 + $0x8c] sm:$0xf]  ;;  %v1364_v32 = vld [vmem:[%s2246_s0 + $0xa8] sm:$0xf] }
  0x29   : > { %834 = vmatpush.bf16.msra.mxu3 %v1593_v23  ;;  %v1350_v23 = vld [vmem:[%s2246_s0 + $0x98] sm:$0xf0]  ;;  %v1558_v33 = vld [vmem:[%s2246_s0 + $0xb4] sm:$0xf0]  ;;  %v1556_v34 = vld [vmem:[%s2246_s0 + $0xac] sm:$0xf] }
  0x2a   : > { %688 = vmatpush.bf16.msra.mxu0 %v1568_v24  ;;  %v1341_v24 = vor.u32 %v1553_v17, %v1340_v16  ;;  %v1366_v35 = vld [vmem:[%s2246_s0 + $0xb8] sm:$0xf0]  ;;  %v1365_v38 = vor.u32 %v1558_v33, %v1364_v32  ;;  %v1380_v44 = vld [vmem:[%s2246_s0 + $0xc8] sm:$0xf]  ;;  %v1562_v45 = vld [vmem:[%s2246_s0 + $0xd4] sm:$0xf0] }
  0x2b   : > { %737 = vmatpush.bf16.msra.mxu1 %v1576_v25  ;;  %v1345_v25 = vor.u32 %v1551_v18, %v1342_v19  ;;  %v1369_v39 = vor.u32 %v1556_v34, %v1366_v35  ;;  %v1560_v46 = vld [vmem:[%s2246_s0 + $0xcc] sm:$0xf]  ;;  %v1382_v47 = vld [vmem:[%s2246_s0 + $0xd8] sm:$0xf0]  ;;  %v1381_v50 = vor.u32 %v1562_v45, %v1380_v44  ;;  %v1396_v56 = vld [vmem:[%s2246_s0 + $0xe8] sm:$0xf] }
  0x2c   : > { %786 = vmatpush.bf16.msra.mxu2 %v1584_v26  ;;  %v1349_v26 = vor.u32 %v1554_v21, %v1348_v20  ;;  %v1385_v51 = vor.u32 %v1560_v46, %v1382_v47  ;;  %v1566_v57 = vld [vmem:[%s2246_s0 + $0xf4] sm:$0xf0]  ;;  %v1564_v58 = vld [vmem:[%s2246_s0 + $0xec] sm:$0xf]  ;;  %v1398_v59 = vld [vmem:[%s2246_s0 + $0xf8] sm:$0xf0] }
  0x2d   : > { %835 = vmatpush.bf16.msra.mxu3 %v1592_v27  ;;  %v1353_v27 = vor.u32 %v1552_v22, %v1350_v23  ;;  %v1397_v62 = vor.u32 %v1566_v57, %v1396_v56  ;;  %v1401_v63 = vor.u32 %v1564_v58, %v1398_v59 }
  0x2e   : > { %689 = vmatpush.bf16.msra.mxu0 %v1567_v28  ;;  %v1356_v28 = vld [vmem:[%s2246_s0 + $0xa0] sm:$0xf] }
  0x2f   : > { %738 = vmatpush.bf16.msra.mxu1 %v1575_v29  ;;  %v1557_v29 = vld [vmem:[%s2246_s0 + $0xac] sm:$0xf0] }
  0x30   : > { %787 = vmatpush.bf16.msra.mxu2 %v1583_v30  ;;  %v1555_v30 = vld [vmem:[%s2246_s0 + $0xa4] sm:$0xf]  ;;  %v1357_v36 = vor.u32 %v1557_v29, %v1356_v28 }
  0x31   : > { %836 = vmatpush.bf16.msra.mxu3 %v1591_v31  ;;  %690 = vmatmul.bf16.vlgmr.msra.gmra.mxu0 %v1277_v40  ;;  %v1358_v31 = vld [vmem:[%s2246_s0 + $0xb0] sm:$0xf0]  ;;  %v1372_v40 = vld [vmem:[%s2246_s0 + $0xc0] sm:$0xf] }
  0x32   : > { %739 = vmatmul.bf16.vlgmr.msra.gmra.mxu1 %v1281_v41  ;;  %v1361_v37 = vor.u32 %v1555_v30, %v1358_v31  ;;  %v1561_v41 = vld [vmem:[%s2246_s0 + $0xcc] sm:$0xf0] }
  0x33   : > { %788 = vmatmul.bf16.vlgmr.msra.gmra.mxu2 %v1285_v42  ;;  %v1559_v42 = vld [vmem:[%s2246_s0 + $0xc4] sm:$0xf]  ;;  %v1373_v48 = vor.u32 %v1561_v41, %v1372_v40 }
  0x34   : > { %837 = vmatmul.bf16.vlgmr.msra.gmra.mxu3 %v1289_v43  ;;  %v1374_v43 = vld [vmem:[%s2246_s0 + $0xd0] sm:$0xf0] }
  0x35   : > { %v1377_v49 = vor.u32 %v1559_v42, %v1374_v43 }
  0x41   : > { %695 = vmatmul.bf16.gmra.mxu0 %v1293_v52  ;;  %v1388_v52 = vld [vmem:[%s2246_s0 + $0xe0] sm:$0xf] }
  0x42   : > { %744 = vmatmul.bf16.gmra.mxu1 %v1297_v53  ;;  %v1565_v53 = vld [vmem:[%s2246_s0 + $0xec] sm:$0xf0] }
  0x43   : > { %793 = vmatmul.bf16.gmra.mxu2 %v1301_v54  ;;  %v1563_v54 = vld [vmem:[%s2246_s0 + $0xe4] sm:$0xf]  ;;  %v1389_v60 = vor.u32 %v1565_v53, %v1388_v52 }
  0x44   : > { %842 = vmatmul.bf16.gmra.mxu3 %v1305_v55  ;;  %v1390_v55 = vld [vmem:[%s2246_s0 + $0xf0] sm:$0xf0] }
  0x45   : > { %v1393_v61 = vor.u32 %v1563_v54, %v1390_v55 }
  0x51   : > { %700 = vmatmul.bf16.gmra.mxu0 %v1309_v0 }
  0x52   : > { %749 = vmatmul.bf16.gmra.mxu1 %v1313_v1 }
  0x53   : > { %798 = vmatmul.bf16.gmra.mxu2 %v1317_v2 }
  0x54   : > { %847 = vmatmul.bf16.gmra.mxu3 %v1321_v3 }
  0x61   : > { %705 = vmatmul.bf16.gmra.mxu0 %v1325_v12 }
  0x62   : > { %754 = vmatmul.bf16.gmra.mxu1 %v1329_v13 }
  0x63   : > { %803 = vmatmul.bf16.gmra.mxu2 %v1333_v14 }
  0x64   : > { %852 = vmatmul.bf16.gmra.mxu3 %v1337_v15 }
  0x71   : > { %710 = vmatmul.bf16.gmra.mxu0 %v1341_v24 }
  0x72   : > { %759 = vmatmul.bf16.gmra.mxu1 %v1345_v25 }
  0x73   : > { %808 = vmatmul.bf16.gmra.mxu2 %v1349_v26 }
  0x74   : > { %857 = vmatmul.bf16.gmra.mxu3 %v1353_v27 }
  0x81   : > { %715 = vmatmul.bf16.gmra.mxu0 %v1357_v36 }
  0x82   : > { %764 = vmatmul.bf16.gmra.mxu1 %v1361_v37 }
  0x83   : > { %813 = vmatmul.bf16.gmra.mxu2 %v1365_v38 }
  0x84   : > { %862 = vmatmul.bf16.gmra.mxu3 %v1369_v39 }
  0x91   : > { %720 = vmatmul.bf16.gmra.mxu0 %v1373_v48 }
  0x92   : > { %769 = vmatmul.bf16.gmra.mxu1 %v1377_v49 }
  0x93   : > { %818 = vmatmul.bf16.gmra.mxu2 %v1381_v50 }
  0x94   : > { %867 = vmatmul.bf16.gmra.mxu3 %v1385_v51 }
  0xa1   : > { %725 = vmatmul.bf16.gmra.mxu0 %v1389_v60 }
  0xa2   : > { %774 = vmatmul.bf16.gmra.mxu1 %v1393_v61 }
  0xa3   : > { %823 = vmatmul.bf16.gmra.mxu2 %v1397_v62 }
  0xa4   : > { %872 = vmatmul.bf16.gmra.mxu3 %v1401_v63 }
  0xae   : > { %v691_v0 = vpop.f32.mrf.mxu0 }
  0xaf   : > { %v740_v1 = vpop.f32.mrf.mxu1 }
  0xb0   : > { %v741_v2 = vadd.f32 %v740_v1, %v691_v0 }
  0xb6   : > { %v789_v3 = vpop.f32.mrf.mxu2  ;;  %v693_v6 = vpop.f32.mrf.mxu0 }
  0xb7   : > { %v838_v4 = vpop.f32.mrf.mxu3  ;;  %v790_v5 = vadd.f32 %v789_v3, %v741_v2  ;;  %v742_v7 = vpop.f32.mrf.mxu1 }
  0xb8   : > { %v743_v9 = vadd.f32 %v742_v7, %v693_v6 }
  0xb9   : > { %v839_v8 = vadd.f32 %v838_v4, %v790_v5 }
  0xbb   : > { %880 = vst [vmem:[#allocation2 + $0x30] sm:$0xff] %v839_v8  ;;  %v959_v16 = vmul.f32 %v839_v8, %v839_v8 }
  0xbe   : > { %v791_v10 = vpop.f32.mrf.mxu2  ;;  %v696_v13 = vpop.f32.mrf.mxu0 }
  0xbf   : > { %v840_v11 = vpop.f32.mrf.mxu3  ;;  %v792_v12 = vadd.f32 %v791_v10, %v743_v9  ;;  %v745_v14 = vpop.f32.mrf.mxu1 }
  0xc0   : > { %v746_v20 = vadd.f32 %v745_v14, %v696_v13 }
  0xc1   : > { %v841_v15 = vadd.f32 %v840_v11, %v792_v12 }
  0xc3   : > { %881 = vst [vmem:[#allocation2] sm:$0xff] %v841_v15  ;;  %v1602_v17 = vpack.c.bf16 %v841_v15, %v839_v8  ;;  %v935_v18 = vadd.f32 %v841_v15, %v839_v8  ;;  %v960_v19 = vmul.f32 %v841_v15, %v841_v15 }
  0xc5   : > { %1603 = vst [vmem:[%s2250_s4] sm:$0xff] %v1602_v17   ;;  %v975_v21 = vadd.f32 %v960_v19, %v959_v16 }
  0xc6   : > { %v794_v22 = vpop.f32.mrf.mxu2  ;;  %v698_v25 = vpop.f32.mrf.mxu0 }
  0xc7   : > { %v843_v23 = vpop.f32.mrf.mxu3  ;;  %v795_v24 = vadd.f32 %v794_v22, %v746_v20  ;;  %v747_v26 = vpop.f32.mrf.mxu1 }
  0xc8   : > { %v748_v31 = vadd.f32 %v747_v26, %v698_v25 }
  0xc9   : > { %v844_v27 = vadd.f32 %v843_v23, %v795_v24 }
  0xcb   : > { %882 = vst [vmem:[#allocation2 + $0x58] sm:$0xff] %v844_v27  ;;  %v936_v28 = vadd.f32 %v935_v18, %v844_v27  ;;  %v961_v29 = vmul.f32 %v844_v27, %v844_v27 }
  0xcd   : > { %v976_v30 = vadd.f32 %v975_v21, %v961_v29 }
  0xce   : > { %v796_v32 = vpop.f32.mrf.mxu2  ;;  %v701_v35 = vpop.f32.mrf.mxu0 }
  0xcf   : > { %v845_v33 = vpop.f32.mrf.mxu3  ;;  %v797_v34 = vadd.f32 %v796_v32, %v748_v31  ;;  %v750_v36 = vpop.f32.mrf.mxu1 }
  0xd0   : > { %v751_v41 = vadd.f32 %v750_v36, %v701_v35 }
  0xd1   : > { %v846_v37 = vadd.f32 %v845_v33, %v797_v34 }
  0xd3   : > { %883 = vst [vmem:[#allocation2 + $0x18] sm:$0xff] %v846_v37  ;;  %v1607_v38 = vpack.c.bf16 %v846_v37, %v844_v27  ;;  %v937_v39 = vadd.f32 %v936_v28, %v846_v37  ;;  %v962_v40 = vmul.f32 %v846_v37, %v846_v37 }
  0xd5   : > { %1679 = vst [vmem:[%s2250_s4 + $0x8] sm:$0xff] %v1607_v38   ;;  %v977_v42 = vadd.f32 %v976_v30, %v962_v40 }
  0xd6   : > { %v799_v43 = vpop.f32.mrf.mxu2  ;;  %v703_v46 = vpop.f32.mrf.mxu0 }
  0xd7   : > { %v848_v44 = vpop.f32.mrf.mxu3  ;;  %v800_v45 = vadd.f32 %v799_v43, %v751_v41  ;;  %v752_v47 = vpop.f32.mrf.mxu1 }
  0xd8   : > { %v753_v52 = vadd.f32 %v752_v47, %v703_v46 }
  0xd9   : > { %v849_v48 = vadd.f32 %v848_v44, %v800_v45  ;;  %v1748_v44 = vmov 0.0  }
  0xda   : > { %932 = vst [vmem:[#allocation3] sm:$0x1] %v1748_v44 }
  0xdb   : > { %884 = vst [vmem:[#allocation2 + $0x50] sm:$0xff] %v849_v48  ;;  %v2089_v49 = vadd.f32 %v937_v39, %v849_v48  ;;  %v963_v50 = vmul.f32 %v849_v48, %v849_v48 }
  0xdc   : > { %933 = vst [vmem:[#allocation4] sm:$0x1] %v1748_v44 }
  0xdd   : > { %v2091_v51 = vadd.f32 %v977_v42, %v963_v50 }
  0xde   : > { %v801_v53 = vpop.f32.mrf.mxu2  ;;  %v706_v56 = vpop.f32.mrf.mxu0 }
  0xdf   : > { %v850_v54 = vpop.f32.mrf.mxu3  ;;  %v802_v55 = vadd.f32 %v801_v53, %v753_v52  ;;  %v755_v57 = vpop.f32.mrf.mxu1 }
  0xe0   : > { %v756_v60 = vadd.f32 %v755_v57, %v706_v56 }
  0xe1   : > { %v2093_v58 = vadd.f32 %v850_v54, %v802_v55 }
  0xe3   : > { %885 = vst [vmem:[#allocation2 + $0x68] sm:$0xff] %v2093_v58  ;;  %v1612_v59 = vpack.c.bf16 %v2093_v58, %v849_v48  ;;  %v964_v50 = vmul.f32 %v2093_v58, %v2093_v58  ;;  %v939_v56 = vadd.f32 %v2089_v49, %v2093_v58 }
  0xe5   : > { %1680 = vst [vmem:[%s2250_s4 + $0x10] sm:$0xff] %v1612_v59   ;;  %v979_v59 = vadd.f32 %v2091_v51, %v964_v50 }
  0xe6   : > { %v804_v61 = vpop.f32.mrf.mxu2  ;;  %v708_v0 = vpop.f32.mrf.mxu0 }
  0xe7   : > { %v853_v62 = vpop.f32.mrf.mxu3  ;;  %v805_v63 = vadd.f32 %v804_v61, %v756_v60  ;;  %v757_v1 = vpop.f32.mrf.mxu1 }
  0xe8   : > { %v758_v3 = vadd.f32 %v757_v1, %v708_v0 }
  0xe9   : > { %v2100_v2 = vadd.f32 %v853_v62, %v805_v63 }
  0xeb   : > { %886 = vst [vmem:[#allocation2 + $0x8] sm:$0xff] %v2100_v2  ;;  %v965_v53 = vmul.f32 %v2100_v2, %v2100_v2  ;;  %v940_v62 = vadd.f32 %v939_v56, %v2100_v2 }
  0xed   : > { %v980_v1 = vadd.f32 %v979_v59, %v965_v53  ;;  %v958_v53 = vld [vmem:[#allocation4] sm:$0x1] }
  0xee   : > { %v806_v4 = vpop.f32.mrf.mxu2  ;;  %v711_v7 = vpop.f32.mrf.mxu0 }
  0xef   : > { %v855_v5 = vpop.f32.mrf.mxu3  ;;  %v807_v6 = vadd.f32 %v806_v4, %v758_v3  ;;  %v760_v8 = vpop.f32.mrf.mxu1 }
  0xf0   : > { %v761_v11 = vadd.f32 %v760_v8, %v711_v7 }
  0xf1   : > { %v2103_v9 = vadd.f32 %v855_v5, %v807_v6 }
  0xf3   : > { %887 = vst [vmem:[#allocation2 + $0x48] sm:$0xff] %v2103_v9  ;;  %v1617_v10 = vpack.c.bf16 %v2103_v9, %v2100_v2  ;;  %v966_v63 = vmul.f32 %v2103_v9, %v2103_v9  ;;  %v941_v3 = vadd.f32 %v940_v62, %v2103_v9 }
  0xf5   : > { %1681 = vst [vmem:[%s2250_s4 + $0x18] sm:$0xff] %v1617_v10   ;;  %v981_v7 = vadd.f32 %v980_v1, %v966_v63 }
  0xf6   : > { %v809_v12 = vpop.f32.mrf.mxu2  ;;  %v713_v15 = vpop.f32.mrf.mxu0 }
  0xf7   : > { %v858_v13 = vpop.f32.mrf.mxu3  ;;  %v810_v14 = vadd.f32 %v809_v12, %v761_v11  ;;  %v762_v16 = vpop.f32.mrf.mxu1 }
  0xf8   : > { %v763_v18 = vadd.f32 %v762_v16, %v713_v15 }
  0xf9   : > { %v859_v17 = vadd.f32 %v858_v13, %v810_v14 }
  0xfb   : > { %888 = vst [vmem:[#allocation2 + $0x40] sm:$0xff] %v859_v17  ;;  %v967_v4 = vmul.f32 %v859_v17, %v859_v17  ;;  %v942_v49 = vadd.f32 %v941_v3, %v859_v17 }
  0xfd   : > { %v982_v8 = vadd.f32 %v981_v7, %v967_v4 }
  0xfe   : > { %v811_v19 = vpop.f32.mrf.mxu2  ;;  %v716_v22 = vpop.f32.mrf.mxu0 }
  0xff   : > { %v860_v20 = vpop.f32.mrf.mxu3  ;;  %v812_v21 = vadd.f32 %v811_v19, %v763_v18  ;;  %v765_v23 = vpop.f32.mrf.mxu1 }
 0x100   : > { %v766_v26 = vadd.f32 %v765_v23, %v716_v22 }
 0x101   : > { %v861_v24 = vadd.f32 %v860_v20, %v812_v21 }
 0x103   : > { %889 = vst [vmem:[#allocation2 + $0x20] sm:$0xff] %v861_v24  ;;  %v1622_v25 = vpack.c.bf16 %v861_v24, %v859_v17  ;;  %v968_v58 = vmul.f32 %v861_v24, %v861_v24  ;;  %v943_v10 = vadd.f32 %v942_v49, %v861_v24 }
 0x105   : > { %1682 = vst [vmem:[%s2250_s4 + $0x20] sm:$0xff] %v1622_v25   ;;  %v983_v13 = vadd.f32 %v982_v8, %v968_v58 }
 0x106   : > { %v814_v27 = vpop.f32.mrf.mxu2  ;;  %v718_v30 = vpop.f32.mrf.mxu0 }
 0x107   : > { %v863_v28 = vpop.f32.mrf.mxu3  ;;  %v815_v29 = vadd.f32 %v814_v27, %v766_v26  ;;  %v767_v31 = vpop.f32.mrf.mxu1 }
 0x108   : > { %v768_v33 = vadd.f32 %v767_v31, %v718_v30 }
 0x109   : > { %v864_v32 = vadd.f32 %v863_v28, %v815_v29 }
 0x10b   : > { %890 = vst [vmem:[#allocation2 + $0x10] sm:$0xff] %v864_v32  ;;  %v969_v11 = vmul.f32 %v864_v32, %v864_v32  ;;  %v944_v14 = vadd.f32 %v943_v10, %v864_v32 }
 0x10d   : > { %v984_v19 = vadd.f32 %v983_v13, %v969_v11 }
 0x10e   : > { %v816_v34 = vpop.f32.mrf.mxu2  ;;  %v721_v37 = vpop.f32.mrf.mxu0 }
 0x10f   : > { %v865_v35 = vpop.f32.mrf.mxu3  ;;  %v817_v36 = vadd.f32 %v816_v34, %v768_v33  ;;  %v770_v38 = vpop.f32.mrf.mxu1 }
 0x110   : > { %v771_v41 = vadd.f32 %v770_v38, %v721_v37 }
 0x111   : > { %v866_v39 = vadd.f32 %v865_v35, %v817_v36 }
 0x113   : > { %891 = vst [vmem:[#allocation2 + $0x38] sm:$0xff] %v866_v39  ;;  %v1627_v40 = vpack.c.bf16 %v866_v39, %v864_v32  ;;  %v970_v9 = vmul.f32 %v866_v39, %v866_v39  ;;  %v945_v20 = vadd.f32 %v944_v14, %v866_v39 }
 0x115   : > { %1683 = vst [vmem:[%s2250_s4 + $0x28] sm:$0xff] %v1627_v40   ;;  %v985_v21 = vadd.f32 %v984_v19, %v970_v9 }
 0x116   : > { %v819_v42 = vpop.f32.mrf.mxu2  ;;  %v723_v46 = vpop.f32.mrf.mxu0 }
 0x117   : > { %v868_v43 = vpop.f32.mrf.mxu3  ;;  %v820_v45 = vadd.f32 %v819_v42, %v771_v41  ;;  %v772_v47 = vpop.f32.mrf.mxu1 }
 0x118   : > { %v773_v52 = vadd.f32 %v772_v47, %v723_v46 }
 0x119   : > { %v869_v48 = vadd.f32 %v868_v43, %v820_v45 }
 0x11b   : > { %892 = vst [vmem:[#allocation2 + $0x60] sm:$0xff] %v869_v48  ;;  %v971_v17 = vmul.f32 %v869_v48, %v869_v48  ;;  %v946_v22 = vadd.f32 %v945_v20, %v869_v48 }
 0x11d   : > { %v986_v27 = vadd.f32 %v985_v21, %v971_v17 }
 0x11e   : > { %v821_v54 = vpop.f32.mrf.mxu2  ;;  %v726_v60 = vpop.f32.mrf.mxu0 }
 0x11f   : > { %v870_v55 = vpop.f32.mrf.mxu3  ;;  %v822_v57 = vadd.f32 %v821_v54, %v773_v52  ;;  %v775_v61 = vpop.f32.mrf.mxu1 }
 0x120   : > { %v776_v6 = vadd.f32 %v775_v61, %v726_v60 }
 0x121   : > { %v871_v0 = vadd.f32 %v870_v55, %v822_v57 }
 0x123   : > { %893 = vst [vmem:[#allocation2 + $0x70] sm:$0xff] %v871_v0  ;;  %v1632_v5 = vpack.c.bf16 %v871_v0, %v869_v48  ;;  %v972_v23 = vmul.f32 %v871_v0, %v871_v0  ;;  %v947_v28 = vadd.f32 %v946_v22, %v871_v0  ;;  %v934_v48 = vld [vmem:[#allocation3] sm:$0x1] }
 0x125   : > { %1684 = vst [vmem:[%s2250_s4 + $0x30] sm:$0xff] %v1632_v5   ;;  %v987_v31 = vadd.f32 %v986_v27, %v972_v23 }
 0x126   : > { %v824_v51 = vpop.f32.mrf.mxu2  ;;  %v728_v16 = vpop.f32.mrf.mxu0 }
 0x127   : > { %v873_v2 = vpop.f32.mrf.mxu3  ;;  %v825_v12 = vadd.f32 %v824_v51, %v776_v6  ;;  %v777_v18 = vpop.f32.mrf.mxu1 }
 0x128   : > { %v778_v25 = vadd.f32 %v777_v18, %v728_v16 }
 0x129   : > { %v874_v15 = vadd.f32 %v873_v2, %v825_v12 }
 0x12b   : > { %894 = vst [vmem:[#allocation2 + $0x78] sm:$0xff] %v874_v15  ;;  %v973_v24 = vmul.f32 %v874_v15, %v874_v15  ;;  %v948_v32 = vadd.f32 %v947_v28, %v874_v15 }
 0x12d   : > { %v988_v34 = vadd.f32 %v987_v31, %v973_v24 }
 0x12e   : > { %v826_v26 = vpop.f32.mrf.mxu2 }
 0x12f   : > { %v827_v29 = vadd.f32 %v826_v26, %v778_v25  ;;  %v875_v30 = vpop.f32.mrf.mxu3 }
 0x131   : > { %v876_v33 = vadd.f32 %v875_v30, %v827_v29 }
 0x133   : > { %895 = vst [vmem:[#allocation2 + $0x28] sm:$0xff] %v876_v33  ;;  %v1637_v35 = vpack.c.bf16 %v876_v33, %v874_v15  ;;  %v949_v36 = vadd.f32 %v948_v32, %v876_v33  ;;  %v974_v37 = vmul.f32 %v876_v33, %v876_v33 }
 0x135   : > { %1685 = vst [vmem:[%s2250_s4 + $0x38] sm:$0xff] %v1637_v35   ;;  %v950_v38 = vrot.slane %v949_v36, 4  ;;  %v989_v39 = vadd.f32 %v988_v34, %v974_v37 }
 0x137   : > { %v951_v40 = vadd.f32 %v950_v38, %v949_v36  ;;  %v990_v41 = vrot.slane %v989_v39, 4 }
 0x139   : > { %v952_v42 = vrot.slane %v951_v40, 2  ;;  %v991_v43 = vadd.f32 %v990_v41, %v989_v39 }
 0x13b   : > { %v953_v44 = vadd.f32 %v952_v42, %v951_v40  ;;  %v992_v45 = vrot.slane %v991_v43, 2 }
 0x13d   : > { %v954_v46 = vrot.slane %v953_v44, 1  ;;  %v993_v47 = vadd.f32 %v992_v45, %v991_v43 }
 0x13f   : > { %v955_v50 = vadd.f32 %v954_v46, %v953_v44  ;;  %v994_v52 = vrot.slane %v993_v47, 1 }
 0x141   : > { %v956_v54 = vadd.f32 %v955_v50, %v934_v48  ;;  %v995_v55 = vadd.f32 %v994_v52, %v993_v47 }
 0x143   : > { %957 = vst [vmem:[#allocation3] sm:$0x1] %v956_v54  ;;  %v996_v56 = vadd.f32 %v995_v55, %v958_v53 }
 0x145   : > { %997 = vst [vmem:[#allocation4] sm:$0x1] %v996_v56 }
 0x14a   : > { %v1001_v57 = vld [vmem:[#allocation3] sm:$0x1] }
 0x14b   : > { %v1002_v59 = vmul.f32 0.0078125, %v1001_v57 }
 0x14c   : > { %v1003_v60 = vld [vmem:[#allocation4] sm:$0x1] }
 0x14d   : > { %v1004_v61 = vmul.f32 0.0078125, %v1003_v60  ;;  %v1005_v62 = vmul.f32 %v1002_v59, %v1002_v59  ;;  %1007 = vst [vmem:[#allocation3] sm:$0x1] %v1002_v59 }
 0x14f   : > { %v1006_v63 = vsub.f32 %v1004_v61, %v1005_v62 }
 0x151   : > { %v1008_v0 = vadd.f32 1e-05, %v1006_v63 }
 0x153   : > { %1718 = vrsqrt.f32 %v1008_v0  ;;  %vm1015_vm1 = vweird.f32 %v1008_v0 }
 0x159   : > { %v1719_v1 = vpop.eup %1718 }
 0x15a   : > { %v1010_v3 = vmul.f32 %v1719_v1, %v1008_v0  ;;  %vm1016_vm0 = vweird.f32 %v1719_v1 }
 0x15b   : > { %vm1017_vm2 = vmor %vm1015_vm1, %vm1016_vm0 }
 0x15c   : > { %v1011_v4 = vmul.f32 %v1719_v1, %v1010_v3 }
 0x15e   : > { %v1012_v5 = vmul.f32 0.5, %v1011_v4 }
 0x160   : > { %v1013_v6 = vsub.f32 1.5, %v1012_v5 }
 0x162   : > { %v1014_v7 = vmul.f32 %v1719_v1, %v1013_v6 }
 0x164   : > { %v1018_v49 = vsel %vm1017_vm2, %v1719_v1, %v1014_v7 }
 0x165   : > { %1019 = vst [vmem:[#allocation4] sm:$0x1] %v1018_v49 }
 0x166 PF: > { %p1530_p5 = scmp.ne.s32.totalorder %s1738_s15, 1 }
 0x168   : > { %1023 = sbr.rel (%p1530_p5) target bundleno = 404 (0x194), region = 52 }
 0x16d   : > { %v1026_v58 = vld [vmem:[#allocation2 + $0x30] sm:$0xff]  ;;  %v1027_v51 = vld [vmem:[#allocation2] sm:$0xff]  ;;  %v1028_v13 = vld [vmem:[#allocation2 + $0x58] sm:$0xff] }
 0x16e   : > { %v2135_v2 = vld [vmem:[#allocation3] ss:$0 sm:$0xff]  ;;  %v2137_v8 = vld [vmem:[#allocation4] ss:$0 sm:$0xff]  ;;  %v1029_v14 = vld [vmem:[#allocation2 + $0x18] sm:$0xff] }
 0x16f   : > { %v1046_v10 = vsub.f32 %v1026_v58, %v2135_v2  ;;  %v1047_v11 = vsub.f32 %v1027_v51, %v2135_v2  ;;  %v2144_v12 = vld [vmem:[%s2248_s2] ss:$0 sm:$0xff]  ;;  %v1048_v9 = vsub.f32 %v1028_v13, %v2135_v2  ;;  %v1049_v15 = vsub.f32 %v1029_v14, %v2135_v2  ;;  %v1030_v16 = vld [vmem:[#allocation2 + $0x50] sm:$0xff]  ;;  %v1031_v18 = vld [vmem:[#allocation2 + $0x68] sm:$0xff] }
 0x170   : > { %v1032_v19 = vld [vmem:[#allocation2 + $0x8] sm:$0xff]  ;;  %v2153_v21 = vld [vmem:[%s2249_s3] ss:$0 sm:$0xff]  ;;  %v1050_v22 = vsub.f32 %v1030_v16, %v2135_v2  ;;  %v1051_v23 = vsub.f32 %v1031_v18, %v2135_v2  ;;  %v1036_v62 = vld [vmem:[#allocation2 + $0x10] sm:$0xff] }
 0x171   : > { %v1066_v20 = vmul.f32 %v2137_v8, %v1046_v10  ;;  %v1067_v17 = vmul.f32 %v2137_v8, %v1047_v11  ;;  %v1033_v25 = vld [vmem:[#allocation2 + $0x48] sm:$0xff]  ;;  %v1068_v26 = vmul.f32 %v2137_v8, %v1048_v9  ;;  %v1069_v27 = vmul.f32 %v2137_v8, %v1049_v15  ;;  %v1034_v60 = vld [vmem:[#allocation2 + $0x40] sm:$0xff]  ;;  %v1037_v5 = vld [vmem:[#allocation2 + $0x38] sm:$0xff] }
 0x172   : > { %v1052_v28 = vsub.f32 %v1032_v19, %v2135_v2  ;;  %v1053_v24 = vsub.f32 %v1033_v25, %v2135_v2  ;;  %v1070_v31 = vmul.f32 %v2137_v8, %v1050_v22  ;;  %v1071_v32 = vmul.f32 %v2137_v8, %v1051_v23  ;;  %v1035_v61 = vld [vmem:[#allocation2 + $0x20] sm:$0xff]  ;;  %v1039_v10 = vld [vmem:[#allocation2 + $0x70] sm:$0xff]  ;;  %v1040_v19 = vld [vmem:[#allocation2 + $0x78] sm:$0xff] }
 0x173   : > { %v1086_v29 = vmul.f32 %v2144_v12, %v1066_v20  ;;  %v1087_v30 = vmul.f32 %v2144_v12, %v1067_v17  ;;  %v1088_v33 = vmul.f32 %v2144_v12, %v1068_v26  ;;  %v1089_v34 = vmul.f32 %v2144_v12, %v1069_v27  ;;  %v1038_v51 = vld [vmem:[#allocation2 + $0x60] sm:$0xff]  ;;  %v1041_v25 = vld [vmem:[#allocation2 + $0x28] sm:$0xff] }
 0x174   : > { %v1072_v35 = vmul.f32 %v2137_v8, %v1052_v28  ;;  %v1073_v36 = vmul.f32 %v2137_v8, %v1053_v24  ;;  %v1090_v39 = vmul.f32 %v2144_v12, %v1070_v31  ;;  %v1091_v40 = vmul.f32 %v2144_v12, %v1071_v32 }
 0x175   : > { %v1106_v37 = vadd.f32 %v2153_v21, %v1086_v29  ;;  %v1107_v38 = vadd.f32 %v2153_v21, %v1087_v30  ;;  %v1108_v41 = vadd.f32 %v2153_v21, %v1088_v33  ;;  %v1109_v42 = vadd.f32 %v2153_v21, %v1089_v34 }
 0x176   : > { %v1092_v43 = vmul.f32 %v2144_v12, %v1072_v35  ;;  %v1093_v44 = vmul.f32 %v2144_v12, %v1073_v36  ;;  %v1110_v53 = vadd.f32 %v2153_v21, %v1090_v39  ;;  %v1111_v54 = vadd.f32 %v2153_v21, %v1091_v40 }
 0x177   : > { %vm1122_vm3 = vcmp.ge.f32.partialorder %v1106_v37, 0.0  ;;  %vm1123_vm4 = vcmp.ge.f32.partialorder %v1107_v38, 0.0  ;;  %v1138_v45 = vmul.f32 0.2, %v1106_v37  ;;  %v1139_v46 = vmul.f32 0.2, %v1107_v38 }
 0x178   : > { %vm1124_vm5 = vcmp.ge.f32.partialorder %v1108_v41, 0.0  ;;  %vm1125_vm6 = vcmp.ge.f32.partialorder %v1109_v42, 0.0  ;;  %v1140_v47 = vmul.f32 0.2, %v1108_v41  ;;  %v1141_v48 = vmul.f32 0.2, %v1109_v42 }
 0x179   : > { %v1154_v50 = vsel %vm1122_vm3, %v1106_v37, %v1138_v45  ;;  %v1155_v52 = vsel %vm1123_vm4, %v1107_v38, %v1139_v46  ;;  %v1112_v59 = vadd.f32 %v2153_v21, %v1092_v43  ;;  %vm1126_vm7 = vcmp.ge.f32.partialorder %v1110_v53, 0.0 }
 0x17a   : > { %v1642_v55 = vpack.c.bf16 %v1155_v52, %v1154_v50  ;;  %v1156_v56 = vsel %vm1124_vm5, %v1108_v41, %v1140_v47  ;;  %v1157_v57 = vsel %vm1125_vm6, %v1109_v42, %v1141_v48  ;;  %vm1127_vm8 = vcmp.ge.f32.partialorder %v1111_v54, 0.0 }
 0x17b   : > { %v1647_v63 = vpack.c.bf16 %v1157_v57, %v1156_v56  ;;  %v1142_v0 = vmul.f32 0.2, %v1110_v53  ;;  %v1143_v1 = vmul.f32 0.2, %v1111_v54  ;;  %v1113_v3 = vadd.f32 %v2153_v21, %v1093_v44 }
 0x17c   : > { %1643 = vst [vmem:[%s2250_s4] sm:$0xff] %v1642_v55   ;;  %vm1128_vm9 = vcmp.ge.f32.partialorder %v1112_v59, 0.0  ;;  %v1144_v4 = vmul.f32 0.2, %v1112_v59  ;;  %v1054_v7 = vsub.f32 %v1034_v60, %v2135_v2  ;;  %v1055_v49 = vsub.f32 %v1035_v61, %v2135_v2 }
 0x17d   : > { %1686 = vst [vmem:[%s2250_s4 + $0x8] sm:$0xff] %v1647_v63   ;;  %v1158_v6 = vsel %vm1126_vm7, %v1110_v53, %v1142_v0  ;;  %v1056_v58 = vsub.f32 %v1036_v62, %v2135_v2  ;;  %v1159_v11 = vsel %vm1127_vm8, %v1111_v54, %v1143_v1  ;;  %vm1129_vm10 = vcmp.ge.f32.partialorder %v1113_v3, 0.0 }
 0x17e   : > { %v1145_v13 = vmul.f32 0.2, %v1113_v3  ;;  %v1160_v14 = vsel %vm1128_vm9, %v1112_v59, %v1144_v4  ;;  %v1652_v9 = vpack.c.bf16 %v1159_v11, %v1158_v6  ;;  %v1074_v15 = vmul.f32 %v2137_v8, %v1054_v7 }
 0x17f   : > { %v1075_v16 = vmul.f32 %v2137_v8, %v1055_v49  ;;  %v1057_v18 = vsub.f32 %v1037_v5, %v2135_v2  ;;  %v1076_v17 = vmul.f32 %v2137_v8, %v1056_v58  ;;  %v1058_v22 = vsub.f32 %v1038_v51, %v2135_v2 }
 0x180   : > { %v1161_v20 = vsel %vm1129_vm10, %v1113_v3, %v1145_v13  ;;  %v1059_v23 = vsub.f32 %v1039_v10, %v2135_v2  ;;  %1687 = vst [vmem:[%s2250_s4 + $0x10] sm:$0xff] %v1652_v9   ;;  %v1094_v27 = vmul.f32 %v2144_v12, %v1074_v15  ;;  %v1060_v32 = vsub.f32 %v1040_v19, %v2135_v2 }
 0x181   : > { %v1657_v26 = vpack.c.bf16 %v1161_v20, %v1160_v14  ;;  %v1095_v28 = vmul.f32 %v2144_v12, %v1075_v16  ;;  %v1077_v24 = vmul.f32 %v2137_v8, %v1057_v18  ;;  %v1096_v29 = vmul.f32 %v2144_v12, %v1076_v17 }
 0x182   : > { %v1078_v30 = vmul.f32 %v2137_v8, %v1058_v22  ;;  %v1079_v31 = vmul.f32 %v2137_v8, %v1059_v23  ;;  %v1114_v33 = vadd.f32 %v2153_v21, %v1094_v27  ;;  %v1061_v36 = vsub.f32 %v1041_v25, %v2135_v2 }
 0x183   : > { %1688 = vst [vmem:[%s2250_s4 + $0x18] sm:$0xff] %v1657_v26   ;;  %v1115_v34 = vadd.f32 %v2153_v21, %v1095_v28  ;;  %v1097_v35 = vmul.f32 %v2144_v12, %v1077_v24  ;;  %v1116_v37 = vadd.f32 %v2153_v21, %v1096_v29  ;;  %v1080_v40 = vmul.f32 %v2137_v8, %v1060_v32 }
 0x184   : > { %v1098_v38 = vmul.f32 %v2144_v12, %v1078_v30  ;;  %v1099_v39 = vmul.f32 %v2144_v12, %v1079_v31  ;;  %vm1130_vm11 = vcmp.ge.f32.partialorder %v1114_v33, 0.0  ;;  %v1146_v41 = vmul.f32 0.2, %v1114_v33 }
 0x185   : > { %vm1131_vm12 = vcmp.ge.f32.partialorder %v1115_v34, 0.0  ;;  %v1147_v42 = vmul.f32 0.2, %v1115_v34  ;;  %v1117_v43 = vadd.f32 %v2153_v21, %v1097_v35  ;;  %vm1132_vm13 = vcmp.ge.f32.partialorder %v1116_v37, 0.0 }
 0x186   : > { %v1148_v44 = vmul.f32 0.2, %v1116_v37  ;;  %v1118_v45 = vadd.f32 %v2153_v21, %v1098_v38  ;;  %v1162_v46 = vsel %vm1130_vm11, %v1114_v33, %v1146_v41  ;;  %v1119_v47 = vadd.f32 %v2153_v21, %v1099_v39 }
 0x187   : > { %v1163_v2 = vsel %vm1131_vm12, %v1115_v34, %v1147_v42  ;;  %v1081_v48 = vmul.f32 %v2137_v8, %v1061_v36  ;;  %vm1133_vm14 = vcmp.ge.f32.partialorder %v1117_v43, 0.0  ;;  %v1149_v52 = vmul.f32 0.2, %v1117_v43 }
 0x188   : > { %v1662_v50 = vpack.c.bf16 %v1163_v2, %v1162_v46  ;;  %v1164_v53 = vsel %vm1132_vm13, %v1116_v37, %v1148_v44  ;;  %vm1134_vm15 = vcmp.ge.f32.partialorder %v1118_v45, 0.0  ;;  %vm1135_vm0 = vcmp.ge.f32.partialorder %v1119_v47, 0.0 }
 0x189   : > { %v1150_v54 = vmul.f32 0.2, %v1118_v45  ;;  %v1151_v55 = vmul.f32 0.2, %v1119_v47  ;;  %v1165_v56 = vsel %vm1133_vm14, %v1117_v43, %v1149_v52  ;;  %v1100_v57 = vmul.f32 %v2144_v12, %v1080_v40 }
 0x18a   : > { %1689 = vst [vmem:[%s2250_s4 + $0x20] sm:$0xff] %v1662_v50   ;;  %v1101_v59 = vmul.f32 %v2144_v12, %v1081_v48  ;;  %v1667_v60 = vpack.c.bf16 %v1165_v56, %v1164_v53 }
 0x18b   : > { %v1166_v61 = vsel %vm1134_vm15, %v1118_v45, %v1150_v54  ;;  %v1167_v8 = vsel %vm1135_vm0, %v1119_v47, %v1151_v55  ;;  %v1120_v63 = vadd.f32 %v2153_v21, %v1100_v57 }
 0x18c   : > { %v1672_v62 = vpack.c.bf16 %v1167_v8, %v1166_v61  ;;  %v1121_v0 = vadd.f32 %v2153_v21, %v1101_v59  ;;  %1690 = vst [vmem:[%s2250_s4 + $0x28] sm:$0xff] %v1667_v60  }
 0x18d   : > { %vm1136_vm1 = vcmp.ge.f32.partialorder %v1120_v63, 0.0  ;;  %v1152_v1 = vmul.f32 0.2, %v1120_v63 }
 0x18e   : > { %1691 = vst [vmem:[%s2250_s4 + $0x30] sm:$0xff] %v1672_v62   ;;  %vm1137_vm2 = vcmp.ge.f32.partialorder %v1121_v0, 0.0  ;;  %v1153_v12 = vmul.f32 0.2, %v1121_v0 }
 0x18f   : > { %v1168_v3 = vsel %vm1136_vm1, %v1120_v63, %v1152_v1 }
 0x190   : > { %v1169_v4 = vsel %vm1137_vm2, %v1121_v0, %v1153_v12 }
 0x191   : > { %v1677_v5 = vpack.c.bf16 %v1169_v4, %v1168_v3 }
 0x193   : > { %1692 = vst [vmem:[%s2250_s4 + $0x38] sm:$0xff] %v1677_v5  }
 0x194 PF: > { %s14_s17 = sadd.s32 1, %s1746_s17   ;;  %s2251_s15 = smov %s1742_s16 }
 0x195   : > { %p11_p6 = scmp.ge.s32.totalorder %s14_s17, 4   ;;  %s2252_s16 = smov %s2254_s18 }
 0x197   :  { %13 = sbr.rel (!%p11_p6) target bundleno = 2 (0x2), region = 84 }

// kernel: discriminator_forward.8
= control target key start
LH: loop header
LB: loop body
LE: loop exit
PB: predicated region body
PF: predicated region fallthrough
CT: control target
= control target key end

     0   :  { %s1706_s15 = smov 0   ;;  %s1708_s16 = smov 0   ;;  %s2043_s0 = inlined_call_operand.vmem [shape: bf16[32,1024], index: 0, kind: input, shape index: {}]   ;;  %s2044_s1 = inlined_call_operand.vmem [shape: bf16[1024,128], index: 1, kind: input, shape index: {}]   ;;  %s2045_s2 = inlined_call_operand.vmem [shape: f32[1,128], index: 2, kind: input, shape index: {}]   ;;  %s2046_s3 = inlined_call_operand.vmem [shape: f32[1,128], index: 3, kind: input, shape index: {}]   ;;  %s2047_s4 = inlined_call_operand.vmem [shape: bf16[32,128], index: 4, kind: output, shape index: {}]  }
   0x1   :  { %s1710_s17 = smov 0  }
   0x2 LB: > { %s26_s18 = sadd.s32 1, %s1674_s16  ;;  %p1196_p0 = scmp.ge.s32.totalorder %s1678_s17, 1  ;;  %s1678_s17 = sphi %s1710_s17, %s14_s17   ;;  %s1674_s16 = sphi %s1708_s16, %s2049_s16   ;;  %s1670_s15 = sphi %s1706_s15, %s2048_s15  }
   0x3   : > { %p28_p1 = scmp.ge.s32.totalorder %s26_s18, 2  ;;  %p184_p2 = scmp.lt.s32.totalorder %s1678_s17, 3 }
   0x5   : > { %s2051_s18 = smov (%p28_p1, %s26_s18), 0  ;;  %p185_p3 = pnand %p1196_p0, %p184_p2 }
   0x6   : > { %p1197_p4 = scmp.ne.s32.totalorder (!%p185_p3), %s1670_s15, 0 }
   0x7   : > { %188 = sbr.rel (%p185_p3) target bundleno = 318 (0x13e), region = 36 }
   0xc   : > { %233 = sbr.rel (%p1197_p4) target bundleno = 294 (0x126), region = 40 }
  0x11   : > { %v1546_v0 = vld [vmem:[%s2044_s1 + $0x38] sm:$0xff]  ;;  %v1545_v4 = vld [vmem:[%s2044_s1 + $0x30] sm:$0xff]  ;;  %v1544_v8 = vld [vmem:[%s2044_s1 + $0x28] sm:$0xff] }
  0x12   : > { %v1554_v1 = vld [vmem:[%s2044_s1 + $0x78] sm:$0xff]  ;;  %842 = vmatpush.bf16.msra.mxu0 %v1546_v0  ;;  %v1553_v5 = vld [vmem:[%s2044_s1 + $0x70] sm:$0xff]  ;;  %v1552_v9 = vld [vmem:[%s2044_s1 + $0x68] sm:$0xff] }
  0x13   : > { %v1562_v2 = vld [vmem:[%s2044_s1 + $0xb8] sm:$0xff]  ;;  %861 = vmatpush.bf16.msra.mxu1 %v1554_v1  ;;  %v1561_v6 = vld [vmem:[%s2044_s1 + $0xb0] sm:$0xff]  ;;  %v1560_v10 = vld [vmem:[%s2044_s1 + $0xa8] sm:$0xff] }
  0x14   : > { %v1570_v3 = vld [vmem:[%s2044_s1 + $0xf8] sm:$0xff]  ;;  %880 = vmatpush.bf16.msra.mxu2 %v1562_v2  ;;  %v1569_v7 = vld [vmem:[%s2044_s1 + $0xf0] sm:$0xff]  ;;  %v1568_v11 = vld [vmem:[%s2044_s1 + $0xe8] sm:$0xff] }
  0x15   : > { %899 = vmatpush.bf16.msra.mxu3 %v1570_v3  ;;  %v1543_v12 = vld [vmem:[%s2044_s1 + $0x20] sm:$0xff]  ;;  %v1542_v16 = vld [vmem:[%s2044_s1 + $0x18] sm:$0xff]  ;;  %v1541_v20 = vld [vmem:[%s2044_s1 + $0x10] sm:$0xff] }
  0x16   : > { %843 = vmatpush.bf16.msra.mxu0 %v1545_v4  ;;  %v1551_v13 = vld [vmem:[%s2044_s1 + $0x60] sm:$0xff]  ;;  %v1550_v17 = vld [vmem:[%s2044_s1 + $0x58] sm:$0xff]  ;;  %v1549_v21 = vld [vmem:[%s2044_s1 + $0x50] sm:$0xff] }
  0x17   : > { %862 = vmatpush.bf16.msra.mxu1 %v1553_v5  ;;  %v1559_v14 = vld [vmem:[%s2044_s1 + $0xa0] sm:$0xff]  ;;  %v1558_v18 = vld [vmem:[%s2044_s1 + $0x98] sm:$0xff]  ;;  %v1557_v22 = vld [vmem:[%s2044_s1 + $0x90] sm:$0xff] }
  0x18   : > { %881 = vmatpush.bf16.msra.mxu2 %v1561_v6  ;;  %v1567_v15 = vld [vmem:[%s2044_s1 + $0xe0] sm:$0xff]  ;;  %v1566_v19 = vld [vmem:[%s2044_s1 + $0xd8] sm:$0xff]  ;;  %v1565_v23 = vld [vmem:[%s2044_s1 + $0xd0] sm:$0xff] }
  0x19   : > { %900 = vmatpush.bf16.msra.mxu3 %v1569_v7  ;;  %v1540_v24 = vld [vmem:[%s2044_s1 + $0x8] sm:$0xff]  ;;  %v1539_v28 = vld [vmem:[%s2044_s1] sm:$0xff]  ;;  %v1594_v40 = vld [vmem:[%s2044_s1 + $0x1b8] sm:$0xff] }
  0x1a   : > { %844 = vmatpush.bf16.msra.mxu0 %v1544_v8  ;;  %v1548_v25 = vld [vmem:[%s2044_s1 + $0x48] sm:$0xff]  ;;  %v1547_v29 = vld [vmem:[%s2044_s1 + $0x40] sm:$0xff]  ;;  %v1578_v41 = vld [vmem:[%s2044_s1 + $0x138] sm:$0xff] }
  0x1b   : > { %863 = vmatpush.bf16.msra.mxu1 %v1552_v9  ;;  %v1556_v26 = vld [vmem:[%s2044_s1 + $0x88] sm:$0xff]  ;;  %v1555_v30 = vld [vmem:[%s2044_s1 + $0x80] sm:$0xff]  ;;  %v1586_v46 = vld [vmem:[%s2044_s1 + $0x178] sm:$0xff] }
  0x1c   : > { %882 = vmatpush.bf16.msra.mxu2 %v1560_v10  ;;  %v1564_v27 = vld [vmem:[%s2044_s1 + $0xc8] sm:$0xff]  ;;  %v1563_v31 = vld [vmem:[%s2044_s1 + $0xc0] sm:$0xff]  ;;  %v1602_v47 = vld [vmem:[%s2044_s1 + $0x1f8] sm:$0xff] }
  0x1d   : > { %901 = vmatpush.bf16.msra.mxu3 %v1568_v11  ;;  %v1200_v32 = vld [vmem:[%s2043_s0] sm:$0xf]  ;;  %v1523_v34 = vld [vmem:[%s2043_s0 + $0x4] sm:$0xf]  ;;  %v1208_v36 = vld [vmem:[%s2043_s0 + $0x8] sm:$0xf] }
  0x1e   : > { %845 = vmatpush.bf16.msra.mxu0 %v1543_v12  ;;  %v1527_v33 = vld [vmem:[%s2043_s0 + $0x1c] sm:$0xf0]  ;;  %v1202_v35 = vld [vmem:[%s2043_s0 + $0x20] sm:$0xf0]  ;;  %v1528_v37 = vld [vmem:[%s2043_s0 + $0x24] sm:$0xf0] }
  0x1f   : > { %864 = vmatpush.bf16.msra.mxu1 %v1551_v13  ;;  %v1524_v38 = vld [vmem:[%s2043_s0 + $0xc] sm:$0xf]  ;;  %v1201_v42 = vor.u32 %v1527_v33, %v1200_v32  ;;  %v1205_v43 = vor.u32 %v1523_v34, %v1202_v35  ;;  %v1209_v44 = vor.u32 %v1528_v37, %v1208_v36  ;;  %v1593_v48 = vld [vmem:[%s2044_s1 + $0x1b0] sm:$0xff]  ;;  %v1591_v56 = vld [vmem:[%s2044_s1 + $0x1a0] sm:$0xff] }
  0x20   : > { %883 = vmatpush.bf16.msra.mxu2 %v1559_v14  ;;  %v1210_v39 = vld [vmem:[%s2043_s0 + $0x28] sm:$0xf0]  ;;  %v1577_v49 = vld [vmem:[%s2044_s1 + $0x130] sm:$0xff]  ;;  %v1575_v57 = vld [vmem:[%s2044_s1 + $0x120] sm:$0xff] }
  0x21   : > { %902 = vmatpush.bf16.msra.mxu3 %v1567_v15  ;;  %v1213_v45 = vor.u32 %v1524_v38, %v1210_v39  ;;  %v1585_v50 = vld [vmem:[%s2044_s1 + $0x170] sm:$0xff]  ;;  %v1592_v52 = vld [vmem:[%s2044_s1 + $0x1a8] sm:$0xff]  ;;  %v1583_v58 = vld [vmem:[%s2044_s1 + $0x160] sm:$0xff] }
  0x22   : > { %846 = vmatpush.bf16.msra.mxu0 %v1542_v16  ;;  %v1601_v51 = vld [vmem:[%s2044_s1 + $0x1f0] sm:$0xff]  ;;  %v1576_v53 = vld [vmem:[%s2044_s1 + $0x128] sm:$0xff]  ;;  %v1599_v59 = vld [vmem:[%s2044_s1 + $0x1e0] sm:$0xff] }
  0x23   : > { %865 = vmatpush.bf16.msra.mxu1 %v1550_v17  ;;  %v1584_v54 = vld [vmem:[%s2044_s1 + $0x168] sm:$0xff]  ;;  %v1232_v60 = vld [vmem:[%s2043_s0 + $0x40] sm:$0xf]  ;;  %v1531_v62 = vld [vmem:[%s2043_s0 + $0x44] sm:$0xf] }
  0x24   : > { %884 = vmatpush.bf16.msra.mxu2 %v1558_v18  ;;  %v1600_v55 = vld [vmem:[%s2044_s1 + $0x1e8] sm:$0xff]  ;;  %v1535_v61 = vld [vmem:[%s2043_s0 + $0x5c] sm:$0xf0]  ;;  %v1234_v63 = vld [vmem:[%s2043_s0 + $0x60] sm:$0xf0] }
  0x25   : > { %903 = vmatpush.bf16.msra.mxu3 %v1566_v19  ;;  %v1240_v0 = vld [vmem:[%s2043_s0 + $0x48] sm:$0xf]  ;;  %v1532_v2 = vld [vmem:[%s2043_s0 + $0x4c] sm:$0xf]  ;;  %v1590_v4 = vld [vmem:[%s2044_s1 + $0x198] sm:$0xff]  ;;  %v1233_v6 = vor.u32 %v1535_v61, %v1232_v60  ;;  %v1237_v7 = vor.u32 %v1531_v62, %v1234_v63 }
  0x26   : > { %847 = vmatpush.bf16.msra.mxu0 %v1541_v20  ;;  %v1536_v1 = vld [vmem:[%s2043_s0 + $0x64] sm:$0xf0]  ;;  %v1242_v3 = vld [vmem:[%s2043_s0 + $0x68] sm:$0xf0]  ;;  %v1574_v5 = vld [vmem:[%s2044_s1 + $0x118] sm:$0xff] }
  0x27   : > { %866 = vmatpush.bf16.msra.mxu1 %v1549_v21  ;;  %v1241_v8 = vor.u32 %v1536_v1, %v1240_v0  ;;  %v1245_v9 = vor.u32 %v1532_v2, %v1242_v3  ;;  %v1582_v10 = vld [vmem:[%s2044_s1 + $0x158] sm:$0xff]  ;;  %v1589_v12 = vld [vmem:[%s2044_s1 + $0x190] sm:$0xff]  ;;  %v1588_v16 = vld [vmem:[%s2044_s1 + $0x188] sm:$0xff] }
  0x28   : > { %885 = vmatpush.bf16.msra.mxu2 %v1557_v22  ;;  %v1598_v11 = vld [vmem:[%s2044_s1 + $0x1d8] sm:$0xff]  ;;  %v1573_v13 = vld [vmem:[%s2044_s1 + $0x110] sm:$0xff]  ;;  %v1572_v17 = vld [vmem:[%s2044_s1 + $0x108] sm:$0xff] }
  0x29   : > { %904 = vmatpush.bf16.msra.mxu3 %v1565_v23  ;;  %v1581_v14 = vld [vmem:[%s2044_s1 + $0x150] sm:$0xff]  ;;  %v1580_v18 = vld [vmem:[%s2044_s1 + $0x148] sm:$0xff]  ;;  %v1587_v20 = vld [vmem:[%s2044_s1 + $0x180] sm:$0xff] }
  0x2a   : > { %848 = vmatpush.bf16.msra.mxu0 %v1540_v24  ;;  %v1597_v15 = vld [vmem:[%s2044_s1 + $0x1d0] sm:$0xff]  ;;  %v1596_v19 = vld [vmem:[%s2044_s1 + $0x1c8] sm:$0xff]  ;;  %v1571_v21 = vld [vmem:[%s2044_s1 + $0x100] sm:$0xff] }
  0x2b   : > { %867 = vmatpush.bf16.msra.mxu1 %v1548_v25  ;;  %v1579_v22 = vld [vmem:[%s2044_s1 + $0x140] sm:$0xff]  ;;  %v1216_v24 = vld [vmem:[%s2043_s0 + $0x10] sm:$0xf]  ;;  %v1533_v38 = vld [vmem:[%s2043_s0 + $0x54] sm:$0xf] }
  0x2c   : > { %886 = vmatpush.bf16.msra.mxu2 %v1556_v26  ;;  %v1595_v23 = vld [vmem:[%s2044_s1 + $0x1c0] sm:$0xff]  ;;  %v1529_v25 = vld [vmem:[%s2043_s0 + $0x2c] sm:$0xf0]  ;;  %v1525_v26 = vld [vmem:[%s2043_s0 + $0x14] sm:$0xf] }
  0x2d   : > { %905 = vmatpush.bf16.msra.mxu3 %v1564_v27  ;;  %v1218_v27 = vld [vmem:[%s2043_s0 + $0x30] sm:$0xf0]  ;;  %v1217_v32 = vor.u32 %v1529_v25, %v1216_v24  ;;  %v1248_v36 = vld [vmem:[%s2043_s0 + $0x50] sm:$0xf] }
  0x2e   : > { %849 = vmatpush.bf16.msra.mxu0 %v1539_v28  ;;  %v1224_v28 = vld [vmem:[%s2043_s0 + $0x18] sm:$0xf]  ;;  %v1221_v33 = vor.u32 %v1525_v26, %v1218_v27  ;;  %v1537_v37 = vld [vmem:[%s2043_s0 + $0x6c] sm:$0xf0]  ;;  %v1250_v39 = vld [vmem:[%s2043_s0 + $0x70] sm:$0xf0] }
  0x2f   : > { %868 = vmatpush.bf16.msra.mxu1 %v1547_v29  ;;  %v1530_v29 = vld [vmem:[%s2043_s0 + $0x34] sm:$0xf0] }
  0x30   : > { %887 = vmatpush.bf16.msra.mxu2 %v1555_v30  ;;  %v1526_v30 = vld [vmem:[%s2043_s0 + $0x1c] sm:$0xf]  ;;  %v1225_v34 = vor.u32 %v1530_v29, %v1224_v28 }
  0x31   : > { %906 = vmatpush.bf16.msra.mxu3 %v1563_v31  ;;  %850 = vmatmul.bf16.vlgmr.msra.gmra.mxu0 %v1201_v42  ;;  %v1226_v31 = vld [vmem:[%s2043_s0 + $0x38] sm:$0xf0] }
  0x32   : > { %918 = vmatpush.bf16.msrb.mxu0 %v1578_v41  ;;  %869 = vmatmul.bf16.vlgmr.msra.gmra.mxu1 %v1205_v43  ;;  %v1229_v35 = vor.u32 %v1526_v30, %v1226_v31  ;;  %v1538_v41 = vld [vmem:[%s2043_s0 + $0x74] sm:$0xf0]  ;;  %v1534_v42 = vld [vmem:[%s2043_s0 + $0x5c] sm:$0xf] }
  0x33   : > { %888 = vmatmul.bf16.vlgmr.msra.gmra.mxu2 %v1209_v44  ;;  %937 = vmatpush.bf16.msrb.mxu1 %v1586_v46  ;;  %v1258_v43 = vld [vmem:[%s2043_s0 + $0x78] sm:$0xf0]  ;;  %v1249_v44 = vor.u32 %v1537_v37, %v1248_v36 }
  0x34   : > { %956 = vmatpush.bf16.msrb.mxu2 %v1594_v40  ;;  %907 = vmatmul.bf16.vlgmr.msra.gmra.mxu3 %v1213_v45  ;;  %v1256_v40 = vld [vmem:[%s2043_s0 + $0x58] sm:$0xf]  ;;  %v1253_v45 = vor.u32 %v1533_v38, %v1250_v39 }
  0x35   : > { %975 = vmatpush.bf16.msrb.mxu3 %v1602_v47  ;;  %v1257_v46 = vor.u32 %v1538_v41, %v1256_v40  ;;  %v1261_v47 = vor.u32 %v1534_v42, %v1258_v43 }
  0x36   : > { %919 = vmatpush.bf16.msrb.mxu0 %v1577_v49 }
  0x37   : > { %938 = vmatpush.bf16.msrb.mxu1 %v1585_v50 }
  0x38   : > { %957 = vmatpush.bf16.msrb.mxu2 %v1593_v48 }
  0x39   : > { %976 = vmatpush.bf16.msrb.mxu3 %v1601_v51 }
  0x3a   : > { %920 = vmatpush.bf16.msrb.mxu0 %v1576_v53 }
  0x3b   : > { %939 = vmatpush.bf16.msrb.mxu1 %v1584_v54 }
  0x3c   : > { %958 = vmatpush.bf16.msrb.mxu2 %v1592_v52 }
  0x3d   : > { %977 = vmatpush.bf16.msrb.mxu3 %v1600_v55 }
  0x3e   : > { %921 = vmatpush.bf16.msrb.mxu0 %v1575_v57 }
  0x3f   : > { %940 = vmatpush.bf16.msrb.mxu1 %v1583_v58 }
  0x40   : > { %959 = vmatpush.bf16.msrb.mxu2 %v1591_v56 }
  0x41   : > { %978 = vmatpush.bf16.msrb.mxu3 %v1599_v59  ;;  %855 = vmatmul.bf16.gmra.mxu0 %v1233_v6 }
  0x42   : > { %922 = vmatpush.bf16.msrb.mxu0 %v1574_v5  ;;  %874 = vmatmul.bf16.gmra.mxu1 %v1237_v7 }
  0x43   : > { %893 = vmatmul.bf16.gmra.mxu2 %v1241_v8  ;;  %941 = vmatpush.bf16.msrb.mxu1 %v1582_v10  ;;  %v1680_v10 = vmov 0.0  }
  0x44   : > { %960 = vmatpush.bf16.msrb.mxu2 %v1590_v4  ;;  %912 = vmatmul.bf16.gmra.mxu3 %v1245_v9  ;;  %1012 = vst [vmem:[#allocation3] sm:$0x1] %v1680_v10 }
  0x45   : > { %979 = vmatpush.bf16.msrb.mxu3 %v1598_v11  ;;  %1013 = vst [vmem:[#allocation4] sm:$0x1] %v1680_v10 }
  0x46   : > { %923 = vmatpush.bf16.msrb.mxu0 %v1573_v13 }
  0x47   : > { %942 = vmatpush.bf16.msrb.mxu1 %v1581_v14 }
  0x48   : > { %961 = vmatpush.bf16.msrb.mxu2 %v1589_v12 }
  0x49   : > { %980 = vmatpush.bf16.msrb.mxu3 %v1597_v15 }
  0x4a   : > { %924 = vmatpush.bf16.msrb.mxu0 %v1572_v17 }
  0x4b   : > { %943 = vmatpush.bf16.msrb.mxu1 %v1580_v18 }
  0x4c   : > { %962 = vmatpush.bf16.msrb.mxu2 %v1588_v16 }
  0x4d   : > { %981 = vmatpush.bf16.msrb.mxu3 %v1596_v19 }
  0x4e   : > { %925 = vmatpush.bf16.msrb.mxu0 %v1571_v21 }
  0x4f   : > { %944 = vmatpush.bf16.msrb.mxu1 %v1579_v22 }
  0x50   : > { %963 = vmatpush.bf16.msrb.mxu2 %v1587_v20 }
  0x51   : > { %982 = vmatpush.bf16.msrb.mxu3 %v1595_v23  ;;  %926 = vmatmul.bf16.vlgmr.msrb.gmra.mxu0 %v1217_v32 }
  0x52   : > { %945 = vmatmul.bf16.vlgmr.msrb.gmra.mxu1 %v1221_v33 }
  0x53   : > { %964 = vmatmul.bf16.vlgmr.msrb.gmra.mxu2 %v1225_v34 }
  0x54   : > { %983 = vmatmul.bf16.vlgmr.msrb.gmra.mxu3 %v1229_v35 }
  0x61   : > { %931 = vmatmul.bf16.gmra.mxu0 %v1249_v44 }
  0x62   : > { %950 = vmatmul.bf16.gmra.mxu1 %v1253_v45 }
  0x63   : > { %969 = vmatmul.bf16.gmra.mxu2 %v1257_v46 }
  0x64   : > { %988 = vmatmul.bf16.gmra.mxu3 %v1261_v47 }
  0xae   : > { %v851_v48 = vpop.f32.mrf.mxu0 }
  0xaf   : > { %v870_v49 = vpop.f32.mrf.mxu1 }
  0xb0   : > { %v871_v62 = vadd.f32 %v870_v49, %v851_v48 }
  0xb6   : > { %v889_v50 = vpop.f32.mrf.mxu2  ;;  %v853_v52 = vpop.f32.mrf.mxu0 }
  0xb7   : > { %v908_v51 = vpop.f32.mrf.mxu3  ;;  %v872_v53 = vpop.f32.mrf.mxu1  ;;  %v890_v63 = vadd.f32 %v889_v50, %v871_v62 }
  0xb8   : > { %v873_v5 = vadd.f32 %v872_v53, %v853_v52 }
  0xb9   : > { %v909_v2 = vadd.f32 %v908_v51, %v890_v63 }
  0xbe   : > { %v891_v54 = vpop.f32.mrf.mxu2  ;;  %v856_v56 = vpop.f32.mrf.mxu0 }
  0xbf   : > { %v910_v55 = vpop.f32.mrf.mxu3  ;;  %v875_v57 = vpop.f32.mrf.mxu1  ;;  %v892_v7 = vadd.f32 %v891_v54, %v873_v5  ;;  %v1026_v5 = vld [vmem:[#allocation4] sm:$0x1] }
  0xc0   : > { %v876_v16 = vadd.f32 %v875_v57, %v856_v56 }
  0xc1   : > { %v911_v11 = vadd.f32 %v910_v55, %v892_v7 }
  0xc6   : > { %v894_v58 = vpop.f32.mrf.mxu2  ;;  %v858_v60 = vpop.f32.mrf.mxu0 }
  0xc7   : > { %v913_v59 = vpop.f32.mrf.mxu3  ;;  %v877_v61 = vpop.f32.mrf.mxu1  ;;  %v895_v19 = vadd.f32 %v894_v58, %v876_v16 }
  0xc8   : > { %v878_v26 = vadd.f32 %v877_v61, %v858_v60 }
  0xc9   : > { %v914_v22 = vadd.f32 %v913_v59, %v895_v19 }
  0xce   : > { %v896_v0 = vpop.f32.mrf.mxu2  ;;  %v927_v3 = vpop.f32.mrf.mxu0 }
  0xcf   : > { %v915_v1 = vpop.f32.mrf.mxu3  ;;  %v946_v4 = vpop.f32.mrf.mxu1  ;;  %v928_v6 = vadd.f32 %v927_v3, %v909_v2  ;;  %v897_v30 = vadd.f32 %v896_v0, %v878_v26  ;;  %v1014_v2 = vld [vmem:[#allocation3] sm:$0x1] }
  0xd1   : > { %v947_v8 = vadd.f32 %v946_v4, %v928_v6  ;;  %v916_v34 = vadd.f32 %v915_v1, %v897_v30 }
  0xd6   : > { %v965_v9 = vpop.f32.mrf.mxu2  ;;  %v929_v14 = vpop.f32.mrf.mxu0 }
  0xd7   : > { %v966_v12 = vadd.f32 %v965_v9, %v947_v8  ;;  %v984_v13 = vpop.f32.mrf.mxu3  ;;  %v948_v15 = vpop.f32.mrf.mxu1  ;;  %v930_v18 = vadd.f32 %v929_v14, %v911_v11 }
  0xd9   : > { %v985_v17 = vadd.f32 %v984_v13, %v966_v12  ;;  %v949_v20 = vadd.f32 %v948_v15, %v930_v18 }
  0xdb   : > { %996 = vst [vmem:[#allocation2 + $0x10] sm:$0xff] %v985_v17  ;;  %v1027_v44 = vmul.f32 %v985_v17, %v985_v17 }
  0xde   : > { %v967_v21 = vpop.f32.mrf.mxu2  ;;  %v932_v25 = vpop.f32.mrf.mxu0 }
  0xdf   : > { %v968_v23 = vadd.f32 %v967_v21, %v949_v20  ;;  %v986_v24 = vpop.f32.mrf.mxu3  ;;  %v933_v28 = vadd.f32 %v932_v25, %v914_v22  ;;  %v951_v29 = vpop.f32.mrf.mxu1 }
  0xe1   : > { %v987_v27 = vadd.f32 %v986_v24, %v968_v23  ;;  %v952_v32 = vadd.f32 %v951_v29, %v933_v28 }
  0xe3   : > { %997 = vst [vmem:[#allocation2] sm:$0xff] %v987_v27  ;;  %v1606_v31 = vpack.c.bf16 %v987_v27, %v985_v17  ;;  %v1028_v41 = vmul.f32 %v987_v27, %v987_v27  ;;  %v1015_v45 = vadd.f32 %v987_v27, %v985_v17 }
  0xe5   : > { %1607 = vst [vmem:[%s2047_s4] sm:$0xff] %v1606_v31   ;;  %v1031_v49 = vadd.f32 %v1028_v41, %v1027_v44 }
  0xe6   : > { %v970_v33 = vpop.f32.mrf.mxu2  ;;  %v934_v37 = vpop.f32.mrf.mxu0 }
  0xe7   : > { %v971_v35 = vadd.f32 %v970_v33, %v952_v32  ;;  %v989_v36 = vpop.f32.mrf.mxu3  ;;  %v935_v39 = vadd.f32 %v934_v37, %v916_v34  ;;  %v953_v40 = vpop.f32.mrf.mxu1 }
  0xe9   : > { %v990_v38 = vadd.f32 %v989_v36, %v971_v35  ;;  %v954_v42 = vadd.f32 %v953_v40, %v935_v39 }
  0xeb   : > { %998 = vst [vmem:[#allocation2 + $0x18] sm:$0xff] %v990_v38  ;;  %v1029_v46 = vmul.f32 %v990_v38, %v990_v38  ;;  %v1016_v50 = vadd.f32 %v1015_v45, %v990_v38 }
  0xed   : > { %v1032_v52 = vadd.f32 %v1031_v49, %v1029_v46 }
  0xee   : > { %v972_v43 = vpop.f32.mrf.mxu2 }
  0xef   : > { %v973_v47 = vadd.f32 %v972_v43, %v954_v42  ;;  %v991_v48 = vpop.f32.mrf.mxu3 }
  0xf1   : > { %v992_v51 = vadd.f32 %v991_v48, %v973_v47 }
  0xf3   : > { %999 = vst [vmem:[#allocation2 + $0x8] sm:$0xff] %v992_v51  ;;  %v1611_v53 = vpack.c.bf16 %v992_v51, %v990_v38  ;;  %v1017_v54 = vadd.f32 %v1016_v50, %v992_v51  ;;  %v1030_v55 = vmul.f32 %v992_v51, %v992_v51 }
  0xf5   : > { %1623 = vst [vmem:[%s2047_s4 + $0x8] sm:$0xff] %v1611_v53   ;;  %v1018_v56 = vrot.slane %v1017_v54, 4  ;;  %v1033_v57 = vadd.f32 %v1032_v52, %v1030_v55 }
  0xf7   : > { %v1019_v58 = vadd.f32 %v1018_v56, %v1017_v54  ;;  %v1034_v59 = vrot.slane %v1033_v57, 4 }
  0xf9   : > { %v1020_v60 = vrot.slane %v1019_v58, 2  ;;  %v1035_v61 = vadd.f32 %v1034_v59, %v1033_v57 }
  0xfb   : > { %v1021_v62 = vadd.f32 %v1020_v60, %v1019_v58  ;;  %v1036_v63 = vrot.slane %v1035_v61, 2 }
  0xfd   : > { %v1022_v0 = vrot.slane %v1021_v62, 1  ;;  %v1037_v1 = vadd.f32 %v1036_v63, %v1035_v61 }
  0xff   : > { %v1023_v3 = vadd.f32 %v1022_v0, %v1021_v62  ;;  %v1038_v4 = vrot.slane %v1037_v1, 1 }
 0x101   : > { %v1024_v6 = vadd.f32 %v1023_v3, %v1014_v2  ;;  %v1039_v7 = vadd.f32 %v1038_v4, %v1037_v1 }
 0x103   : > { %1025 = vst [vmem:[#allocation3] sm:$0x1] %v1024_v6  ;;  %v1040_v8 = vadd.f32 %v1039_v7, %v1026_v5 }
 0x105   : > { %1041 = vst [vmem:[#allocation4] sm:$0x1] %v1040_v8 }
 0x10a   : > { %v1045_v9 = vld [vmem:[#allocation3] sm:$0x1] }
 0x10b   : > { %v1046_v10 = vmul.f32 0.03125, %v1045_v9 }
 0x10c   : > { %v1047_v11 = vld [vmem:[#allocation4] sm:$0x1] }
 0x10d   : > { %v1048_v12 = vmul.f32 0.03125, %v1047_v11  ;;  %v1049_v13 = vmul.f32 %v1046_v10, %v1046_v10  ;;  %1051 = vst [vmem:[#allocation3] sm:$0x1] %v1046_v10 }
 0x10f   : > { %v1050_v14 = vsub.f32 %v1048_v12, %v1049_v13 }
 0x111   : > { %v1052_v15 = vadd.f32 1e-05, %v1050_v14 }
 0x113   : > { %1650 = vrsqrt.f32 %v1052_v15  ;;  %vm1059_vm1 = vweird.f32 %v1052_v15 }
 0x119   : > { %v1651_v16 = vpop.eup %1650 }
 0x11a   : > { %v1054_v17 = vmul.f32 %v1651_v16, %v1052_v15  ;;  %vm1060_vm0 = vweird.f32 %v1651_v16 }
 0x11b   : > { %vm1061_vm2 = vmor %vm1059_vm1, %vm1060_vm0 }
 0x11c   : > { %v1055_v18 = vmul.f32 %v1651_v16, %v1054_v17 }
 0x11e   : > { %v1056_v19 = vmul.f32 0.5, %v1055_v18 }
 0x120   : > { %v1057_v20 = vsub.f32 1.5, %v1056_v19 }
 0x122   : > { %v1058_v21 = vmul.f32 %v1651_v16, %v1057_v20 }
 0x124   : > { %v1062_v22 = vsel %vm1061_vm2, %v1651_v16, %v1058_v21 }
 0x125   : > { %1063 = vst [vmem:[#allocation4] sm:$0x1] %v1062_v22 }
 0x126 PF: > { %p1518_p5 = scmp.ne.s32.totalorder %s1670_s15, 1 }
 0x128   : > { %1067 = sbr.rel (%p1518_p5) target bundleno = 318 (0x13e), region = 52 }
 0x12d   : > { %v1070_v23 = vld [vmem:[#allocation2 + $0x10] sm:$0xff]  ;;  %v1071_v24 = vld [vmem:[#allocation2] sm:$0xff]  ;;  %v1072_v30 = vld [vmem:[#allocation2 + $0x18] sm:$0xff] }
 0x12e   : > { %v1652_v25 = vld [vmem:[#allocation3] ss:$0 sm:$0xff]  ;;  %v1653_v26 = vld [vmem:[#allocation4] ss:$0 sm:$0xff]  ;;  %v1073_v31 = vld [vmem:[#allocation2 + $0x8] sm:$0xff] }
 0x12f   : > { %v1078_v27 = vsub.f32 %v1070_v23, %v1652_v25  ;;  %v1079_v28 = vsub.f32 %v1071_v24, %v1652_v25  ;;  %v1654_v29 = vld [vmem:[%s2045_s2] ss:$0 sm:$0xff]  ;;  %v1080_v32 = vsub.f32 %v1072_v30, %v1652_v25  ;;  %v1081_v33 = vsub.f32 %v1073_v31, %v1652_v25 }
 0x130   : > { %v1655_v36 = vld [vmem:[%s2046_s3] ss:$0 sm:$0xff] }
 0x131   : > { %v1086_v34 = vmul.f32 %v1653_v26, %v1078_v27  ;;  %v1087_v35 = vmul.f32 %v1653_v26, %v1079_v28  ;;  %v1088_v37 = vmul.f32 %v1653_v26, %v1080_v32  ;;  %v1089_v38 = vmul.f32 %v1653_v26, %v1081_v33 }
 0x133   : > { %v1094_v39 = vmul.f32 %v1654_v29, %v1086_v34  ;;  %v1095_v40 = vmul.f32 %v1654_v29, %v1087_v35  ;;  %v1096_v41 = vmul.f32 %v1654_v29, %v1088_v37  ;;  %v1097_v42 = vmul.f32 %v1654_v29, %v1089_v38 }
 0x135   : > { %v1102_v43 = vadd.f32 %v1655_v36, %v1094_v39  ;;  %v1103_v44 = vadd.f32 %v1655_v36, %v1095_v40  ;;  %v1104_v45 = vadd.f32 %v1655_v36, %v1096_v41  ;;  %v1105_v46 = vadd.f32 %v1655_v36, %v1097_v42 }
 0x137   : > { %vm1106_vm3 = vcmp.ge.f32.partialorder %v1102_v43, 0.0  ;;  %vm1107_vm4 = vcmp.ge.f32.partialorder %v1103_v44, 0.0  ;;  %v1110_v47 = vmul.f32 0.2, %v1102_v43  ;;  %v1111_v48 = vmul.f32 0.2, %v1103_v44 }
 0x138   : > { %vm1108_vm5 = vcmp.ge.f32.partialorder %v1104_v45, 0.0  ;;  %vm1109_vm6 = vcmp.ge.f32.partialorder %v1105_v46, 0.0  ;;  %v1112_v49 = vmul.f32 0.2, %v1104_v45  ;;  %v1113_v50 = vmul.f32 0.2, %v1105_v46 }
 0x139   : > { %v1114_v51 = vsel %vm1106_vm3, %v1102_v43, %v1110_v47  ;;  %v1115_v52 = vsel %vm1107_vm4, %v1103_v44, %v1111_v48 }
 0x13a   : > { %v1616_v53 = vpack.c.bf16 %v1115_v52, %v1114_v51  ;;  %v1116_v54 = vsel %vm1108_vm5, %v1104_v45, %v1112_v49  ;;  %v1117_v55 = vsel %vm1109_vm6, %v1105_v46, %v1113_v50 }
 0x13b   : > { %v1621_v56 = vpack.c.bf16 %v1117_v55, %v1116_v54 }
 0x13c   : > { %1617 = vst [vmem:[%s2047_s4] sm:$0xff] %v1616_v53  }
 0x13d   : > { %1624 = vst [vmem:[%s2047_s4 + $0x8] sm:$0xff] %v1621_v56  }
 0x13e PF: > { %s14_s17 = sadd.s32 1, %s1678_s17   ;;  %s2048_s15 = smov %s1674_s16 }
 0x13f   : > { %p11_p6 = scmp.ge.s32.totalorder %s14_s17, 4   ;;  %s2049_s16 = smov %s2051_s18 }
 0x141   :  { %13 = sbr.rel (!%p11_p6) target bundleno = 2 (0x2), region = 84 }

// kernel: discriminator_forward.9
= control target key start
LH: loop header
LB: loop body
LE: loop exit
PB: predicated region body
PF: predicated region fallthrough
CT: control target
= control target key end

     0   :  { %s2598_s1 = inlined_call_operand.vmem [shape: bf16[2048,128], index: 1, kind: input, shape index: {}]   ;;  %s2599_s2 = inlined_call_operand.vmem [shape: f32[1,128], index: 2, kind: input, shape index: {}]   ;;  %s2600_s0 = inlined_call_operand.vmem [shape: bf16[16,2048], index: 0, kind: input, shape index: {}]   ;;  %s2601_s3 = inlined_call_operand.vmem [shape: f32[16,128], index: 3, kind: output, shape index: {}]  }
   0x1   :  { %v1967_v0 = vld [vmem:[%s2598_s1 + $0x38] sm:$0xff]  ;;  %v1966_v4 = vld [vmem:[%s2598_s1 + $0x30] sm:$0xff]  ;;  %v1965_v8 = vld [vmem:[%s2598_s1 + $0x28] sm:$0xff] }
   0x2   :  { %v1975_v1 = vld [vmem:[%s2598_s1 + $0x78] sm:$0xff]  ;;  %1138 = vmatpush.bf16.msra.mxu0 %v1967_v0  ;;  %v1974_v5 = vld [vmem:[%s2598_s1 + $0x70] sm:$0xff]  ;;  %v1973_v9 = vld [vmem:[%s2598_s1 + $0x68] sm:$0xff] }
   0x3   :  { %v1983_v2 = vld [vmem:[%s2598_s1 + $0xb8] sm:$0xff]  ;;  %1152 = vmatpush.bf16.msra.mxu1 %v1975_v1  ;;  %v1982_v6 = vld [vmem:[%s2598_s1 + $0xb0] sm:$0xff]  ;;  %v1981_v10 = vld [vmem:[%s2598_s1 + $0xa8] sm:$0xff] }
   0x4   :  { %v1991_v3 = vld [vmem:[%s2598_s1 + $0xf8] sm:$0xff]  ;;  %1166 = vmatpush.bf16.msra.mxu2 %v1983_v2  ;;  %v1990_v7 = vld [vmem:[%s2598_s1 + $0xf0] sm:$0xff]  ;;  %v1989_v11 = vld [vmem:[%s2598_s1 + $0xe8] sm:$0xff] }
   0x5   :  { %1180 = vmatpush.bf16.msra.mxu3 %v1991_v3  ;;  %v1964_v12 = vld [vmem:[%s2598_s1 + $0x20] sm:$0xff]  ;;  %v1963_v16 = vld [vmem:[%s2598_s1 + $0x18] sm:$0xff]  ;;  %v1962_v20 = vld [vmem:[%s2598_s1 + $0x10] sm:$0xff] }
   0x6   :  { %1139 = vmatpush.bf16.msra.mxu0 %v1966_v4  ;;  %v1972_v13 = vld [vmem:[%s2598_s1 + $0x60] sm:$0xff]  ;;  %v1971_v17 = vld [vmem:[%s2598_s1 + $0x58] sm:$0xff]  ;;  %v1970_v21 = vld [vmem:[%s2598_s1 + $0x50] sm:$0xff] }
   0x7   :  { %1153 = vmatpush.bf16.msra.mxu1 %v1974_v5  ;;  %v1980_v14 = vld [vmem:[%s2598_s1 + $0xa0] sm:$0xff]  ;;  %v1979_v18 = vld [vmem:[%s2598_s1 + $0x98] sm:$0xff]  ;;  %v1978_v22 = vld [vmem:[%s2598_s1 + $0x90] sm:$0xff] }
   0x8   :  { %1167 = vmatpush.bf16.msra.mxu2 %v1982_v6  ;;  %v1988_v15 = vld [vmem:[%s2598_s1 + $0xe0] sm:$0xff]  ;;  %v1987_v19 = vld [vmem:[%s2598_s1 + $0xd8] sm:$0xff]  ;;  %v1986_v23 = vld [vmem:[%s2598_s1 + $0xd0] sm:$0xff] }
   0x9   :  { %1181 = vmatpush.bf16.msra.mxu3 %v1990_v7  ;;  %v1961_v24 = vld [vmem:[%s2598_s1 + $0x8] sm:$0xff]  ;;  %v1960_v28 = vld [vmem:[%s2598_s1] sm:$0xff]  ;;  %v1999_v32 = vld [vmem:[%s2598_s1 + $0x138] sm:$0xff] }
   0xa   :  { %1140 = vmatpush.bf16.msra.mxu0 %v1965_v8  ;;  %v1969_v25 = vld [vmem:[%s2598_s1 + $0x48] sm:$0xff]  ;;  %v1968_v29 = vld [vmem:[%s2598_s1 + $0x40] sm:$0xff]  ;;  %v2007_v33 = vld [vmem:[%s2598_s1 + $0x178] sm:$0xff] }
   0xb   :  { %1154 = vmatpush.bf16.msra.mxu1 %v1973_v9  ;;  %v1977_v26 = vld [vmem:[%s2598_s1 + $0x88] sm:$0xff]  ;;  %v1976_v30 = vld [vmem:[%s2598_s1 + $0x80] sm:$0xff]  ;;  %v2015_v42 = vld [vmem:[%s2598_s1 + $0x1b8] sm:$0xff] }
   0xc   :  { %1168 = vmatpush.bf16.msra.mxu2 %v1981_v10  ;;  %v1985_v27 = vld [vmem:[%s2598_s1 + $0xc8] sm:$0xff]  ;;  %v1984_v31 = vld [vmem:[%s2598_s1 + $0xc0] sm:$0xff]  ;;  %v2023_v43 = vld [vmem:[%s2598_s1 + $0x1f8] sm:$0xff] }
   0xd   :  { %1182 = vmatpush.bf16.msra.mxu3 %v1989_v11  ;;  %v1370_v34 = vld [vmem:[%s2600_s0] sm:$0xf]  ;;  %v1378_v36 = vld [vmem:[%s2600_s0 + $0x8] sm:$0xf]  ;;  %v1944_v38 = vld [vmem:[%s2600_s0 + $0x4] sm:$0xf] }
   0xe   :  { %1141 = vmatpush.bf16.msra.mxu0 %v1964_v12  ;;  %v1952_v35 = vld [vmem:[%s2600_s0 + $0x3c] sm:$0xf0]  ;;  %v1953_v37 = vld [vmem:[%s2600_s0 + $0x44] sm:$0xf0]  ;;  %v1372_v39 = vld [vmem:[%s2600_s0 + $0x40] sm:$0xf0] }
   0xf   :  { %1155 = vmatpush.bf16.msra.mxu1 %v1972_v13  ;;  %v1945_v40 = vld [vmem:[%s2600_s0 + $0xc] sm:$0xf]  ;;  %v1371_v44 = vor.u32 %v1952_v35, %v1370_v34  ;;  %v1379_v45 = vor.u32 %v1953_v37, %v1378_v36  ;;  %v1375_v46 = vor.u32 %v1944_v38, %v1372_v39  ;;  %v1998_v48 = vld [vmem:[%s2598_s1 + $0x130] sm:$0xff]  ;;  %v1996_v56 = vld [vmem:[%s2598_s1 + $0x120] sm:$0xff] }
  0x10   :  { %1169 = vmatpush.bf16.msra.mxu2 %v1980_v14  ;;  %v1380_v41 = vld [vmem:[%s2600_s0 + $0x48] sm:$0xf0]  ;;  %v2006_v49 = vld [vmem:[%s2598_s1 + $0x170] sm:$0xff]  ;;  %v2004_v57 = vld [vmem:[%s2598_s1 + $0x160] sm:$0xff] }
  0x11   :  { %1183 = vmatpush.bf16.msra.mxu3 %v1988_v15  ;;  %v1383_v47 = vor.u32 %v1945_v40, %v1380_v41  ;;  %v2014_v50 = vld [vmem:[%s2598_s1 + $0x1b0] sm:$0xff]  ;;  %v1997_v52 = vld [vmem:[%s2598_s1 + $0x128] sm:$0xff]  ;;  %v2012_v58 = vld [vmem:[%s2598_s1 + $0x1a0] sm:$0xff] }
  0x12   :  { %1142 = vmatpush.bf16.msra.mxu0 %v1963_v16  ;;  %v2022_v51 = vld [vmem:[%s2598_s1 + $0x1f0] sm:$0xff]  ;;  %v2005_v53 = vld [vmem:[%s2598_s1 + $0x168] sm:$0xff]  ;;  %v2020_v59 = vld [vmem:[%s2598_s1 + $0x1e0] sm:$0xff] }
  0x13   :  { %1156 = vmatpush.bf16.msra.mxu1 %v1971_v17  ;;  %v2013_v54 = vld [vmem:[%s2598_s1 + $0x1a8] sm:$0xff]  ;;  %v1995_v60 = vld [vmem:[%s2598_s1 + $0x118] sm:$0xff]  ;;  %v1994_v0 = vld [vmem:[%s2598_s1 + $0x110] sm:$0xff] }
  0x14   :  { %1170 = vmatpush.bf16.msra.mxu2 %v1979_v18  ;;  %v2021_v55 = vld [vmem:[%s2598_s1 + $0x1e8] sm:$0xff]  ;;  %v2003_v61 = vld [vmem:[%s2598_s1 + $0x158] sm:$0xff]  ;;  %v2002_v1 = vld [vmem:[%s2598_s1 + $0x150] sm:$0xff] }
  0x15   :  { %1184 = vmatpush.bf16.msra.mxu3 %v1987_v19  ;;  %v2011_v62 = vld [vmem:[%s2598_s1 + $0x198] sm:$0xff]  ;;  %v2010_v2 = vld [vmem:[%s2598_s1 + $0x190] sm:$0xff]  ;;  %v1993_v4 = vld [vmem:[%s2598_s1 + $0x108] sm:$0xff] }
  0x16   :  { %1143 = vmatpush.bf16.msra.mxu0 %v1962_v20  ;;  %v2019_v63 = vld [vmem:[%s2598_s1 + $0x1d8] sm:$0xff]  ;;  %v2018_v3 = vld [vmem:[%s2598_s1 + $0x1d0] sm:$0xff]  ;;  %v2001_v5 = vld [vmem:[%s2598_s1 + $0x148] sm:$0xff] }
  0x17   :  { %1157 = vmatpush.bf16.msra.mxu1 %v1970_v21  ;;  %v2009_v6 = vld [vmem:[%s2598_s1 + $0x188] sm:$0xff]  ;;  %v1992_v8 = vld [vmem:[%s2598_s1 + $0x100] sm:$0xff]  ;;  %v2031_v12 = vld [vmem:[%s2598_s1 + $0x238] sm:$0xff] }
  0x18   :  { %1171 = vmatpush.bf16.msra.mxu2 %v1978_v22  ;;  %v2017_v7 = vld [vmem:[%s2598_s1 + $0x1c8] sm:$0xff]  ;;  %v2000_v9 = vld [vmem:[%s2598_s1 + $0x140] sm:$0xff]  ;;  %v2039_v13 = vld [vmem:[%s2598_s1 + $0x278] sm:$0xff] }
  0x19   :  { %1185 = vmatpush.bf16.msra.mxu3 %v1986_v23  ;;  %v2008_v10 = vld [vmem:[%s2598_s1 + $0x180] sm:$0xff]  ;;  %v1386_v14 = vld [vmem:[%s2600_s0 + $0x10] sm:$0xf]  ;;  %v1394_v16 = vld [vmem:[%s2600_s0 + $0x18] sm:$0xf] }
  0x1a   :  { %1144 = vmatpush.bf16.msra.mxu0 %v1961_v24  ;;  %v2016_v11 = vld [vmem:[%s2598_s1 + $0x1c0] sm:$0xff]  ;;  %v1954_v15 = vld [vmem:[%s2600_s0 + $0x4c] sm:$0xf0]  ;;  %v1955_v17 = vld [vmem:[%s2600_s0 + $0x54] sm:$0xf0] }
  0x1b   :  { %1158 = vmatpush.bf16.msra.mxu1 %v1969_v25  ;;  %v1946_v18 = vld [vmem:[%s2600_s0 + $0x14] sm:$0xf]  ;;  %v1947_v20 = vld [vmem:[%s2600_s0 + $0x1c] sm:$0xf]  ;;  %v1387_v24 = vor.u32 %v1954_v15, %v1386_v14  ;;  %v1395_v25 = vor.u32 %v1955_v17, %v1394_v16  ;;  %v2045_v34 = vld [vmem:[%s2598_s1 + $0x2a8] sm:$0xff] }
  0x1c   :  { %1172 = vmatpush.bf16.msra.mxu2 %v1977_v26  ;;  %v1388_v19 = vld [vmem:[%s2600_s0 + $0x50] sm:$0xf0]  ;;  %v1396_v21 = vld [vmem:[%s2600_s0 + $0x58] sm:$0xf0]  ;;  %v2053_v35 = vld [vmem:[%s2598_s1 + $0x2e8] sm:$0xff] }
  0x1d   :  { %1186 = vmatpush.bf16.msra.mxu3 %v1985_v27  ;;  %v2047_v22 = vld [vmem:[%s2598_s1 + $0x2b8] sm:$0xff]  ;;  %v1391_v26 = vor.u32 %v1946_v18, %v1388_v19  ;;  %v1399_v27 = vor.u32 %v1947_v20, %v1396_v21  ;;  %v2028_v36 = vld [vmem:[%s2598_s1 + $0x220] sm:$0xff]  ;;  %v2077_v14 = vld [vmem:[%s2598_s1 + $0x3a8] sm:$0xff] }
  0x1e   :  { %1145 = vmatpush.bf16.msra.mxu0 %v1960_v28  ;;  %v2055_v23 = vld [vmem:[%s2598_s1 + $0x2f8] sm:$0xff]  ;;  %v2030_v28 = vld [vmem:[%s2598_s1 + $0x230] sm:$0xff]  ;;  %v2036_v37 = vld [vmem:[%s2598_s1 + $0x260] sm:$0xff] }
  0x1f   :  { %1159 = vmatpush.bf16.msra.mxu1 %v1968_v29  ;;  %v2038_v29 = vld [vmem:[%s2598_s1 + $0x270] sm:$0xff]  ;;  %v2044_v38 = vld [vmem:[%s2598_s1 + $0x2a0] sm:$0xff]  ;;  %v2027_v40 = vld [vmem:[%s2598_s1 + $0x218] sm:$0xff] }
  0x20   :  { %1173 = vmatpush.bf16.msra.mxu2 %v1976_v30  ;;  %v2046_v30 = vld [vmem:[%s2598_s1 + $0x2b0] sm:$0xff]  ;;  %v2052_v39 = vld [vmem:[%s2598_s1 + $0x2e0] sm:$0xff]  ;;  %v2035_v41 = vld [vmem:[%s2598_s1 + $0x258] sm:$0xff] }
  0x21   :  { %1187 = vmatpush.bf16.msra.mxu3 %v1984_v31  ;;  %1146 = vmatmul.bf16.vlgmr.msra.gmra.mxu0 %v1371_v44  ;;  %v2054_v31 = vld [vmem:[%s2598_s1 + $0x2f0] sm:$0xff]  ;;  %v2085_v15 = vld [vmem:[%s2598_s1 + $0x3e8] sm:$0xff]  ;;  %v2060_v16 = vld [vmem:[%s2598_s1 + $0x320] sm:$0xff] }
  0x22   :  { %1194 = vmatpush.bf16.msrb.mxu0 %v1999_v32  ;;  %1160 = vmatmul.bf16.vlgmr.msra.gmra.mxu1 %v1375_v46  ;;  %v2029_v32 = vld [vmem:[%s2598_s1 + $0x228] sm:$0xff]  ;;  %v2026_v44 = vld [vmem:[%s2598_s1 + $0x210] sm:$0xff]  ;;  %v2068_v17 = vld [vmem:[%s2598_s1 + $0x360] sm:$0xff] }
  0x23   :  { %1208 = vmatpush.bf16.msrb.mxu1 %v2007_v33  ;;  %1174 = vmatmul.bf16.vlgmr.msra.gmra.mxu2 %v1379_v45  ;;  %v2037_v33 = vld [vmem:[%s2598_s1 + $0x268] sm:$0xff]  ;;  %v2034_v45 = vld [vmem:[%s2598_s1 + $0x250] sm:$0xff]  ;;  %v2076_v18 = vld [vmem:[%s2598_s1 + $0x3a0] sm:$0xff] }
  0x24   :  { %1222 = vmatpush.bf16.msrb.mxu2 %v2015_v42  ;;  %1188 = vmatmul.bf16.vlgmr.msra.gmra.mxu3 %v1383_v47  ;;  %v2043_v42 = vld [vmem:[%s2598_s1 + $0x298] sm:$0xff]  ;;  %v2042_v46 = vld [vmem:[%s2598_s1 + $0x290] sm:$0xff]  ;;  %v2084_v19 = vld [vmem:[%s2598_s1 + $0x3e0] sm:$0xff] }
  0x25   :  { %1236 = vmatpush.bf16.msrb.mxu3 %v2023_v43  ;;  %v2051_v43 = vld [vmem:[%s2598_s1 + $0x2d8] sm:$0xff]  ;;  %v2050_v47 = vld [vmem:[%s2598_s1 + $0x2d0] sm:$0xff] }
  0x26   :  { %1195 = vmatpush.bf16.msrb.mxu0 %v1998_v48  ;;  %v2025_v48 = vld [vmem:[%s2598_s1 + $0x208] sm:$0xff]  ;;  %v2059_v20 = vld [vmem:[%s2598_s1 + $0x318] sm:$0xff] }
  0x27   :  { %1209 = vmatpush.bf16.msrb.mxu1 %v2006_v49  ;;  %v2033_v49 = vld [vmem:[%s2598_s1 + $0x248] sm:$0xff]  ;;  %v2067_v21 = vld [vmem:[%s2598_s1 + $0x358] sm:$0xff] }
  0x28   :  { %1223 = vmatpush.bf16.msrb.mxu2 %v2014_v50  ;;  %v2041_v50 = vld [vmem:[%s2598_s1 + $0x288] sm:$0xff] }
  0x29   :  { %1237 = vmatpush.bf16.msrb.mxu3 %v2022_v51  ;;  %v2049_v51 = vld [vmem:[%s2598_s1 + $0x2c8] sm:$0xff] }
  0x2a   :  { %1196 = vmatpush.bf16.msrb.mxu0 %v1997_v52  ;;  %v2024_v52 = vld [vmem:[%s2598_s1 + $0x200] sm:$0xff] }
  0x2b   :  { %1210 = vmatpush.bf16.msrb.mxu1 %v2005_v53  ;;  %v2032_v53 = vld [vmem:[%s2598_s1 + $0x240] sm:$0xff] }
  0x2c   :  { %1224 = vmatpush.bf16.msrb.mxu2 %v2013_v54  ;;  %v2040_v54 = vld [vmem:[%s2598_s1 + $0x280] sm:$0xff] }
  0x2d   :  { %1238 = vmatpush.bf16.msrb.mxu3 %v2021_v55  ;;  %v2048_v55 = vld [vmem:[%s2598_s1 + $0x2c0] sm:$0xff] }
  0x2e   :  { %1197 = vmatpush.bf16.msrb.mxu0 %v1996_v56  ;;  %v2063_v56 = vld [vmem:[%s2598_s1 + $0x338] sm:$0xff] }
  0x2f   :  { %1211 = vmatpush.bf16.msrb.mxu1 %v2004_v57  ;;  %v2071_v57 = vld [vmem:[%s2598_s1 + $0x378] sm:$0xff] }
  0x30   :  { %1225 = vmatpush.bf16.msrb.mxu2 %v2012_v58  ;;  %v1402_v58 = vld [vmem:[%s2600_s0 + $0x20] sm:$0xf] }
  0x31   :  { %1239 = vmatpush.bf16.msrb.mxu3 %v2020_v59  ;;  %v1956_v59 = vld [vmem:[%s2600_s0 + $0x5c] sm:$0xf0] }
  0x32   :  { %1198 = vmatpush.bf16.msrb.mxu0 %v1995_v60  ;;  %v1410_v60 = vld [vmem:[%s2600_s0 + $0x28] sm:$0xf] }
  0x33   :  { %1212 = vmatpush.bf16.msrb.mxu1 %v2003_v61  ;;  %v1957_v61 = vld [vmem:[%s2600_s0 + $0x64] sm:$0xf0] }
  0x34   :  { %1226 = vmatpush.bf16.msrb.mxu2 %v2011_v62  ;;  %v1948_v62 = vld [vmem:[%s2600_s0 + $0x24] sm:$0xf] }
  0x35   :  { %1240 = vmatpush.bf16.msrb.mxu3 %v2019_v63  ;;  %v1404_v63 = vld [vmem:[%s2600_s0 + $0x60] sm:$0xf0] }
  0x36   :  { %1199 = vmatpush.bf16.msrb.mxu0 %v1994_v0  ;;  %v1949_v0 = vld [vmem:[%s2600_s0 + $0x2c] sm:$0xf] }
  0x37   :  { %1213 = vmatpush.bf16.msrb.mxu1 %v2002_v1  ;;  %v1412_v1 = vld [vmem:[%s2600_s0 + $0x68] sm:$0xf0] }
  0x38   :  { %1227 = vmatpush.bf16.msrb.mxu2 %v2010_v2  ;;  %v2079_v2 = vld [vmem:[%s2598_s1 + $0x3b8] sm:$0xff] }
  0x39   :  { %1241 = vmatpush.bf16.msrb.mxu3 %v2018_v3  ;;  %v2087_v3 = vld [vmem:[%s2598_s1 + $0x3f8] sm:$0xff] }
  0x3a   :  { %1200 = vmatpush.bf16.msrb.mxu0 %v1993_v4  ;;  %v1403_v4 = vor.u32 %v1956_v59, %v1402_v58 }
  0x3b   :  { %1214 = vmatpush.bf16.msrb.mxu1 %v2001_v5  ;;  %v1411_v5 = vor.u32 %v1957_v61, %v1410_v60 }
  0x3c   :  { %1228 = vmatpush.bf16.msrb.mxu2 %v2009_v6  ;;  %v1407_v6 = vor.u32 %v1948_v62, %v1404_v63 }
  0x3d   :  { %1242 = vmatpush.bf16.msrb.mxu3 %v2017_v7  ;;  %v1415_v7 = vor.u32 %v1949_v0, %v1412_v1 }
  0x3e   :  { %1201 = vmatpush.bf16.msrb.mxu0 %v1992_v8  ;;  %v2062_v8 = vld [vmem:[%s2598_s1 + $0x330] sm:$0xff] }
  0x3f   :  { %1215 = vmatpush.bf16.msrb.mxu1 %v2000_v9  ;;  %v2070_v9 = vld [vmem:[%s2598_s1 + $0x370] sm:$0xff] }
  0x40   :  { %1229 = vmatpush.bf16.msrb.mxu2 %v2008_v10  ;;  %v2078_v10 = vld [vmem:[%s2598_s1 + $0x3b0] sm:$0xff] }
  0x41   :  { %1243 = vmatpush.bf16.msrb.mxu3 %v2016_v11  ;;  %1202 = vmatmul.bf16.vlgmr.msrb.gmra.mxu0 %v1387_v24  ;;  %v2086_v11 = vld [vmem:[%s2598_s1 + $0x3f0] sm:$0xff] }
  0x42   :  { %1250 = vmatpush.bf16.msra.mxu0 %v2031_v12  ;;  %1216 = vmatmul.bf16.vlgmr.msrb.gmra.mxu1 %v1391_v26  ;;  %v2061_v12 = vld [vmem:[%s2598_s1 + $0x328] sm:$0xff]  ;;  %v2058_v24 = vld [vmem:[%s2598_s1 + $0x310] sm:$0xff] }
  0x43   :  { %1264 = vmatpush.bf16.msra.mxu1 %v2039_v13  ;;  %1230 = vmatmul.bf16.vlgmr.msrb.gmra.mxu2 %v1395_v25  ;;  %v2069_v13 = vld [vmem:[%s2598_s1 + $0x368] sm:$0xff]  ;;  %v2066_v25 = vld [vmem:[%s2598_s1 + $0x350] sm:$0xff] }
  0x44   :  { %1278 = vmatpush.bf16.msra.mxu2 %v2047_v22  ;;  %1244 = vmatmul.bf16.vlgmr.msrb.gmra.mxu3 %v1399_v27  ;;  %v2075_v22 = vld [vmem:[%s2598_s1 + $0x398] sm:$0xff]  ;;  %v2074_v26 = vld [vmem:[%s2598_s1 + $0x390] sm:$0xff] }
  0x45   :  { %1292 = vmatpush.bf16.msra.mxu3 %v2055_v23  ;;  %v2083_v23 = vld [vmem:[%s2598_s1 + $0x3d8] sm:$0xff]  ;;  %v2082_v27 = vld [vmem:[%s2598_s1 + $0x3d0] sm:$0xff] }
  0x46   :  { %1251 = vmatpush.bf16.msra.mxu0 %v2030_v28  ;;  %v2057_v28 = vld [vmem:[%s2598_s1 + $0x308] sm:$0xff] }
  0x47   :  { %1265 = vmatpush.bf16.msra.mxu1 %v2038_v29  ;;  %v2065_v29 = vld [vmem:[%s2598_s1 + $0x348] sm:$0xff] }
  0x48   :  { %1279 = vmatpush.bf16.msra.mxu2 %v2046_v30  ;;  %v2073_v30 = vld [vmem:[%s2598_s1 + $0x388] sm:$0xff] }
  0x49   :  { %1293 = vmatpush.bf16.msra.mxu3 %v2054_v31  ;;  %v2081_v31 = vld [vmem:[%s2598_s1 + $0x3c8] sm:$0xff] }
  0x4a   :  { %1252 = vmatpush.bf16.msra.mxu0 %v2029_v32  ;;  %v2056_v32 = vld [vmem:[%s2598_s1 + $0x300] sm:$0xff] }
  0x4b   :  { %1266 = vmatpush.bf16.msra.mxu1 %v2037_v33  ;;  %v2064_v33 = vld [vmem:[%s2598_s1 + $0x340] sm:$0xff] }
  0x4c   :  { %1280 = vmatpush.bf16.msra.mxu2 %v2045_v34  ;;  %v2072_v34 = vld [vmem:[%s2598_s1 + $0x380] sm:$0xff] }
  0x4d   :  { %1294 = vmatpush.bf16.msra.mxu3 %v2053_v35  ;;  %v2080_v35 = vld [vmem:[%s2598_s1 + $0x3c0] sm:$0xff] }
  0x4e   :  { %1253 = vmatpush.bf16.msra.mxu0 %v2028_v36  ;;  %v1418_v36 = vld [vmem:[%s2600_s0 + $0x30] sm:$0xf] }
  0x4f   :  { %1267 = vmatpush.bf16.msra.mxu1 %v2036_v37  ;;  %v1958_v37 = vld [vmem:[%s2600_s0 + $0x6c] sm:$0xf0] }
  0x50   :  { %1281 = vmatpush.bf16.msra.mxu2 %v2044_v38  ;;  %v1950_v38 = vld [vmem:[%s2600_s0 + $0x34] sm:$0xf] }
  0x51   :  { %1295 = vmatpush.bf16.msra.mxu3 %v2052_v39  ;;  %v1420_v39 = vld [vmem:[%s2600_s0 + $0x70] sm:$0xf0] }
  0x52   :  { %1254 = vmatpush.bf16.msra.mxu0 %v2027_v40  ;;  %v1426_v40 = vld [vmem:[%s2600_s0 + $0x38] sm:$0xf] }
  0x53   :  { %1268 = vmatpush.bf16.msra.mxu1 %v2035_v41  ;;  %v1959_v41 = vld [vmem:[%s2600_s0 + $0x74] sm:$0xf0] }
  0x54   :  { %1282 = vmatpush.bf16.msra.mxu2 %v2043_v42  ;;  %v1951_v42 = vld [vmem:[%s2600_s0 + $0x3c] sm:$0xf] }
  0x55   :  { %1296 = vmatpush.bf16.msra.mxu3 %v2051_v43  ;;  %v1428_v43 = vld [vmem:[%s2600_s0 + $0x78] sm:$0xf0] }
  0x56   :  { %1255 = vmatpush.bf16.msra.mxu0 %v2026_v44  ;;  %v1419_v44 = vor.u32 %v1958_v37, %v1418_v36 }
  0x57   :  { %1269 = vmatpush.bf16.msra.mxu1 %v2034_v45  ;;  %v1423_v45 = vor.u32 %v1950_v38, %v1420_v39 }
  0x58   :  { %1283 = vmatpush.bf16.msra.mxu2 %v2042_v46  ;;  %v1427_v46 = vor.u32 %v1959_v41, %v1426_v40 }
  0x59   :  { %1297 = vmatpush.bf16.msra.mxu3 %v2050_v47  ;;  %v1431_v47 = vor.u32 %v1951_v42, %v1428_v43 }
  0x5a   :  { %1256 = vmatpush.bf16.msra.mxu0 %v2025_v48 }
  0x5b   :  { %1270 = vmatpush.bf16.msra.mxu1 %v2033_v49 }
  0x5c   :  { %1284 = vmatpush.bf16.msra.mxu2 %v2041_v50 }
  0x5d   :  { %1298 = vmatpush.bf16.msra.mxu3 %v2049_v51 }
  0x5e   :  { %1257 = vmatpush.bf16.msra.mxu0 %v2024_v52 }
  0x5f   :  { %1271 = vmatpush.bf16.msra.mxu1 %v2032_v53  ;;  %v2088_v53 = vld [vmem:[%s2599_s2] ss:$0 sm:$0xff] }
  0x60   :  { %1285 = vmatpush.bf16.msra.mxu2 %v2040_v54 }
  0x61   :  { %1299 = vmatpush.bf16.msra.mxu3 %v2048_v55  ;;  %1258 = vmatmul.bf16.vlgmr.msra.gmra.mxu0 %v1403_v4 }
  0x62   :  { %1306 = vmatpush.bf16.msrb.mxu0 %v2063_v56  ;;  %1272 = vmatmul.bf16.vlgmr.msra.gmra.mxu1 %v1407_v6 }
  0x63   :  { %1320 = vmatpush.bf16.msrb.mxu1 %v2071_v57  ;;  %1286 = vmatmul.bf16.vlgmr.msra.gmra.mxu2 %v1411_v5 }
  0x64   :  { %1334 = vmatpush.bf16.msrb.mxu2 %v2079_v2  ;;  %1300 = vmatmul.bf16.vlgmr.msra.gmra.mxu3 %v1415_v7 }
  0x65   :  { %1348 = vmatpush.bf16.msrb.mxu3 %v2087_v3 }
  0x66   :  { %1307 = vmatpush.bf16.msrb.mxu0 %v2062_v8 }
  0x67   :  { %1321 = vmatpush.bf16.msrb.mxu1 %v2070_v9 }
  0x68   :  { %1335 = vmatpush.bf16.msrb.mxu2 %v2078_v10 }
  0x69   :  { %1349 = vmatpush.bf16.msrb.mxu3 %v2086_v11 }
  0x6a   :  { %1308 = vmatpush.bf16.msrb.mxu0 %v2061_v12 }
  0x6b   :  { %1322 = vmatpush.bf16.msrb.mxu1 %v2069_v13 }
  0x6c   :  { %1336 = vmatpush.bf16.msrb.mxu2 %v2077_v14 }
  0x6d   :  { %1350 = vmatpush.bf16.msrb.mxu3 %v2085_v15 }
  0x6e   :  { %1309 = vmatpush.bf16.msrb.mxu0 %v2060_v16 }
  0x6f   :  { %1323 = vmatpush.bf16.msrb.mxu1 %v2068_v17 }
  0x70   :  { %1337 = vmatpush.bf16.msrb.mxu2 %v2076_v18 }
  0x71   :  { %1351 = vmatpush.bf16.msrb.mxu3 %v2084_v19 }
  0x72   :  { %1310 = vmatpush.bf16.msrb.mxu0 %v2059_v20 }
  0x73   :  { %1324 = vmatpush.bf16.msrb.mxu1 %v2067_v21 }
  0x74   :  { %1338 = vmatpush.bf16.msrb.mxu2 %v2075_v22 }
  0x75   :  { %1352 = vmatpush.bf16.msrb.mxu3 %v2083_v23 }
  0x76   :  { %1311 = vmatpush.bf16.msrb.mxu0 %v2058_v24 }
  0x77   :  { %1325 = vmatpush.bf16.msrb.mxu1 %v2066_v25 }
  0x78   :  { %1339 = vmatpush.bf16.msrb.mxu2 %v2074_v26 }
  0x79   :  { %1353 = vmatpush.bf16.msrb.mxu3 %v2082_v27 }
  0x7a   :  { %1312 = vmatpush.bf16.msrb.mxu0 %v2057_v28 }
  0x7b   :  { %1326 = vmatpush.bf16.msrb.mxu1 %v2065_v29 }
  0x7c   :  { %1340 = vmatpush.bf16.msrb.mxu2 %v2073_v30 }
  0x7d   :  { %1354 = vmatpush.bf16.msrb.mxu3 %v2081_v31 }
  0x7e   :  { %1313 = vmatpush.bf16.msrb.mxu0 %v2056_v32 }
  0x7f   :  { %1327 = vmatpush.bf16.msrb.mxu1 %v2064_v33 }
  0x80   :  { %1341 = vmatpush.bf16.msrb.mxu2 %v2072_v34 }
  0x81   :  { %1355 = vmatpush.bf16.msrb.mxu3 %v2080_v35  ;;  %1314 = vmatmul.bf16.vlgmr.msrb.gmra.mxu0 %v1419_v44 }
  0x82   :  { %1328 = vmatmul.bf16.vlgmr.msrb.gmra.mxu1 %v1423_v45 }
  0x83   :  { %1342 = vmatmul.bf16.vlgmr.msrb.gmra.mxu2 %v1427_v46 }
  0x84   :  { %1356 = vmatmul.bf16.vlgmr.msrb.gmra.mxu3 %v1431_v47 }
  0x9e   :  { %v1147_v48 = vpop.f32.mrf.mxu0 }
  0x9f   :  { %v1161_v49 = vpop.f32.mrf.mxu1  ;;  %v1148_v55 = vadd.f32 %v2088_v53, %v1147_v48 }
  0xa1   :  { %v1162_v58 = vadd.f32 %v1161_v49, %v1148_v55 }
  0xa6   :  { %v1175_v50 = vpop.f32.mrf.mxu2  ;;  %v1149_v52 = vpop.f32.mrf.mxu0 }
  0xa7   :  { %v1189_v51 = vpop.f32.mrf.mxu3  ;;  %v1163_v54 = vpop.f32.mrf.mxu1  ;;  %v1176_v61 = vadd.f32 %v1175_v50, %v1162_v58  ;;  %v1150_v62 = vadd.f32 %v2088_v53, %v1149_v52 }
  0xa9   :  { %v1190_v1 = vadd.f32 %v1189_v51, %v1176_v61  ;;  %v1164_v2 = vadd.f32 %v1163_v54, %v1150_v62 }
  0xae   :  { %v1177_v56 = vpop.f32.mrf.mxu2 }
  0xaf   :  { %v1191_v57 = vpop.f32.mrf.mxu3  ;;  %v1178_v6 = vadd.f32 %v1177_v56, %v1164_v2 }
  0xb1   :  { %v1192_v10 = vadd.f32 %v1191_v57, %v1178_v6 }
  0xbe   :  { %v1203_v59 = vpop.f32.mrf.mxu0 }
  0xbf   :  { %v1217_v60 = vpop.f32.mrf.mxu1  ;;  %v1204_v4 = vadd.f32 %v1203_v59, %v1190_v1 }
  0xc1   :  { %v1218_v7 = vadd.f32 %v1217_v60, %v1204_v4 }
  0xc6   :  { %v1231_v63 = vpop.f32.mrf.mxu2  ;;  %v1205_v3 = vpop.f32.mrf.mxu0 }
  0xc7   :  { %v1245_v0 = vpop.f32.mrf.mxu3  ;;  %v1219_v5 = vpop.f32.mrf.mxu1  ;;  %v1232_v12 = vadd.f32 %v1231_v63, %v1218_v7  ;;  %v1206_v14 = vadd.f32 %v1205_v3, %v1192_v10 }
  0xc9   :  { %v1246_v15 = vadd.f32 %v1245_v0, %v1232_v12  ;;  %v1220_v18 = vadd.f32 %v1219_v5, %v1206_v14 }
  0xce   :  { %v1233_v8 = vpop.f32.mrf.mxu2 }
  0xcf   :  { %v1247_v9 = vpop.f32.mrf.mxu3  ;;  %v1234_v20 = vadd.f32 %v1233_v8, %v1220_v18 }
  0xd1   :  { %v1248_v24 = vadd.f32 %v1247_v9, %v1234_v20 }
  0xde   :  { %v1259_v11 = vpop.f32.mrf.mxu0 }
  0xdf   :  { %v1273_v13 = vpop.f32.mrf.mxu1  ;;  %v1260_v19 = vadd.f32 %v1259_v11, %v1246_v15 }
  0xe1   :  { %v1274_v22 = vadd.f32 %v1273_v13, %v1260_v19 }
  0xe6   :  { %v1287_v16 = vpop.f32.mrf.mxu2  ;;  %v1261_v21 = vpop.f32.mrf.mxu0 }
  0xe7   :  { %v1301_v17 = vpop.f32.mrf.mxu3  ;;  %v1275_v23 = vpop.f32.mrf.mxu1  ;;  %v1288_v25 = vadd.f32 %v1287_v16, %v1274_v22  ;;  %v1262_v26 = vadd.f32 %v1261_v21, %v1248_v24 }
  0xe9   :  { %v1302_v29 = vadd.f32 %v1301_v17, %v1288_v25  ;;  %v1276_v31 = vadd.f32 %v1275_v23, %v1262_v26 }
  0xee   :  { %v1289_v27 = vpop.f32.mrf.mxu2 }
  0xef   :  { %v1303_v28 = vpop.f32.mrf.mxu3  ;;  %v1290_v34 = vadd.f32 %v1289_v27, %v1276_v31 }
  0xf1   :  { %v1304_v38 = vadd.f32 %v1303_v28, %v1290_v34 }
  0xfe   :  { %v1315_v30 = vpop.f32.mrf.mxu0 }
  0xff   :  { %v1316_v32 = vadd.f32 %v1315_v30, %v1302_v29  ;;  %v1329_v33 = vpop.f32.mrf.mxu1 }
 0x101   :  { %v1330_v35 = vadd.f32 %v1329_v33, %v1316_v32 }
 0x106   :  { %v1343_v36 = vpop.f32.mrf.mxu2  ;;  %v1317_v40 = vpop.f32.mrf.mxu0 }
 0x107   :  { %v1357_v37 = vpop.f32.mrf.mxu3  ;;  %v1344_v39 = vadd.f32 %v1343_v36, %v1330_v35  ;;  %v1318_v42 = vadd.f32 %v1317_v40, %v1304_v38  ;;  %v1331_v43 = vpop.f32.mrf.mxu1 }
 0x109   :  { %v1358_v41 = vadd.f32 %v1357_v37, %v1344_v39  ;;  %v1332_v44 = vadd.f32 %v1331_v43, %v1318_v42 }
 0x10b   :  { %1362 = vst [vmem:[%s2601_s3] sm:$0xff] %v1358_v41 }
 0x10e   :  { %v1345_v45 = vpop.f32.mrf.mxu2 }
 0x10f   :  { %v1346_v46 = vadd.f32 %v1345_v45, %v1332_v44  ;;  %v1359_v47 = vpop.f32.mrf.mxu3 }
 0x111   :  { %v1360_v48 = vadd.f32 %v1359_v47, %v1346_v46 }
 0x113   :  { %1363 = vst [vmem:[%s2601_s3 + $0x8] sm:$0xff] %v1360_v48 }

</bundles_post_ra>
